<compile_context>
chip_gen: v5e
topology: v5e:2x2
jax: 0.10.0
libtpu: 0.0.40
codegen_flags: <defaults>
</compile_context>

<pallas_src>
import functools

import jax
import jax.numpy as jnp
from jax.experimental import pallas as pl
from jax.experimental.pallas import tpu as pltpu

# ---- model dims --------------------------------------------------------------
IN_F = 28 * 28          # 784 (true K of fc1 and N of fc4 -- kept unpadded)
HID = 400
HID_P = 512             # 4 * 128 (lane-aligned hidden width)
ML_W = 8                # packed mu||logvar / eps / z lane width (>= 2 * z_dim)
# packed bias layout (lane-aligned slot starts):
#   [ b1 (512) | b_mu_lv (slot 128, uses ML_W) | b3 (512) | b4 (784) | pad ]
B1_OFF = 0
BML_OFF = HID_P                      # 512
B3_OFF = HID_P + 128                 # 640
B4_OFF = HID_P + 128 + HID_P         # 1152 (multiple of 128)
B_TOT = 2048


def _round_up(n, m):
    return ((n + m - 1) // m) * m


def _vae_kernel(x_ref, eps_ref, w1_ref, wml_ref, w3_ref, w4_ref, b_ref,
                recon_ref, mulv_ref, *, z_dim):
    """One batch tile of the full VAE forward (encode + reparam + decode)."""
    # lane-aligned static slices of the packed bias buffer
    b1 = b_ref[:, B1_OFF:B1_OFF + HID_P]          # (1, 512)
    b_ml = b_ref[:, BML_OFF:BML_OFF + ML_W]       # (1, 8)
    b3 = b_ref[:, B3_OFF:B3_OFF + HID_P]          # (1, 512)
    b4 = b_ref[:, B4_OFF:B4_OFF + IN_F]           # (1, 784)

    # ---- encode: fc1 + relu (x cast to bf16 in-kernel; f32 accumulation) ----
    x = x_ref[...].astype(jnp.bfloat16)                          # (TB, 784)
    h1 = jnp.dot(x, w1_ref[...], preferred_element_type=jnp.float32) + b1
    h1 = jnp.maximum(h1, 0.0)                                    # (TB, 512) f32

    # ---- fused fc21/fc22: packed [mu | logvar | 0...] in 8 lanes ----
    mulv = jnp.dot(h1.astype(jnp.bfloat16), wml_ref[...],
                   preferred_element_type=jnp.float32) + b_ml    # (TB, 8) f32
    mulv_ref[...] = mulv                                         # narrow f32 store

    # ---- reparameterize (lane-packed, no per-lane extraction) ----
    # eps was pre-placed at lanes [z_dim, 2*z_dim); exp(0.5*mulv) holds std at
    # exactly those lanes, so eps * exp(0.5*mulv) = eps_j * std_j there, 0 elsewhere.
    lane = jax.lax.broadcasted_iota(jnp.int32, (1, ML_W), 1)     # (1, 8)
    zc = jnp.where(lane < z_dim, mulv, 0.0) + eps_ref[...] * jnp.exp(0.5 * mulv)
    # zc lanes: [0,z_dim) = mu_j ; [z_dim,2*z_dim) = eps_j*std_j ; rest = 0.

    # ---- fc3 + relu: w3p has w3[j] at rows j AND z_dim+j => zc @ w3p == z @ w3 ----
    h3 = jnp.dot(zc.astype(jnp.bfloat16), w3_ref[...],
                 preferred_element_type=jnp.float32) + b3        # (TB, 512) f32
    h3 = jnp.maximum(h3, 0.0)

    # ---- decode: fc4 + sigmoid, bf16 store (dominant HBM write halved) ----
    logits = jnp.dot(h3.astype(jnp.bfloat16), w4_ref[...],
                     preferred_element_type=jnp.float32) + b4    # (TB, 784) f32
    recon_ref[...] = jax.nn.sigmoid(logits).astype(jnp.bfloat16)


@functools.partial(jax.jit, static_argnames=("z_dim",))
def vae_forward(x_nchw, eps, packed, *, z_dim=2):
    """x_nchw: (B, 1, 28, 28) f32.  eps: (B, z_dim) f32 (== torch.randn_like(std)).

    Returns (recon (B, 784) bf16, mu (B, z_dim) f32, logvar (B, z_dim) f32).
    """
    assert 2 * z_dim <= ML_W
    B = x_nchw.shape[0]
    x = x_nchw.reshape(B, IN_F).astype(jnp.float32)

    # >=2 grid steps for B >= 16 (v7x dual TensorCore), capped at 512 rows/tile.
    TB = min(512, _round_up(max(1, -(-B // 2)), 8))
    PB = _round_up(B, TB)
    grid = (PB // TB,)

    if PB != B:
        x = jnp.pad(x, ((0, PB - B), (0, 0)))

    # eps placed at lanes [z_dim, 2*z_dim) of an 8-lane stream (zeros elsewhere).
    eps_p = jnp.zeros((PB, ML_W), jnp.float32)
    eps_p = eps_p.at[:B, z_dim:2 * z_dim].set(eps.astype(jnp.float32))

    args = (x, eps_p, packed["w1"], packed["wml"], packed["w3"], packed["w4"],
            packed["bias"])

    in_bytes = sum(int(a.size) * a.dtype.itemsize for a in args)
    out_bytes = PB * IN_F * 2 + PB * ML_W * 4
    cost = pl.CostEstimate(
        flops=2 * PB * (IN_F * HID_P + HID_P * ML_W + ML_W * HID_P + HID_P * IN_F),
        transcendentals=PB * (ML_W + IN_F),
        bytes_accessed=in_bytes + out_bytes,
    )

    recon_pad, mulv = pl.pallas_call(
        functools.partial(_vae_kernel, z_dim=z_dim),
        out_shape=(
            jax.ShapeDtypeStruct((PB, IN_F), jnp.bfloat16),
            jax.ShapeDtypeStruct((PB, ML_W), jnp.float32),
        ),
        grid=grid,
        in_specs=[
            pl.BlockSpec((TB, IN_F), lambda i: (i, 0)),        # x tile (f32)
            pl.BlockSpec((TB, ML_W), lambda i: (i, 0)),        # eps tile
            pl.BlockSpec((IN_F, HID_P), lambda i: (0, 0)),     # w1   (resident)
            pl.BlockSpec((HID_P, ML_W), lambda i: (0, 0)),     # w21||w22
            pl.BlockSpec((ML_W, HID_P), lambda i: (0, 0)),     # w3 (duplicated rows)
            pl.BlockSpec((HID_P, IN_F), lambda i: (0, 0)),     # w4
            pl.BlockSpec((1, B_TOT), lambda i: (0, 0)),        # packed biases
        ],
        out_specs=(
            pl.BlockSpec((TB, IN_F), lambda i: (i, 0)),        # recon tile (bf16)
            pl.BlockSpec((TB, ML_W), lambda i: (i, 0)),        # packed mu||logvar
        ),
        compiler_params=pltpu.CompilerParams(
            dimension_semantics=("parallel",),
            vmem_limit_bytes=48 * 1024 * 1024,
        ),
        cost_estimate=cost,
    )(*args)

    recon = recon_pad if PB == B else recon_pad[:B]
    mu = mulv[:B, :z_dim]
    logvar = mulv[:B, z_dim:2 * z_dim]
    return recon, mu, logvar


# ---- parameter construction --------------------------------------------------
def init_params(key, z_dim=2):
    """Raw f32 params, nn.Linear-style init (uniform +-1/sqrt(fan_in)).
    Weights stored (in_features, out_features); biases 1-D (out,)."""
    def linear(key, fan_in, fan_out):
        kw, kb = jax.random.split(key)
        bound = 1.0 / jnp.sqrt(fan_in)
        w = jax.random.uniform(kw, (fan_in, fan_out), jnp.float32, -bound, bound)
        b = jax.random.uniform(kb, (fan_out,), jnp.float32, -bound, bound)
        return w, b

    k1, k21, k22, k3, k4 = jax.random.split(key, 5)
    w1, b1 = linear(k1, IN_F, HID)
    w21, b21 = linear(k21, HID, z_dim)
    w22, b22 = linear(k22, HID, z_dim)
    w3, b3 = linear(k3, z_dim, HID)
    w4, b4 = linear(k4, HID, IN_F)
    return dict(w1=w1, b1=b1, w21=w21, b21=b21, w22=w22, b22=b22,
                w3=w3, b3=b3, w4=w4, b4=b4)


def pack_params(p, z_dim=2):
    """One-time repack: lane-aligned hidden dim, fused fc21/fc22, packed biases,
    bf16 MXU weights.  fc3's weight is duplicated at rows j and z_dim+j so the
    lane-packed z (mu at [0,z_dim), eps*std at [z_dim,2*z_dim)) contracts to z @ w3."""
    assert 2 * z_dim <= ML_W

    w1 = jnp.zeros((IN_F, HID_P), jnp.bfloat16)
    w1 = w1.at[:, :HID].set(p["w1"].astype(jnp.bfloat16))

    wml = jnp.zeros((HID_P, ML_W), jnp.bfloat16)
    wml = wml.at[:HID, :z_dim].set(p["w21"].astype(jnp.bfloat16))
    wml = wml.at[:HID, z_dim:2 * z_dim].set(p["w22"].astype(jnp.bfloat16))

    w3p = jnp.zeros((ML_W, HID_P), jnp.bfloat16)
    w3p = w3p.at[:z_dim, :HID].set(p["w3"].astype(jnp.bfloat16))
    w3p = w3p.at[z_dim:2 * z_dim, :HID].set(p["w3"].astype(jnp.bfloat16))

    w4 = jnp.zeros((HID_P, IN_F), jnp.bfloat16)
    w4 = w4.at[:HID, :].set(p["w4"].astype(jnp.bfloat16))

    bias = jnp.zeros((1, B_TOT), jnp.float32)
    bias = bias.at[0, B1_OFF:B1_OFF + HID].set(p["b1"])
    bias = bias.at[0, BML_OFF:BML_OFF + z_dim].set(p["b21"])
    bias = bias.at[0, BML_OFF + z_dim:BML_OFF + 2 * z_dim].set(p["b22"])
    bias = bias.at[0, B3_OFF:B3_OFF + HID].set(p["b3"])
    bias = bias.at[0, B4_OFF:B4_OFF + IN_F].set(p["b4"])

    return dict(w1=w1, wml=wml, w3=w3p, w4=w4, bias=bias)


def reference_forward(x_nchw, eps, p):
    """Pure-JAX f32 reference of the PyTorch forward."""
    B = x_nchw.shape[0]
    x = x_nchw.reshape(B, IN_F)
    h1 = jnp.maximum(x @ p["w1"] + p["b1"], 0.0)
    mu = h1 @ p["w21"] + p["b21"]
    logvar = h1 @ p["w22"] + p["b22"]
    z = mu + eps * jnp.exp(0.5 * logvar)
    h3 = jnp.maximum(z @ p["w3"] + p["b3"], 0.0)
    recon = jax.nn.sigmoid(h3 @ p["w4"] + p["b4"])
    return recon, mu, logvar


if __name__ == "__main__":
    key = jax.random.PRNGKey(0)
    k_params, k_x, k_eps = jax.random.split(key, 3)

    B, z_dim = 2, 2
    raw = init_params(k_params, z_dim=z_dim)
    packed = pack_params(raw, z_dim=z_dim)

    x = jax.random.uniform(k_x, (B, 1, 28, 28), jnp.float32)   # MNIST-like NCHW
    eps = jax.random.normal(k_eps, (B, z_dim), jnp.float32)    # torch.randn_like(std)

    recon, mu, logvar = vae_forward(x, eps, packed, z_dim=z_dim)
    jax.block_until_ready((recon, mu, logvar))

    r_ref, mu_ref, lv_ref = reference_forward(x, eps, raw)
    assert recon.shape == (B, IN_F) and mu.shape == (B, z_dim) and logvar.shape == (B, z_dim)
    # bf16 MXU operands / bf16 recon output vs f32 reference -> bf16-level tolerance.
    assert jnp.allclose(mu, mu_ref, atol=3e-2, rtol=3e-2)
    assert jnp.allclose(logvar, lv_ref, atol=3e-2, rtol=3e-2)
    assert jnp.allclose(recon.astype(jnp.float32), r_ref, atol=3e-2, rtol=3e-2)

    print("KERNEL_OK")
</pallas_src>

<mosaic_0001>
module attributes {stable_mosaic.version = 11 : i64} {
  func.func @_vae_kernel(%arg0: i32, %arg1: memref<8x784xf32, #tpu.memory_space<vmem>>, %arg2: memref<8x8xf32, #tpu.memory_space<vmem>>, %arg3: memref<784x512xbf16, #tpu.memory_space<vmem>>, %arg4: memref<512x8xbf16, #tpu.memory_space<vmem>>, %arg5: memref<8x512xbf16, #tpu.memory_space<vmem>>, %arg6: memref<512x784xbf16, #tpu.memory_space<vmem>>, %arg7: memref<1x2048xf32, #tpu.memory_space<vmem>>, %arg8: memref<8x784xbf16, #tpu.memory_space<vmem>>, %arg9: memref<8x8xf32, #tpu.memory_space<vmem>>) attributes {dimension_semantics = [#tpu.dimension_semantics<parallel>], iteration_bounds = array<i64: 1>, scalar_prefetch = 0 : i64, scratch_operands = 0 : i64, tpu.core_type = #tpu.core_type<tc>, window_params = [{transform_indices = @transform_0, window_bounds = array<i64: 8, 784>}, {transform_indices = @transform_1, window_bounds = array<i64: 8, 8>}, {pipeline_mode = #tpu.pipeline_mode<synchronous>, transform_indices = @transform_2, window_bounds = array<i64: 784, 512>}, {pipeline_mode = #tpu.pipeline_mode<synchronous>, transform_indices = @transform_3, window_bounds = array<i64: 512, 8>}, {pipeline_mode = #tpu.pipeline_mode<synchronous>, transform_indices = @transform_4, window_bounds = array<i64: 8, 512>}, {pipeline_mode = #tpu.pipeline_mode<synchronous>, transform_indices = @transform_5, window_bounds = array<i64: 512, 784>}, {pipeline_mode = #tpu.pipeline_mode<synchronous>, transform_indices = @transform_6, window_bounds = array<i64: 1, 2048>}, {transform_indices = @transform_7, window_bounds = array<i64: 8, 784>}, {transform_indices = @transform_8, window_bounds = array<i64: 8, 8>}]} {
    %c0 = arith.constant 0 : index
    %c0_0 = arith.constant 0 : index
    %0 = vector.load %arg7[%c0, %c0_0] : memref<1x2048xf32, #tpu.memory_space<vmem>>, vector<1x512xf32>
    %c0_1 = arith.constant 0 : index
    %c512 = arith.constant 512 : index
    %1 = vector.load %arg7[%c0_1, %c512] : memref<1x2048xf32, #tpu.memory_space<vmem>>, vector<1x8xf32>
    %c0_2 = arith.constant 0 : index
    %c640 = arith.constant 640 : index
    %2 = vector.load %arg7[%c0_2, %c640] : memref<1x2048xf32, #tpu.memory_space<vmem>>, vector<1x512xf32>
    %c0_3 = arith.constant 0 : index
    %c1152 = arith.constant 1152 : index
    %3 = vector.load %arg7[%c0_3, %c1152] : memref<1x2048xf32, #tpu.memory_space<vmem>>, vector<1x784xf32>
    %c0_4 = arith.constant 0 : index
    %c0_5 = arith.constant 0 : index
    %4 = vector.load %arg1[%c0_4, %c0_5] : memref<8x784xf32, #tpu.memory_space<vmem>>, vector<8x784xf32>
    %5 = arith.truncf %4 : vector<8x784xf32> to vector<8x784xbf16>
    %c0_6 = arith.constant 0 : index
    %c0_7 = arith.constant 0 : index
    %6 = vector.load %arg3[%c0_6, %c0_7] : memref<784x512xbf16, #tpu.memory_space<vmem>>, vector<784x512xbf16>
    %cst = arith.constant dense<0.000000e+00> : vector<8x512xf32>
    %7 = tpu.matmul %5, %6, %cst {dimension_numbers = #tpu.dot_dimension_numbers<[1], [0], [0], [1], [0, 0, 1, 1], [], []>} : vector<8x784xbf16>, vector<784x512xbf16>, vector<8x512xf32> -> vector<8x512xf32>
    %8 = vector.broadcast %0 : vector<1x512xf32> to vector<8x512xf32>
    %9 = arith.addf %7, %8 : vector<8x512xf32>
    %cst_8 = arith.constant 0.000000e+00 : f32
    %10 = vector.broadcast %cst_8 : f32 to vector<8x512xf32>
    %11 = arith.maximumf %9, %10 : vector<8x512xf32>
    %12 = arith.truncf %11 : vector<8x512xf32> to vector<8x512xbf16>
    %c0_9 = arith.constant 0 : index
    %c0_10 = arith.constant 0 : index
    %13 = vector.load %arg4[%c0_9, %c0_10] : memref<512x8xbf16, #tpu.memory_space<vmem>>, vector<512x8xbf16>
    %cst_11 = arith.constant dense<0.000000e+00> : vector<8x8xf32>
    %14 = tpu.matmul %12, %13, %cst_11 {dimension_numbers = #tpu.dot_dimension_numbers<[1], [0], [0], [1], [0, 0, 1, 1], [], []>} : vector<8x512xbf16>, vector<512x8xbf16>, vector<8x8xf32> -> vector<8x8xf32>
    %15 = vector.broadcast %1 : vector<1x8xf32> to vector<8x8xf32>
    %16 = arith.addf %14, %15 : vector<8x8xf32>
    %c0_12 = arith.constant 0 : index
    %c0_13 = arith.constant 0 : index
    %17 = vector.load %arg9[%c0_12, %c0_13] : memref<8x8xf32, #tpu.memory_space<vmem>>, vector<8x8xf32>
    tpu.vector_store %arg9[%c0_12, %c0_13], %16 {strides = array<i32>} : memref<8x8xf32, #tpu.memory_space<vmem>>, vector<8x8xf32>,
    %18 = tpu.iota {dimensions = array<i32: 1>} : vector<1x8xi32>
    %c2_i32 = arith.constant 2 : i32
    %19 = vector.broadcast %c2_i32 : i32 to vector<1x8xi32>
    %20 = arith.cmpi slt, %18, %19 : vector<1x8xi32>
    %cst_14 = arith.constant 0.000000e+00 : f32
    %21 = vector.shape_cast %20 : vector<1x8xi1> to vector<1x8xi1>
    %22 = vector.broadcast %21 : vector<1x8xi1> to vector<8x8xi1>
    %23 = vector.broadcast %cst_14 : f32 to vector<8x8xf32>
    %24 = arith.select %22, %16, %23 : vector<8x8xi1>, vector<8x8xf32>
    %c0_15 = arith.constant 0 : index
    %c0_16 = arith.constant 0 : index
    %25 = vector.load %arg2[%c0_15, %c0_16] : memref<8x8xf32, #tpu.memory_space<vmem>>, vector<8x8xf32>
    %cst_17 = arith.constant 5.000000e-01 : f32
    %26 = vector.broadcast %cst_17 : f32 to vector<8x8xf32>
    %27 = arith.mulf %26, %16 : vector<8x8xf32>
    %28 = math.exp %27 : vector<8x8xf32>
    %29 = arith.mulf %25, %28 : vector<8x8xf32>
    %30 = arith.addf %24, %29 : vector<8x8xf32>
    %31 = arith.truncf %30 : vector<8x8xf32> to vector<8x8xbf16>
    %c0_18 = arith.constant 0 : index
    %c0_19 = arith.constant 0 : index
    %32 = vector.load %arg5[%c0_18, %c0_19] : memref<8x512xbf16, #tpu.memory_space<vmem>>, vector<8x512xbf16>
    %cst_20 = arith.constant dense<0.000000e+00> : vector<8x512xf32>
    %33 = tpu.matmul %31, %32, %cst_20 {dimension_numbers = #tpu.dot_dimension_numbers<[1], [0], [0], [1], [0, 0, 1, 1], [], []>} : vector<8x8xbf16>, vector<8x512xbf16>, vector<8x512xf32> -> vector<8x512xf32>
    %34 = vector.broadcast %2 : vector<1x512xf32> to vector<8x512xf32>
    %35 = arith.addf %33, %34 : vector<8x512xf32>
    %cst_21 = arith.constant 0.000000e+00 : f32
    %36 = vector.broadcast %cst_21 : f32 to vector<8x512xf32>
    %37 = arith.maximumf %35, %36 : vector<8x512xf32>
    %38 = arith.truncf %37 : vector<8x512xf32> to vector<8x512xbf16>
    %c0_22 = arith.constant 0 : index
    %c0_23 = arith.constant 0 : index
    %39 = vector.load %arg6[%c0_22, %c0_23] : memref<512x784xbf16, #tpu.memory_space<vmem>>, vector<512x784xbf16>
    %cst_24 = arith.constant dense<0.000000e+00> : vector<8x784xf32>
    %40 = tpu.matmul %38, %39, %cst_24 {dimension_numbers = #tpu.dot_dimension_numbers<[1], [0], [0], [1], [0, 0, 1, 1], [], []>} : vector<8x512xbf16>, vector<512x784xbf16>, vector<8x784xf32> -> vector<8x784xf32>
    %41 = vector.broadcast %3 : vector<1x784xf32> to vector<8x784xf32>
    %42 = arith.addf %40, %41 : vector<8x784xf32>
    %43 = arith.negf %42 : vector<8x784xf32>
    %44 = math.exp %43 : vector<8x784xf32>
    %cst_25 = arith.constant 1.000000e+00 : f32
    %45 = vector.broadcast %cst_25 : f32 to vector<8x784xf32>
    %46 = arith.addf %45, %44 : vector<8x784xf32>
    %47 = arith.divf %45, %46 : vector<8x784xf32>
    %48 = arith.truncf %47 : vector<8x784xf32> to vector<8x784xbf16>
    %c0_26 = arith.constant 0 : index
    %c0_27 = arith.constant 0 : index
    %49 = vector.load %arg8[%c0_26, %c0_27] : memref<8x784xbf16, #tpu.memory_space<vmem>>, vector<8x784xbf16>
    tpu.vector_store %arg8[%c0_26, %c0_27], %48 {strides = array<i32>} : memref<8x784xbf16, #tpu.memory_space<vmem>>, vector<8x784xbf16>,
    return
  }
  func.func @transform_0(%arg0: i32) -> (i32, i32) {
    %c0_i32 = arith.constant 0 : i32
    %c0_i32_0 = arith.constant 0 : i32
    return %arg0, %c0_i32 : i32, i32
  }
  func.func @transform_1(%arg0: i32) -> (i32, i32) {
    %c0_i32 = arith.constant 0 : i32
    %c0_i32_0 = arith.constant 0 : i32
    return %arg0, %c0_i32 : i32, i32
  }
  func.func @transform_2(%arg0: i32) -> (i32, i32) {
    %c0_i32 = arith.constant 0 : i32
    %c0_i32_0 = arith.constant 0 : i32
    %c0_i32_1 = arith.constant 0 : i32
    return %c0_i32, %c0_i32_0 : i32, i32
  }
  func.func @transform_3(%arg0: i32) -> (i32, i32) {
    %c0_i32 = arith.constant 0 : i32
    %c0_i32_0 = arith.constant 0 : i32
    %c0_i32_1 = arith.constant 0 : i32
    return %c0_i32, %c0_i32_0 : i32, i32
  }
  func.func @transform_4(%arg0: i32) -> (i32, i32) {
    %c0_i32 = arith.constant 0 : i32
    %c0_i32_0 = arith.constant 0 : i32
    %c0_i32_1 = arith.constant 0 : i32
    return %c0_i32, %c0_i32_0 : i32, i32
  }
  func.func @transform_5(%arg0: i32) -> (i32, i32) {
    %c0_i32 = arith.constant 0 : i32
    %c0_i32_0 = arith.constant 0 : i32
    %c0_i32_1 = arith.constant 0 : i32
    return %c0_i32, %c0_i32_0 : i32, i32
  }
  func.func @transform_6(%arg0: i32) -> (i32, i32) {
    %c0_i32 = arith.constant 0 : i32
    %c0_i32_0 = arith.constant 0 : i32
    %c0_i32_1 = arith.constant 0 : i32
    return %c0_i32, %c0_i32_0 : i32, i32
  }
  func.func @transform_7(%arg0: i32) -> (i32, i32) {
    %c0_i32 = arith.constant 0 : i32
    %c0_i32_0 = arith.constant 0 : i32
    return %arg0, %c0_i32 : i32, i32
  }
  func.func @transform_8(%arg0: i32) -> (i32, i32) {
    %c0_i32 = arith.constant 0 : i32
    %c0_i32_0 = arith.constant 0 : i32
    return %arg0, %c0_i32 : i32, i32
  }
}

</mosaic_0001>

<bundles_post_ra>
// kernel: vae_forward.1
= control target key start
LH: loop header
LB: loop body
LE: loop exit
PB: predicated region body
PF: predicated region fallthrough
CT: control target
= control target key end

     0   :  { %vm1232_vm0 = vcmask 130048   ;;  %vm1958_vm1 = vcmask 1043456   ;;  %vm1919_vm2 = vcmask 64512   ;;  %s9127_s2 = inlined_call_operand.vmem [shape: bf16[784,512], index: 2, kind: input, shape index: {}]   ;;  %s9128_s0 = inlined_call_operand.vmem [shape: f32[8,784], index: 0, kind: input, shape index: {}]   ;;  %s9129_s6 = inlined_call_operand.vmem [shape: f32[1,2048], index: 6, kind: input, shape index: {}]   ;;  %s9130_s3 = inlined_call_operand.vmem [shape: bf16[512,8], index: 3, kind: input, shape index: {}]   ;;  %s9131_s4 = inlined_call_operand.vmem [shape: bf16[8,512], index: 4, kind: input, shape index: {}]   ;;  %s9132_s8 = inlined_call_operand.vmem [shape: f32[8,8], index: 8, kind: output, shape index: {1}]   ;;  %s9133_s5 = inlined_call_operand.vmem [shape: bf16[512,784], index: 5, kind: input, shape index: {}]   ;;  %s9134_s1 = inlined_call_operand.vmem [shape: f32[8,8], index: 1, kind: input, shape index: {}]   ;;  %s9135_s7 = inlined_call_operand.vmem [shape: bf16[8,784], index: 7, kind: output, shape index: {0}]  }
   0x1   :  { %v4082_v0 = vld [vmem:[%s9127_s2 + $0xe0] sm:$0xf]  ;;  %v5821_v1 = vld [vmem:[%s9127_s2 + $0xec] sm:$0xf0] }
   0x2   :  { %v4210_v2 = vld [vmem:[%s9127_s2 + $0x1e0] sm:$0xf]  ;;  %v4083_v3 = vor.u32 %v5821_v1, %v4082_v0  ;;  %v5853_v4 = vld [vmem:[%s9127_s2 + $0x1ec] sm:$0xf0] }
   0x3   :  { %v4338_v5 = vld [vmem:[%s9127_s2 + $0x2e0] sm:$0xf]  ;;  %v5885_v6 = vld [vmem:[%s9127_s2 + $0x2ec] sm:$0xf0]  ;;  %v4211_v7 = vor.u32 %v5853_v4, %v4210_v2 }
   0x4   :  { %v4339_v8 = vor.u32 %v5885_v6, %v4338_v5  ;;  %v4466_v9 = vld [vmem:[%s9127_s2 + $0x3e0] sm:$0xf]  ;;  %v5917_v10 = vld [vmem:[%s9127_s2 + $0x3ec] sm:$0xf0]  ;;  %1236 = vmatpush.bf16.msra.mxu0 %v4083_v3 }
   0x5   :  { %v4066_v11 = vld [vmem:[%s9127_s2 + $0xc0] sm:$0xf]  ;;  %v4467_v12 = vor.u32 %v5917_v10, %v4466_v9  ;;  %v5817_v13 = vld [vmem:[%s9127_s2 + $0xcc] sm:$0xf0]  ;;  %1249 = vmatpush.bf16.msra.mxu1 %v4211_v7 }
   0x6   :  { %v4194_v14 = vld [vmem:[%s9127_s2 + $0x1c0] sm:$0xf]  ;;  %v5849_v15 = vld [vmem:[%s9127_s2 + $0x1cc] sm:$0xf0]  ;;  %1262 = vmatpush.bf16.msra.mxu2 %v4339_v8  ;;  %v4067_v16 = vor.u32 %v5817_v13, %v4066_v11 }
   0x7   :  { %v4195_v17 = vor.u32 %v5849_v15, %v4194_v14  ;;  %v4322_v18 = vld [vmem:[%s9127_s2 + $0x2c0] sm:$0xf]  ;;  %v5881_v19 = vld [vmem:[%s9127_s2 + $0x2cc] sm:$0xf0]  ;;  %1275 = vmatpush.bf16.msra.mxu3 %v4467_v12 }
   0x8   :  { %v4450_v20 = vld [vmem:[%s9127_s2 + $0x3c0] sm:$0xf]  ;;  %v4323_v21 = vor.u32 %v5881_v19, %v4322_v18  ;;  %v5913_v22 = vld [vmem:[%s9127_s2 + $0x3cc] sm:$0xf0]  ;;  %1237 = vmatpush.bf16.msra.mxu0 %v4067_v16 }
   0x9   :  { %v4050_v23 = vld [vmem:[%s9127_s2 + $0xa0] sm:$0xf]  ;;  %v5813_v24 = vld [vmem:[%s9127_s2 + $0xac] sm:$0xf0]  ;;  %v4451_v25 = vor.u32 %v5913_v22, %v4450_v20  ;;  %1250 = vmatpush.bf16.msra.mxu1 %v4195_v17 }
   0xa   :  { %v4178_v26 = vld [vmem:[%s9127_s2 + $0x1a0] sm:$0xf]  ;;  %v5845_v27 = vld [vmem:[%s9127_s2 + $0x1ac] sm:$0xf0]  ;;  %v4051_v29 = vor.u32 %v5813_v24, %v4050_v23  ;;  %1263 = vmatpush.bf16.msra.mxu2 %v4323_v21 }
   0xb   :  { %v4306_v28 = vld [vmem:[%s9127_s2 + $0x2a0] sm:$0xf]  ;;  %v5877_v30 = vld [vmem:[%s9127_s2 + $0x2ac] sm:$0xf0]  ;;  %v4179_v33 = vor.u32 %v5845_v27, %v4178_v26  ;;  %1276 = vmatpush.bf16.msra.mxu3 %v4451_v25 }
   0xc   :  { %v4434_v31 = vld [vmem:[%s9127_s2 + $0x3a0] sm:$0xf]  ;;  %v5909_v32 = vld [vmem:[%s9127_s2 + $0x3ac] sm:$0xf0]  ;;  %v4307_v34 = vor.u32 %v5877_v30, %v4306_v28  ;;  %1238 = vmatpush.bf16.msra.mxu0 %v4051_v29 }
   0xd   :  { %v4034_v35 = vld [vmem:[%s9127_s2 + $0x80] sm:$0xf]  ;;  %v5809_v36 = vld [vmem:[%s9127_s2 + $0x8c] sm:$0xf0]  ;;  %v4435_v38 = vor.u32 %v5909_v32, %v4434_v31  ;;  %1251 = vmatpush.bf16.msra.mxu1 %v4179_v33  ;;  %v5819_v33 = vld [vmem:[%s9127_s2 + $0xe4] sm:$0xf] }
   0xe   :  { %v4162_v37 = vld [vmem:[%s9127_s2 + $0x180] sm:$0xf]  ;;  %v5841_v39 = vld [vmem:[%s9127_s2 + $0x18c] sm:$0xf0]  ;;  %v4035_v44 = vor.u32 %v5809_v36, %v4034_v35  ;;  %1264 = vmatpush.bf16.msra.mxu2 %v4307_v34  ;;  %v4084_v34 = vld [vmem:[%s9127_s2 + $0xf0] sm:$0xf0] }
   0xf   :  { %v4290_v40 = vld [vmem:[%s9127_s2 + $0x280] sm:$0xf]  ;;  %v5873_v41 = vld [vmem:[%s9127_s2 + $0x28c] sm:$0xf0]  ;;  %v4163_v45 = vor.u32 %v5841_v39, %v4162_v37  ;;  %1277 = vmatpush.bf16.msra.mxu3 %v4435_v38 }
  0x10   :  { %v4418_v42 = vld [vmem:[%s9127_s2 + $0x380] sm:$0xf]  ;;  %v5905_v43 = vld [vmem:[%s9127_s2 + $0x38c] sm:$0xf0]  ;;  %v4291_v46 = vor.u32 %v5873_v41, %v4290_v40  ;;  %1239 = vmatpush.bf16.msra.mxu0 %v4035_v44  ;;  %v4212_v44 = vld [vmem:[%s9127_s2 + $0x1f0] sm:$0xf0] }
  0x11   :  { %v4018_v47 = vld [vmem:[%s9127_s2 + $0x60] sm:$0xf]  ;;  %v5805_v48 = vld [vmem:[%s9127_s2 + $0x6c] sm:$0xf0]  ;;  %v4419_v50 = vor.u32 %v5905_v43, %v4418_v42  ;;  %1252 = vmatpush.bf16.msra.mxu1 %v4163_v45  ;;  %v5851_v43 = vld [vmem:[%s9127_s2 + $0x1e4] sm:$0xf] }
  0x12   :  { %v4146_v49 = vld [vmem:[%s9127_s2 + $0x160] sm:$0xf]  ;;  %v5837_v51 = vld [vmem:[%s9127_s2 + $0x16c] sm:$0xf0]  ;;  %v4019_v56 = vor.u32 %v5805_v48, %v4018_v47  ;;  %1265 = vmatpush.bf16.msra.mxu2 %v4291_v46  ;;  %v36_v45 = vld [vmem:[%s9128_s0 + $0x18] sm:$0xff]  ;;  %v4087_v47 = vor.u32 %v5819_v33, %v4084_v34 }
  0x13   :  { %v4274_v52 = vld [vmem:[%s9127_s2 + $0x260] sm:$0xf]  ;;  %v5869_v53 = vld [vmem:[%s9127_s2 + $0x26c] sm:$0xf0]  ;;  %v4147_v57 = vor.u32 %v5837_v51, %v4146_v49  ;;  %1278 = vmatpush.bf16.msra.mxu3 %v4419_v50 }
  0x14   :  { %v4402_v54 = vld [vmem:[%s9127_s2 + $0x360] sm:$0xf]  ;;  %v5901_v55 = vld [vmem:[%s9127_s2 + $0x36c] sm:$0xf0]  ;;  %v4275_v58 = vor.u32 %v5869_v53, %v4274_v52  ;;  %1240 = vmatpush.bf16.msra.mxu0 %v4019_v56  ;;  %v5815_v53 = vld [vmem:[%s9127_s2 + $0xc4] sm:$0xf] }
  0x15   :  { %v4002_v59 = vld [vmem:[%s9127_s2 + $0x40] sm:$0xf]  ;;  %v5801_v60 = vld [vmem:[%s9127_s2 + $0x4c] sm:$0xf0]  ;;  %v4403_v62 = vor.u32 %v5901_v55, %v4402_v54  ;;  %1253 = vmatpush.bf16.msra.mxu1 %v4147_v57  ;;  %v4068_v54 = vld [vmem:[%s9127_s2 + $0xd0] sm:$0xf0]  ;;  %v6572_v57 = vpack.c.bf16 %v36_v45, %v36_v45 }
  0x16   :  { %v4130_v61 = vld [vmem:[%s9127_s2 + $0x140] sm:$0xf]  ;;  %v5833_v63 = vld [vmem:[%s9127_s2 + $0x14c] sm:$0xf0]  ;;  %v4003_v4 = vor.u32 %v5801_v60, %v4002_v59  ;;  %1266 = vmatpush.bf16.msra.mxu2 %v4275_v58  ;;  %v34_v58 = vld [vmem:[%s9128_s0 + $0x8] sm:$0xff]  ;;  %v4215_v59 = vor.u32 %v5851_v43, %v4212_v44 }
  0x17   :  { %v4258_v0 = vld [vmem:[%s9127_s2 + $0x240] sm:$0xf]  ;;  %v5865_v1 = vld [vmem:[%s9127_s2 + $0x24c] sm:$0xf0]  ;;  %v4131_v5 = vor.u32 %v5833_v63, %v4130_v61  ;;  %1279 = vmatpush.bf16.msra.mxu3 %v4403_v62  ;;  %v5847_v61 = vld [vmem:[%s9127_s2 + $0x1c4] sm:$0xf] }
  0x18   :  { %v4386_v2 = vld [vmem:[%s9127_s2 + $0x340] sm:$0xf]  ;;  %v5897_v3 = vld [vmem:[%s9127_s2 + $0x34c] sm:$0xf0]  ;;  %v4259_v6 = vor.u32 %v5865_v1, %v4258_v0  ;;  %1241 = vmatpush.bf16.msra.mxu0 %v4003_v4  ;;  %v4196_v62 = vld [vmem:[%s9127_s2 + $0x1d0] sm:$0xf0]  ;;  %v4071_v0 = vor.u32 %v5815_v53, %v4068_v54 }
  0x19   :  { %v3986_v7 = vld [vmem:[%s9127_s2 + $0x20] sm:$0xf]  ;;  %v5797_v8 = vld [vmem:[%s9127_s2 + $0x2c] sm:$0xf0]  ;;  %v4387_v10 = vor.u32 %v5897_v3, %v4386_v2  ;;  %1254 = vmatpush.bf16.msra.mxu1 %v4131_v5  ;;  %v5811_v5 = vld [vmem:[%s9127_s2 + $0xa4] sm:$0xf] }
  0x1a   :  { %v4114_v9 = vld [vmem:[%s9127_s2 + $0x120] sm:$0xf]  ;;  %v5829_v11 = vld [vmem:[%s9127_s2 + $0x12c] sm:$0xf0]  ;;  %v3987_v16 = vor.u32 %v5797_v8, %v3986_v7  ;;  %1267 = vmatpush.bf16.msra.mxu2 %v4259_v6  ;;  %v4052_v6 = vld [vmem:[%s9127_s2 + $0xb0] sm:$0xf0]  ;;  %v6603_v7 = vpack.c.bf16 %v34_v58, %v34_v58  ;;  %v4199_v8 = vor.u32 %v5847_v61, %v4196_v62 }
  0x1b   :  { %v4242_v12 = vld [vmem:[%s9127_s2 + $0x220] sm:$0xf]  ;;  %v5861_v13 = vld [vmem:[%s9127_s2 + $0x22c] sm:$0xf0]  ;;  %v4115_v20 = vor.u32 %v5829_v11, %v4114_v9  ;;  %1280 = vmatpush.bf16.msra.mxu3 %v4387_v10  ;;  %v5843_v10 = vld [vmem:[%s9127_s2 + $0x1a4] sm:$0xf] }
  0x1c   :  { %v4370_v14 = vld [vmem:[%s9127_s2 + $0x320] sm:$0xf]  ;;  %v5893_v15 = vld [vmem:[%s9127_s2 + $0x32c] sm:$0xf0]  ;;  %v4243_v21 = vor.u32 %v5861_v13, %v4242_v12  ;;  %1242 = vmatpush.bf16.msra.mxu0 %v3987_v16  ;;  %v4180_v11 = vld [vmem:[%s9127_s2 + $0x1b0] sm:$0xf0]  ;;  %v4055_v13 = vor.u32 %v5811_v5, %v4052_v6 }
  0x1d   :  { %v3970_v17 = vld [vmem:[%s9127_s2] sm:$0xf]  ;;  %v5793_v18 = vld [vmem:[%s9127_s2 + $0xc] sm:$0xf0]  ;;  %v4371_v25 = vor.u32 %v5893_v15, %v4370_v14  ;;  %1255 = vmatpush.bf16.msra.mxu1 %v4115_v20  ;;  %v4183_v20 = vor.u32 %v5843_v10, %v4180_v11  ;;  %v5799_v43 = vld [vmem:[%s9127_s2 + $0x44] sm:$0xf] }
  0x1e   :  { %v4098_v19 = vld [vmem:[%s9127_s2 + $0x100] sm:$0xf]  ;;  %v5825_v22 = vld [vmem:[%s9127_s2 + $0x10c] sm:$0xf0]  ;;  %v3971_v32 = vor.u32 %v5793_v18, %v3970_v17  ;;  %1268 = vmatpush.bf16.msra.mxu2 %v4243_v21  ;;  %v5807_v18 = vld [vmem:[%s9127_s2 + $0x84] sm:$0xf] }
  0x1f   :  { %v4226_v23 = vld [vmem:[%s9127_s2 + $0x200] sm:$0xf]  ;;  %v5857_v24 = vld [vmem:[%s9127_s2 + $0x20c] sm:$0xf0]  ;;  %v4099_v36 = vor.u32 %v5825_v22, %v4098_v19  ;;  %1281 = vmatpush.bf16.msra.mxu3 %v4371_v25  ;;  %v4036_v19 = vld [vmem:[%s9127_s2 + $0x90] sm:$0xf0] }
  0x20   :  { %v4354_v26 = vld [vmem:[%s9127_s2 + $0x300] sm:$0xf]  ;;  %v5889_v27 = vld [vmem:[%s9127_s2 + $0x30c] sm:$0xf0]  ;;  %v4227_v37 = vor.u32 %v5857_v24, %v4226_v23  ;;  %1243 = vmatpush.bf16.msra.mxu0 %v3971_v32  ;;  %v5839_v22 = vld [vmem:[%s9127_s2 + $0x184] sm:$0xf]  ;;  %v4039_v25 = vor.u32 %v5807_v18, %v4036_v19 }
  0x21   :  { %v4594_v28 = vld [vmem:[%s9127_s2 + $0x4e0] sm:$0xf]  ;;  %v5949_v29 = vld [vmem:[%s9127_s2 + $0x4ec] sm:$0xf0]  ;;  %v4355_v41 = vor.u32 %v5889_v27, %v4354_v26  ;;  %1256 = vmatpush.bf16.msra.mxu1 %v4099_v36  ;;  %v4164_v23 = vld [vmem:[%s9127_s2 + $0x190] sm:$0xf0] }
  0x22   :  { %v4722_v30 = vld [vmem:[%s9127_s2 + $0x5e0] sm:$0xf]  ;;  %v5981_v31 = vld [vmem:[%s9127_s2 + $0x5ec] sm:$0xf0]  ;;  %v4595_v42 = vor.u32 %v5949_v29, %v4594_v28  ;;  %1269 = vmatpush.bf16.msra.mxu2 %v4227_v37  ;;  %v4167_v33 = vor.u32 %v5839_v22, %v4164_v23  ;;  %v4148_v36 = vld [vmem:[%s9127_s2 + $0x170] sm:$0xf0] }
  0x23   :  { %v35_v35 = vld [vmem:[%s9128_s0 + $0x10] sm:$0xff]  ;;  %v4738_v38 = vld [vmem:[%s9127_s2 + $0x600] sm:$0xf]  ;;  %v4723_v46 = vor.u32 %v5981_v31, %v4722_v30  ;;  %1282 = vmatpush.bf16.msra.mxu3 %v4355_v41  ;;  %v5803_v30 = vld [vmem:[%s9127_s2 + $0x64] sm:$0xf] }
  0x24   :  { %v5985_v39 = vld [vmem:[%s9127_s2 + $0x60c] sm:$0xf0]  ;;  %v33_v40 = vld [vmem:[%s9128_s0] sm:$0xff]  ;;  %v6559_v51 = vpack.c.bf16 %v35_v35, %v35_v35  ;;  %1288 = vmatpush.bf16.msrb.mxu0 %v4595_v42  ;;  %1257 = vmatmul.bf16.vlgmr.msra.gmra.mxu1 %v6603_v7  ;;  %v4020_v31 = vld [vmem:[%s9127_s2 + $0x70] sm:$0xf0] }
  0x25   :  { %v4578_v48 = vld [vmem:[%s9127_s2 + $0x4c0] sm:$0xf]  ;;  %v5945_v49 = vld [vmem:[%s9127_s2 + $0x4cc] sm:$0xf0]  ;;  %v6570_v55 = vpack.c.bf16 %v33_v40, %v33_v40  ;;  %v4739_v56 = vor.u32 %v5985_v39, %v4738_v38  ;;  %1301 = vmatpush.bf16.msrb.mxu1 %v4723_v46  ;;  %v5835_v35 = vld [vmem:[%s9127_s2 + $0x164] sm:$0xf]  ;;  %v4023_v38 = vor.u32 %v5803_v30, %v4020_v31 }
  0x26   :  { %v4706_v50 = vld [vmem:[%s9127_s2 + $0x5c0] sm:$0xf]  ;;  %v5977_v52 = vld [vmem:[%s9127_s2 + $0x5cc] sm:$0xf0]  ;;  %v4579_v60 = vor.u32 %v5945_v49, %v4578_v48  ;;  %1270 = vmatmul.bf16.vlgmr.msra.gmra.mxu2 %v6559_v51  ;;  %1283 = vmatmul.bf16.vlgmr.msra.gmra.mxu3 %v6572_v57  ;;  %v4004_v44 = vld [vmem:[%s9127_s2 + $0x50] sm:$0xf0]  ;;  %v4151_v46 = vor.u32 %v5835_v35, %v4148_v36 }
  0x27   :  { %1327 = vmatpush.bf16.msrb.mxu3 %v4087_v47  ;;  %v4707_v63 = vor.u32 %v5977_v52, %v4706_v50  ;;  %v4562_v1 = vld [vmem:[%s9127_s2 + $0x4a0] sm:$0xf]  ;;  %v5941_v2 = vld [vmem:[%s9127_s2 + $0x4ac] sm:$0xf0]  ;;  %1244 = vmatmul.bf16.vlgmr.msra.gmra.mxu0 %v6570_v55  ;;  %v5831_v48 = vld [vmem:[%s9127_s2 + $0x144] sm:$0xf]  ;;  %v4007_v52 = vor.u32 %v5799_v43, %v4004_v44 }
  0x28   :  { %v4690_v3 = vld [vmem:[%s9127_s2 + $0x5a0] sm:$0xf]  ;;  %v5973_v4 = vld [vmem:[%s9127_s2 + $0x5ac] sm:$0xf0]  ;;  %1321 = vmatpush.bf16.msrb.mxu2 %v4739_v56  ;;  %1289 = vmatpush.bf16.msrb.mxu0 %v4579_v60  ;;  %v4563_v9 = vor.u32 %v5941_v2, %v4562_v1  ;;  %v4132_v49 = vld [vmem:[%s9127_s2 + $0x150] sm:$0xf0] }
  0x29   :  { %1302 = vmatpush.bf16.msrb.mxu1 %v4707_v63  ;;  %v4691_v12 = vor.u32 %v5973_v4, %v4690_v3  ;;  %v4546_v14 = vld [vmem:[%s9127_s2 + $0x480] sm:$0xf]  ;;  %v5937_v15 = vld [vmem:[%s9127_s2 + $0x48c] sm:$0xf0]  ;;  %v3988_v60 = vld [vmem:[%s9127_s2 + $0x30] sm:$0xf0]  ;;  %v4135_v61 = vor.u32 %v5831_v48, %v4132_v49 }
  0x2a   :  { %v4674_v16 = vld [vmem:[%s9127_s2 + $0x580] sm:$0xf]  ;;  %v5969_v17 = vld [vmem:[%s9127_s2 + $0x58c] sm:$0xf0]  ;;  %v4547_v21 = vor.u32 %v5937_v15, %v4546_v14  ;;  %v5827_v63 = vld [vmem:[%s9127_s2 + $0x124] sm:$0xf] }
  0x2b   :  { %1328 = vmatpush.bf16.msrb.mxu3 %v4071_v0  ;;  %v4675_v24 = vor.u32 %v5969_v17, %v4674_v16  ;;  %v4530_v26 = vld [vmem:[%s9127_s2 + $0x460] sm:$0xf]  ;;  %v5933_v27 = vld [vmem:[%s9127_s2 + $0x46c] sm:$0xf0]  ;;  %v4116_v0 = vld [vmem:[%s9127_s2 + $0x130] sm:$0xf0] }
  0x2c   :  { %1340 = vmatpush.bf16.msra.mxu2 %v4215_v59  ;;  %1290 = vmatpush.bf16.msrb.mxu0 %v4563_v9  ;;  %v4658_v28 = vld [vmem:[%s9127_s2 + $0x560] sm:$0xf]  ;;  %v5965_v29 = vld [vmem:[%s9127_s2 + $0x56c] sm:$0xf0]  ;;  %v4531_v34 = vor.u32 %v5933_v27, %v4530_v26  ;;  %v5795_v59 = vld [vmem:[%s9127_s2 + $0x24] sm:$0xf]  ;;  %v4119_v14 = vor.u32 %v5827_v63, %v4116_v0 }
  0x2d   :  { %1303 = vmatpush.bf16.msrb.mxu1 %v4691_v12  ;;  %v39_v32 = vld [vmem:[%s9128_s0 + $0x30] sm:$0xff]  ;;  %v4659_v37 = vor.u32 %v5965_v29, %v4658_v28  ;;  %v4514_v39 = vld [vmem:[%s9127_s2 + $0x440] sm:$0xf]  ;;  %v3991_v3 = vor.u32 %v5795_v59, %v3988_v60  ;;  %v5883_v10 = vld [vmem:[%s9127_s2 + $0x2e4] sm:$0xf] }
  0x2e   :  { %v5929_v40 = vld [vmem:[%s9127_s2 + $0x44c] sm:$0xf0]  ;;  %v4642_v41 = vld [vmem:[%s9127_s2 + $0x540] sm:$0xf]  ;;  %v6682_v45 = vpack.c.bf16 %v39_v32, %v39_v32  ;;  %v3972_v9 = vld [vmem:[%s9127_s2 + $0x10] sm:$0xf0] }
  0x2f   :  { %1329 = vmatpush.bf16.msrb.mxu3 %v4055_v13  ;;  %v5961_v42 = vld [vmem:[%s9127_s2 + $0x54c] sm:$0xf0]  ;;  %v4515_v47 = vor.u32 %v5929_v40, %v4514_v39  ;;  %v4498_v53 = vld [vmem:[%s9127_s2 + $0x420] sm:$0xf]  ;;  %v4340_v11 = vld [vmem:[%s9127_s2 + $0x2f0] sm:$0xf0] }
  0x30   :  { %1341 = vmatpush.bf16.msra.mxu2 %v4199_v8  ;;  %1291 = vmatpush.bf16.msrb.mxu0 %v4547_v21  ;;  %v4643_v50 = vor.u32 %v5961_v42, %v4642_v41  ;;  %v5925_v54 = vld [vmem:[%s9127_s2 + $0x42c] sm:$0xf0]  ;;  %v4626_v56 = vld [vmem:[%s9127_s2 + $0x520] sm:$0xf]  ;;  %v5791_v8 = vld [vmem:[%s9127_s2 + $0x4] sm:$0xf] }
  0x31   :  { %1304 = vmatpush.bf16.msrb.mxu1 %v4675_v24  ;;  %v5957_v58 = vld [vmem:[%s9127_s2 + $0x52c] sm:$0xf0]  ;;  %v4499_v62 = vor.u32 %v5925_v54, %v4498_v53  ;;  %v4482_v1 = vld [vmem:[%s9127_s2 + $0x400] sm:$0xf]  ;;  %v5915_v12 = vld [vmem:[%s9127_s2 + $0x3e4] sm:$0xf]  ;;  %v4343_v24 = vor.u32 %v5883_v10, %v4340_v11 }
  0x32   :  { %v4627_v2 = vor.u32 %v5957_v58, %v4626_v56  ;;  %v5921_v4 = vld [vmem:[%s9127_s2 + $0x40c] sm:$0xf0]  ;;  %v4610_v5 = vld [vmem:[%s9127_s2 + $0x500] sm:$0xf]  ;;  %v4468_v13 = vld [vmem:[%s9127_s2 + $0x3f0] sm:$0xf0] }
  0x33   :  { %1330 = vmatpush.bf16.msrb.mxu3 %v4039_v25  ;;  %v5953_v6 = vld [vmem:[%s9127_s2 + $0x50c] sm:$0xf0]  ;;  %v4483_v15 = vor.u32 %v5921_v4, %v4482_v1  ;;  %v5947_v16 = vld [vmem:[%s9127_s2 + $0x4e4] sm:$0xf]  ;;  %v4596_v17 = vld [vmem:[%s9127_s2 + $0x4f0] sm:$0xf0]  ;;  %v4471_v25 = vor.u32 %v5915_v12, %v4468_v13 }
  0x34   :  { %1342 = vmatpush.bf16.msra.mxu2 %v4183_v20  ;;  %1292 = vmatpush.bf16.msrb.mxu0 %v4531_v34  ;;  %v37_v18 = vld [vmem:[%s9128_s0 + $0x20] sm:$0xff]  ;;  %v4611_v19 = vor.u32 %v5953_v6, %v4610_v5  ;;  %v3975_v20 = vor.u32 %v5791_v8, %v3972_v9  ;;  %v4100_v22 = vld [vmem:[%s9127_s2 + $0x110] sm:$0xf0]  ;;  %v38_v23 = vld [vmem:[%s9128_s0 + $0x28] sm:$0xff]  ;;  %v4599_v29 = vor.u32 %v5947_v16, %v4596_v17 }
  0x35   :  { %1305 = vmatpush.bf16.msrb.mxu1 %v4659_v37  ;;  %v5823_v21 = vld [vmem:[%s9127_s2 + $0x104] sm:$0xf]  ;;  %v4724_v27 = vld [vmem:[%s9127_s2 + $0x5f0] sm:$0xf0]  ;;  %v6773_v30 = vpack.c.bf16 %v37_v18, %v37_v18  ;;  %v6784_v35 = vpack.c.bf16 %v38_v23, %v38_v23 }
  0x36   :  { %4752 = vmatmul.msk.bf16.vlgmr.msrb.gmra.mxu2 %vm1232_vm0, %v6682_v45  ;;  %v5979_v26 = vld [vmem:[%s9127_s2 + $0x5e4] sm:$0xf]  ;;  %v4324_v31 = vld [vmem:[%s9127_s2 + $0x2d0] sm:$0xf0]  ;;  %v4103_v34 = vor.u32 %v5823_v21, %v4100_v22 }
  0x37   :  { %1331 = vmatpush.bf16.msrb.mxu3 %v4023_v38  ;;  %v5879_v28 = vld [vmem:[%s9127_s2 + $0x2c4] sm:$0xf]  ;;  %v4580_v37 = vld [vmem:[%s9127_s2 + $0x4d0] sm:$0xf0]  ;;  %v4727_v38 = vor.u32 %v5979_v26, %v4724_v27 }
  0x38   :  { %1343 = vmatpush.bf16.msra.mxu2 %v4167_v33  ;;  %1293 = vmatpush.bf16.msrb.mxu0 %v4515_v47  ;;  %v5911_v32 = vld [vmem:[%s9127_s2 + $0x3c4] sm:$0xf]  ;;  %v4452_v33 = vld [vmem:[%s9127_s2 + $0x3d0] sm:$0xf0]  ;;  %v4327_v39 = vor.u32 %v5879_v28, %v4324_v31 }
  0x39   :  { %1306 = vmatpush.bf16.msrb.mxu1 %v4643_v50  ;;  %v5943_v36 = vld [vmem:[%s9127_s2 + $0x4c4] sm:$0xf]  ;;  %v4455_v40 = vor.u32 %v5911_v32, %v4452_v33  ;;  %v4708_v42 = vld [vmem:[%s9127_s2 + $0x5d0] sm:$0xf0] }
  0x3a   :  { %v5975_v41 = vld [vmem:[%s9127_s2 + $0x5c4] sm:$0xf]  ;;  %v4583_v44 = vor.u32 %v5943_v36, %v4580_v37  ;;  %v4436_v48 = vld [vmem:[%s9127_s2 + $0x3b0] sm:$0xf0] }
  0x3b   :  { %1332 = vmatpush.bf16.msrb.mxu3 %v4007_v52  ;;  %v5875_v43 = vld [vmem:[%s9127_s2 + $0x2a4] sm:$0xf]  ;;  %v4564_v50 = vld [vmem:[%s9127_s2 + $0x4b0] sm:$0xf0]  ;;  %v4711_v52 = vor.u32 %v5975_v41, %v4708_v42 }
  0x3c   :  { %1344 = vmatpush.bf16.msra.mxu2 %v4151_v46  ;;  %1294 = vmatpush.bf16.msrb.mxu0 %v4499_v62  ;;  %v4308_v46 = vld [vmem:[%s9127_s2 + $0x2b0] sm:$0xf0]  ;;  %v5907_v47 = vld [vmem:[%s9127_s2 + $0x3a4] sm:$0xf] }
  0x3d   :  { %1307 = vmatpush.bf16.msrb.mxu1 %v4627_v2  ;;  %v5939_v49 = vld [vmem:[%s9127_s2 + $0x4a4] sm:$0xf]  ;;  %v4311_v53 = vor.u32 %v5875_v43, %v4308_v46  ;;  %v4439_v54 = vor.u32 %v5907_v47, %v4436_v48  ;;  %v4692_v58 = vld [vmem:[%s9127_s2 + $0x5b0] sm:$0xf0] }
  0x3e   :  { %v5971_v56 = vld [vmem:[%s9127_s2 + $0x5a4] sm:$0xf]  ;;  %v4567_v60 = vor.u32 %v5939_v49, %v4564_v50  ;;  %v4420_v63 = vld [vmem:[%s9127_s2 + $0x390] sm:$0xf0] }
  0x3f   :  { %1333 = vmatpush.bf16.msrb.mxu3 %v3991_v3  ;;  %v5871_v59 = vld [vmem:[%s9127_s2 + $0x284] sm:$0xf]  ;;  %v4548_v1 = vld [vmem:[%s9127_s2 + $0x490] sm:$0xf0]  ;;  %v4695_v2 = vor.u32 %v5971_v56, %v4692_v58  ;;  %v4090_v56 = vld [vmem:[%s9127_s2 + $0xe8] sm:$0xf] }
  0x40   :  { %1345 = vmatpush.bf16.msra.mxu2 %v4135_v61  ;;  %1295 = vmatpush.bf16.msrb.mxu0 %v4483_v15  ;;  %v4292_v61 = vld [vmem:[%s9127_s2 + $0x290] sm:$0xf0]  ;;  %v5903_v62 = vld [vmem:[%s9127_s2 + $0x384] sm:$0xf]  ;;  %v5822_v58 = vld [vmem:[%s9127_s2 + $0xf4] sm:$0xf0] }
  0x41   :  { %1308 = vmatpush.bf16.msrb.mxu1 %v4611_v19  ;;  %v5935_v0 = vld [vmem:[%s9127_s2 + $0x484] sm:$0xf]  ;;  %v4295_v3 = vor.u32 %v5871_v59, %v4292_v61  ;;  %v4423_v4 = vor.u32 %v5903_v62, %v4420_v63  ;;  %v4676_v6 = vld [vmem:[%s9127_s2 + $0x590] sm:$0xf0]  ;;  %v4218_v59 = vld [vmem:[%s9127_s2 + $0x1e8] sm:$0xf] }
  0x42   :  { %v5967_v5 = vld [vmem:[%s9127_s2 + $0x584] sm:$0xf]  ;;  %v4551_v9 = vor.u32 %v5935_v0, %v4548_v1  ;;  %v4276_v10 = vld [vmem:[%s9127_s2 + $0x270] sm:$0xf0]  ;;  %v5854_v61 = vld [vmem:[%s9127_s2 + $0x1f4] sm:$0xf0] }
  0x43   :  { %1334 = vmatpush.bf16.msrb.mxu3 %v3975_v20  ;;  %1296 = vmatmul.bf16.vlgmr.msrb.gmra.mxu0 %v6773_v30  ;;  %v5867_v8 = vld [vmem:[%s9127_s2 + $0x264] sm:$0xf]  ;;  %v4404_v12 = vld [vmem:[%s9127_s2 + $0x370] sm:$0xf0]  ;;  %v4679_v15 = vor.u32 %v5967_v5, %v4676_v6  ;;  %v4091_v6 = vor.u32 %v5822_v58, %v4090_v56  ;;  %v5806_v56 = vld [vmem:[%s9127_s2 + $0x74] sm:$0xf0] }
  0x44   :  { %1346 = vmatpush.bf16.msra.mxu2 %v4119_v14  ;;  %1353 = vmatpush.bf16.msra.mxu0 %v4343_v24  ;;  %v5899_v11 = vld [vmem:[%s9127_s2 + $0x364] sm:$0xf]  ;;  %v4532_v14 = vld [vmem:[%s9127_s2 + $0x470] sm:$0xf0]  ;;  %v4279_v16 = vor.u32 %v5867_v8, %v4276_v10  ;;  %v5886_v8 = vld [vmem:[%s9127_s2 + $0x2f4] sm:$0xf0] }
  0x45   :  { %1366 = vmatpush.bf16.msra.mxu1 %v4471_v25  ;;  %v5931_v13 = vld [vmem:[%s9127_s2 + $0x464] sm:$0xf]  ;;  %v4407_v17 = vor.u32 %v5899_v11, %v4404_v12  ;;  %v4660_v19 = vld [vmem:[%s9127_s2 + $0x570] sm:$0xf0]  ;;  %v5918_v10 = vld [vmem:[%s9127_s2 + $0x3f4] sm:$0xf0]  ;;  %v4219_v11 = vor.u32 %v5854_v61, %v4218_v59 }
  0x46   :  { %1309 = vmatmul.bf16.vlgmr.msrb.gmra.mxu1 %v6784_v35  ;;  %1335 = vmatmul.bf16.vlgmr.msrb.gmra.mxu3 %v6570_v55  ;;  %v5963_v18 = vld [vmem:[%s9127_s2 + $0x564] sm:$0xf]  ;;  %v4535_v21 = vor.u32 %v5931_v13, %v4532_v14  ;;  %v4260_v22 = vld [vmem:[%s9127_s2 + $0x250] sm:$0xf0]  ;;  %v4074_v13 = vld [vmem:[%s9127_s2 + $0xc8] sm:$0xf] }
  0x47   :  { %1379 = vmatpush.bf16.msra.mxu3 %v4599_v29  ;;  %v5863_v20 = vld [vmem:[%s9127_s2 + $0x244] sm:$0xf]  ;;  %v4388_v24 = vld [vmem:[%s9127_s2 + $0x350] sm:$0xf0]  ;;  %v4663_v27 = vor.u32 %v5963_v18, %v4660_v19  ;;  %v5818_v14 = vld [vmem:[%s9127_s2 + $0xd4] sm:$0xf0] }
  0x48   :  { %1347 = vmatpush.bf16.msra.mxu2 %v4103_v34  ;;  %1354 = vmatpush.bf16.msra.mxu0 %v4327_v39  ;;  %v5895_v23 = vld [vmem:[%s9127_s2 + $0x344] sm:$0xf]  ;;  %v4516_v26 = vld [vmem:[%s9127_s2 + $0x450] sm:$0xf0]  ;;  %v4263_v28 = vor.u32 %v5863_v20, %v4260_v22  ;;  %v4330_v20 = vld [vmem:[%s9127_s2 + $0x2c8] sm:$0xf] }
  0x49   :  { %1367 = vmatpush.bf16.msra.mxu1 %v4455_v40  ;;  %v5927_v25 = vld [vmem:[%s9127_s2 + $0x444] sm:$0xf]  ;;  %v4391_v29 = vor.u32 %v5895_v23, %v4388_v24  ;;  %v4644_v32 = vld [vmem:[%s9127_s2 + $0x550] sm:$0xf0]  ;;  %v5882_v22 = vld [vmem:[%s9127_s2 + $0x2d4] sm:$0xf0] }
  0x4a   :  { %v5959_v31 = vld [vmem:[%s9127_s2 + $0x544] sm:$0xf]  ;;  %v4519_v34 = vor.u32 %v5927_v25, %v4516_v26  ;;  %v4244_v36 = vld [vmem:[%s9127_s2 + $0x230] sm:$0xf0]  ;;  %v4458_v23 = vld [vmem:[%s9127_s2 + $0x3c8] sm:$0xf] }
  0x4b   :  { %1380 = vmatpush.bf16.msra.mxu3 %v4583_v44  ;;  %1348 = vmatmul.bf16.vlgmr.msra.gmra.mxu2 %v6603_v7  ;;  %v5859_v33 = vld [vmem:[%s9127_s2 + $0x224] sm:$0xf]  ;;  %v4500_v40 = vld [vmem:[%s9127_s2 + $0x430] sm:$0xf0]  ;;  %v4647_v41 = vor.u32 %v5959_v31, %v4644_v32  ;;  %v5914_v24 = vld [vmem:[%s9127_s2 + $0x3d4] sm:$0xf0]  ;;  %v4331_v31 = vor.u32 %v5882_v22, %v4330_v20 }
  0x4c   :  { %1392 = vmatpush.bf16.msrb.mxu2 %v4727_v38  ;;  %1355 = vmatpush.bf16.msra.mxu0 %v4311_v53  ;;  %v5891_v37 = vld [vmem:[%s9127_s2 + $0x324] sm:$0xf]  ;;  %v4372_v38 = vld [vmem:[%s9127_s2 + $0x330] sm:$0xf0]  ;;  %v4247_v44 = vor.u32 %v5859_v33, %v4244_v36  ;;  %v4058_v26 = vld [vmem:[%s9127_s2 + $0xa8] sm:$0xf]  ;;  %v4459_v32 = vor.u32 %v5914_v24, %v4458_v23 }
  0x4d   :  { %1368 = vmatpush.bf16.msra.mxu1 %v4439_v54  ;;  %v5923_v39 = vld [vmem:[%s9127_s2 + $0x424] sm:$0xf]  ;;  %v4628_v43 = vld [vmem:[%s9127_s2 + $0x530] sm:$0xf0]  ;;  %v4375_v46 = vor.u32 %v5891_v37, %v4372_v38  ;;  %v4314_v33 = vld [vmem:[%s9127_s2 + $0x2a8] sm:$0xf] }
  0x4e   :  { %v5955_v42 = vld [vmem:[%s9127_s2 + $0x524] sm:$0xf]  ;;  %v4228_v48 = vld [vmem:[%s9127_s2 + $0x210] sm:$0xf0]  ;;  %v4503_v50 = vor.u32 %v5923_v39, %v4500_v40  ;;  %v5878_v36 = vld [vmem:[%s9127_s2 + $0x2b4] sm:$0xf0] }
  0x4f   :  { %1381 = vmatpush.bf16.msra.mxu3 %v4567_v60  ;;  %v5855_v47 = vld [vmem:[%s9127_s2 + $0x204] sm:$0xf]  ;;  %v4484_v54 = vld [vmem:[%s9127_s2 + $0x410] sm:$0xf0]  ;;  %v4631_v60 = vor.u32 %v5955_v42, %v4628_v43  ;;  %v4442_v37 = vld [vmem:[%s9127_s2 + $0x3a8] sm:$0xf] }
  0x50   :  { %1393 = vmatpush.bf16.msrb.mxu2 %v4711_v52  ;;  %1356 = vmatpush.bf16.msra.mxu0 %v4295_v3  ;;  %v5887_v49 = vld [vmem:[%s9127_s2 + $0x304] sm:$0xf]  ;;  %v4356_v52 = vld [vmem:[%s9127_s2 + $0x310] sm:$0xf0]  ;;  %v4231_v0 = vor.u32 %v5855_v47, %v4228_v48  ;;  %v5910_v38 = vld [vmem:[%s9127_s2 + $0x3b4] sm:$0xf0] }
  0x51   :  { %1369 = vmatpush.bf16.msra.mxu1 %v4423_v4  ;;  %v5919_v53 = vld [vmem:[%s9127_s2 + $0x404] sm:$0xf]  ;;  %v4740_v63 = vld [vmem:[%s9127_s2 + $0x610] sm:$0xf0]  ;;  %v4359_v1 = vor.u32 %v5887_v49, %v4356_v52  ;;  %v4346_v4 = vld [vmem:[%s9127_s2 + $0x2e8] sm:$0xf] }
  0x52   :  { %v5983_v62 = vld [vmem:[%s9127_s2 + $0x604] sm:$0xf]  ;;  %v4612_v3 = vld [vmem:[%s9127_s2 + $0x510] sm:$0xf0]  ;;  %v4487_v5 = vor.u32 %v5919_v53, %v4484_v54  ;;  %v4347_v18 = vor.u32 %v5886_v8, %v4346_v4  ;;  %v4042_v40 = vld [vmem:[%s9127_s2 + $0x88] sm:$0xf] }
  0x53   :  { %1382 = vmatpush.bf16.msra.mxu3 %v4551_v9  ;;  %v4474_v9 = vld [vmem:[%s9127_s2 + $0x3e8] sm:$0xf]  ;;  %v4743_v12 = vor.u32 %v5983_v62, %v4740_v63  ;;  %v5842_v43 = vld [vmem:[%s9127_s2 + $0x194] sm:$0xf0] }
  0x54   :  { %1394 = vmatpush.bf16.msrb.mxu2 %v4695_v2  ;;  %1357 = vmatpush.bf16.msra.mxu0 %v4279_v16  ;;  %v5951_v2 = vld [vmem:[%s9127_s2 + $0x504] sm:$0xf]  ;;  %v4202_v16 = vld [vmem:[%s9127_s2 + $0x1c8] sm:$0xf]  ;;  %v4475_v19 = vor.u32 %v5918_v10, %v4474_v9  ;;  %v5874_v49 = vld [vmem:[%s9127_s2 + $0x294] sm:$0xf0] }
  0x55   :  { %1370 = vmatpush.bf16.msra.mxu1 %v4407_v17  ;;  %v5850_v17 = vld [vmem:[%s9127_s2 + $0x1d4] sm:$0xf0]  ;;  %v4170_v42 = vld [vmem:[%s9127_s2 + $0x188] sm:$0xf] }
  0x56   :  { %v4203_v25 = vor.u32 %v5850_v17, %v4202_v16  ;;  %v4298_v47 = vld [vmem:[%s9127_s2 + $0x288] sm:$0xf]  ;;  %v5906_v52 = vld [vmem:[%s9127_s2 + $0x394] sm:$0xf0]  ;;  %v4171_v53 = vor.u32 %v5842_v43, %v4170_v42 }
  0x57   :  { %1383 = vmatpush.bf16.msra.mxu3 %v4535_v21  ;;  %v4075_v21 = vor.u32 %v5818_v14, %v4074_v13  ;;  %v4026_v54 = vld [vmem:[%s9127_s2 + $0x68] sm:$0xf]  ;;  %v5838_v59 = vld [vmem:[%s9127_s2 + $0x174] sm:$0xf0] }
  0x58   :  { %1395 = vmatpush.bf16.msrb.mxu2 %v4679_v15  ;;  %1358 = vmatpush.bf16.msra.mxu0 %v4263_v28  ;;  %v4615_v15 = vor.u32 %v5951_v2, %v4612_v3  ;;  %v4186_v28 = vld [vmem:[%s9127_s2 + $0x1a8] sm:$0xf]  ;;  %v4027_v63 = vor.u32 %v5806_v56, %v4026_v54  ;;  %v5902_v2 = vld [vmem:[%s9127_s2 + $0x374] sm:$0xf0] }
  0x59   :  { %1371 = vmatpush.bf16.msra.mxu1 %v4391_v29  ;;  %v5846_v29 = vld [vmem:[%s9127_s2 + $0x1b4] sm:$0xf0]  ;;  %v4154_v58 = vld [vmem:[%s9127_s2 + $0x168] sm:$0xf] }
  0x5a   :  { %v4187_v39 = vor.u32 %v5846_v29, %v4186_v28  ;;  %v4282_v62 = vld [vmem:[%s9127_s2 + $0x268] sm:$0xf]  ;;  %v4155_v3 = vor.u32 %v5838_v59, %v4154_v58  ;;  %v5834_v8 = vld [vmem:[%s9127_s2 + $0x154] sm:$0xf0] }
  0x5b   :  { %1384 = vmatpush.bf16.msra.mxu3 %v4519_v34  ;;  %v4010_v4 = vld [vmem:[%s9127_s2 + $0x48] sm:$0xf]  ;;  %v5866_v13 = vld [vmem:[%s9127_s2 + $0x254] sm:$0xf0] }
  0x5c   :  { %1396 = vmatpush.bf16.msrb.mxu2 %v4663_v27  ;;  %1359 = vmatpush.bf16.msra.mxu0 %v4247_v44  ;;  %v5814_v27 = vld [vmem:[%s9127_s2 + $0xb4] sm:$0xf0]  ;;  %v4315_v44 = vor.u32 %v5878_v36, %v4314_v33  ;;  %v4394_v14 = vld [vmem:[%s9127_s2 + $0x348] sm:$0xf] }
  0x5d   :  { %1372 = vmatpush.bf16.msra.mxu1 %v4375_v46  ;;  %v4059_v34 = vor.u32 %v5814_v27, %v4058_v26  ;;  %v4443_v46 = vor.u32 %v5910_v38, %v4442_v37  ;;  %v3994_v17 = vld [vmem:[%s9127_s2 + $0x28] sm:$0xf]  ;;  %v5830_v20 = vld [vmem:[%s9127_s2 + $0x134] sm:$0xf0] }
  0x5e   :  { %v4250_v23 = vld [vmem:[%s9127_s2 + $0x228] sm:$0xf]  ;;  %v5862_v24 = vld [vmem:[%s9127_s2 + $0x234] sm:$0xf0] }
  0x5f   :  { %1385 = vmatpush.bf16.msra.mxu3 %v4503_v50  ;;  %v4426_v50 = vld [vmem:[%s9127_s2 + $0x388] sm:$0xf]  ;;  %v5894_v27 = vld [vmem:[%s9127_s2 + $0x334] sm:$0xf0]  ;;  %v4251_v38 = vor.u32 %v5862_v24, %v4250_v23 }
  0x60   :  { %1397 = vmatpush.bf16.msrb.mxu2 %v4647_v41  ;;  %1360 = vmatpush.bf16.msra.mxu0 %v4231_v0  ;;  %v5810_v41 = vld [vmem:[%s9127_s2 + $0x94] sm:$0xf0]  ;;  %v4427_v61 = vor.u32 %v5906_v52, %v4426_v50  ;;  %v4378_v26 = vld [vmem:[%s9127_s2 + $0x328] sm:$0xf]  ;;  %v4092_v50 = vld [vmem:[%s9127_s2 + $0xf8] sm:$0xf0] }
  0x61   :  { %1373 = vmatpush.bf16.msra.mxu1 %v4359_v1  ;;  %v4043_v48 = vor.u32 %v5810_v41, %v4042_v40  ;;  %v5870_v0 = vld [vmem:[%s9127_s2 + $0x274] sm:$0xf0]  ;;  %v4410_v1 = vld [vmem:[%s9127_s2 + $0x368] sm:$0xf] }
  0x62   :  { %v4283_v9 = vor.u32 %v5870_v0, %v4282_v62  ;;  %v4411_v10 = vor.u32 %v5902_v2, %v4410_v1  ;;  %v3978_v28 = vld [vmem:[%s9127_s2 + $0x8] sm:$0xf]  ;;  %v5826_v33 = vld [vmem:[%s9127_s2 + $0x114] sm:$0xf0]  ;;  %v5852_v1 = vld [vmem:[%s9127_s2 + $0x1ec] sm:$0xf] }
  0x63   :  { %1386 = vmatpush.bf16.msra.mxu3 %v4487_v5  ;;  %1361 = vmatmul.bf16.vlgmr.msra.gmra.mxu0 %v6559_v51  ;;  %v5802_v5 = vld [vmem:[%s9127_s2 + $0x54] sm:$0xf0]  ;;  %v4730_v37 = vld [vmem:[%s9127_s2 + $0x5e8] sm:$0xf]  ;;  %v4220_v2 = vld [vmem:[%s9127_s2 + $0x1f8] sm:$0xf0] }
  0x64   :  { %1398 = vmatpush.bf16.msrb.mxu2 %v4631_v60  ;;  %1412 = vmatpush.bf16.msrb.mxu0 %v4743_v12  ;;  %v4299_v60 = vor.u32 %v5874_v49, %v4298_v47  ;;  %v4011_v12 = vor.u32 %v5802_v5, %v4010_v4  ;;  %v5950_v36 = vld [vmem:[%s9127_s2 + $0x4f4] sm:$0xf0]  ;;  %v4234_v41 = vld [vmem:[%s9127_s2 + $0x208] sm:$0xf]  ;;  %v5820_v47 = vld [vmem:[%s9127_s2 + $0xec] sm:$0xf] }
  0x65   :  { %1418 = vmatpush.bf16.msrb.mxu1 %v4091_v6  ;;  %v4138_v6 = vld [vmem:[%s9127_s2 + $0x148] sm:$0xf]  ;;  %v5982_v40 = vld [vmem:[%s9127_s2 + $0x5f4] sm:$0xf0]  ;;  %v5816_v4 = vld [vmem:[%s9127_s2 + $0xcc] sm:$0xf] }
  0x66   :  { %1387 = vmatmul.bf16.vlgmr.msra.gmra.mxu3 %v6773_v30  ;;  %1374 = vmatmul.bf16.vlgmr.msra.gmra.mxu1 %v6572_v57  ;;  %v4139_v16 = vor.u32 %v5834_v8, %v4138_v6  ;;  %v5858_v42 = vld [vmem:[%s9127_s2 + $0x214] sm:$0xf0]  ;;  %v4746_v52 = vld [vmem:[%s9127_s2 + $0x608] sm:$0xf]  ;;  %v4731_v54 = vor.u32 %v5982_v40, %v4730_v37  ;;  %v4076_v5 = vld [vmem:[%s9127_s2 + $0xd8] sm:$0xf0] }
  0x67   :  { %1431 = vmatpush.bf16.msrb.mxu3 %v4219_v11  ;;  %v4266_v11 = vld [vmem:[%s9127_s2 + $0x248] sm:$0xf]  ;;  %v5946_v58 = vld [vmem:[%s9127_s2 + $0x4d4] sm:$0xf0]  ;;  %v4235_v59 = vor.u32 %v5858_v42, %v4234_v41  ;;  %v5840_v40 = vld [vmem:[%s9127_s2 + $0x18c] sm:$0xf] }
  0x68   :  { %1399 = vmatpush.bf16.msrb.mxu2 %v4615_v15  ;;  %1444 = vmatpush.bf16.msra.mxu0 %v4347_v18  ;;  %v5898_v15 = vld [vmem:[%s9127_s2 + $0x354] sm:$0xf0]  ;;  %v4586_v56 = vld [vmem:[%s9127_s2 + $0x4c8] sm:$0xf]  ;;  %v4172_v41 = vld [vmem:[%s9127_s2 + $0x198] sm:$0xf0] }
  0x69   :  { %1419 = vmatpush.bf16.msrb.mxu1 %v4075_v21  ;;  %v5798_v18 = vld [vmem:[%s9127_s2 + $0x34] sm:$0xf0]  ;;  %v4267_v21 = vor.u32 %v5866_v13, %v4266_v11  ;;  %v4395_v22 = vor.u32 %v5898_v15, %v4394_v14  ;;  %v4570_v8 = vld [vmem:[%s9127_s2 + $0x4a8] sm:$0xf]  ;;  %v4079_v13 = vor.u32 %v5816_v4, %v4076_v5  ;;  %v5848_v14 = vld [vmem:[%s9127_s2 + $0x1cc] sm:$0xf] }
  0x6a   :  { %v5978_v62 = vld [vmem:[%s9127_s2 + $0x5d4] sm:$0xf0]  ;;  %v4698_v11 = vld [vmem:[%s9127_s2 + $0x5a8] sm:$0xf]  ;;  %v4204_v15 = vld [vmem:[%s9127_s2 + $0x1d8] sm:$0xf0] }
  0x6b   :  { %1432 = vmatpush.bf16.msrb.mxu3 %v4203_v25  ;;  %1400 = vmatmul.bf16.vlgmr.msrb.gmra.mxu2 %v6784_v35  ;;  %v3995_v25 = vor.u32 %v5798_v18, %v3994_v17  ;;  %v5812_v17 = vld [vmem:[%s9127_s2 + $0xac] sm:$0xf]  ;;  %v4060_v18 = vld [vmem:[%s9127_s2 + $0xb8] sm:$0xf0]  ;;  %v4682_v23 = vld [vmem:[%s9127_s2 + $0x588] sm:$0xf] }
  0x6c   :  { %1457 = vmatpush.bf16.msra.mxu2 %v4475_v19  ;;  %1445 = vmatpush.bf16.msra.mxu0 %v4331_v31  ;;  %v4122_v19 = vld [vmem:[%s9127_s2 + $0x128] sm:$0xf]  ;;  %v5794_v31 = vld [vmem:[%s9127_s2 + $0x14] sm:$0xf0]  ;;  %v5832_v4 = vld [vmem:[%s9127_s2 + $0x14c] sm:$0xf] }
  0x6d   :  { %1420 = vmatpush.bf16.msrb.mxu1 %v4059_v34  ;;  %v4123_v29 = vor.u32 %v5830_v20, %v4122_v19  ;;  %v4602_v34 = vld [vmem:[%s9127_s2 + $0x4e8] sm:$0xf]  ;;  %v3979_v43 = vor.u32 %v5794_v31, %v3978_v28  ;;  %v5970_v24 = vld [vmem:[%s9127_s2 + $0x594] sm:$0xf0]  ;;  %v4044_v31 = vld [vmem:[%s9127_s2 + $0x98] sm:$0xf0] }
  0x6e   :  { %v4603_v49 = vor.u32 %v5950_v36, %v4602_v34  ;;  %v4554_v20 = vld [vmem:[%s9127_s2 + $0x488] sm:$0xf]  ;;  %v5934_v34 = vld [vmem:[%s9127_s2 + $0x474] sm:$0xf0]  ;;  %v4140_v5 = vld [vmem:[%s9127_s2 + $0x158] sm:$0xf0] }
  0x6f   :  { %1433 = vmatpush.bf16.msrb.mxu3 %v4187_v39  ;;  %v4379_v39 = vor.u32 %v5894_v27, %v4378_v26  ;;  %v5844_v26 = vld [vmem:[%s9127_s2 + $0x1ac] sm:$0xf]  ;;  %v4188_v27 = vld [vmem:[%s9127_s2 + $0x1b8] sm:$0xf0]  ;;  %v4666_v37 = vld [vmem:[%s9127_s2 + $0x568] sm:$0xf] }
  0x70   :  { %1458 = vmatpush.bf16.msra.mxu2 %v4459_v32  ;;  %1446 = vmatpush.bf16.msra.mxu0 %v4315_v44  ;;  %v4106_v32 = vld [vmem:[%s9127_s2 + $0x108] sm:$0xf]  ;;  %v4191_v36 = vor.u32 %v5844_v26, %v4188_v27 }
  0x71   :  { %1421 = vmatpush.bf16.msrb.mxu1 %v4043_v48  ;;  %v4362_v44 = vld [vmem:[%s9127_s2 + $0x308] sm:$0xf]  ;;  %v4107_v48 = vor.u32 %v5826_v33, %v4106_v32  ;;  %v4683_v32 = vor.u32 %v5970_v24, %v4682_v23  ;;  %v5792_v24 = vld [vmem:[%s9127_s2 + $0xc] sm:$0xf] }
  0x72   :  { %v4538_v33 = vld [vmem:[%s9127_s2 + $0x468] sm:$0xf] }
  0x73   :  { %1434 = vmatpush.bf16.msrb.mxu3 %v4171_v53  ;;  %4753 = vmatmul.msk.bf16.vlgmr.msrb.gmra.mxu0 %vm1232_vm0, %v6682_v45  ;;  %v5986_v53 = vld [vmem:[%s9127_s2 + $0x614] sm:$0xf0]  ;;  %v4539_v42 = vor.u32 %v5934_v34, %v4538_v33  ;;  %v5880_v33 = vld [vmem:[%s9127_s2 + $0x2cc] sm:$0xf]  ;;  %v4332_v34 = vld [vmem:[%s9127_s2 + $0x2d8] sm:$0xf0] }
  0x74   :  { %1459 = vmatpush.bf16.msra.mxu2 %v4443_v46  ;;  %1447 = vmatpush.bf16.msra.mxu0 %v4299_v60  ;;  %v5890_v46 = vld [vmem:[%s9127_s2 + $0x314] sm:$0xf0]  ;;  %v4747_v0 = vor.u32 %v5986_v53, %v4746_v52 }
  0x75   :  { %1422 = vmatpush.bf16.msrb.mxu1 %v4027_v63  ;;  %v4363_v60 = vor.u32 %v5890_v46, %v4362_v44  ;;  %v4095_v63 = vor.u32 %v5820_v47, %v4092_v50  ;;  %v4028_v44 = vld [vmem:[%s9127_s2 + $0x78] sm:$0xf0]  ;;  %v4522_v47 = vld [vmem:[%s9127_s2 + $0x448] sm:$0xf]  ;;  %v5962_v52 = vld [vmem:[%s9127_s2 + $0x554] sm:$0xf0] }
  0x76   :  { %v4650_v50 = vld [vmem:[%s9127_s2 + $0x548] sm:$0xf] }
  0x77   :  { %1435 = vmatpush.bf16.msrb.mxu3 %v4155_v3  ;;  %v4587_v3 = vor.u32 %v5946_v58, %v4586_v56  ;;  %v4156_v56 = vld [vmem:[%s9127_s2 + $0x178] sm:$0xf0] }
  0x78   :  { %1460 = vmatpush.bf16.msra.mxu2 %v4427_v61  ;;  %1448 = vmatpush.bf16.msra.mxu0 %v4283_v9  ;;  %v4714_v61 = vld [vmem:[%s9127_s2 + $0x5c8] sm:$0xf]  ;;  %v5942_v9 = vld [vmem:[%s9127_s2 + $0x4b4] sm:$0xf0] }
  0x79   :  { %1423 = vmatpush.bf16.msrb.mxu1 %v4011_v12  ;;  %v4715_v6 = vor.u32 %v5978_v62, %v4714_v61  ;;  %v5974_v12 = vld [vmem:[%s9127_s2 + $0x5b4] sm:$0xf0]  ;;  %v4651_v61 = vor.u32 %v5962_v52, %v4650_v50  ;;  %v4506_v62 = vld [vmem:[%s9127_s2 + $0x428] sm:$0xf]  ;;  %v5876_v50 = vld [vmem:[%s9127_s2 + $0x2ac] sm:$0xf] }
  0x7a   :  { %v4699_v19 = vor.u32 %v5974_v12, %v4698_v11  ;;  %v5922_v12 = vld [vmem:[%s9127_s2 + $0x414] sm:$0xf0]  ;;  %v4316_v52 = vld [vmem:[%s9127_s2 + $0x2b8] sm:$0xf0] }
  0x7b   :  { %1436 = vmatpush.bf16.msrb.mxu3 %v4139_v16  ;;  %v4571_v16 = vor.u32 %v5942_v9, %v4570_v8  ;;  %v5796_v8 = vld [vmem:[%s9127_s2 + $0x2c] sm:$0xf]  ;;  %v3996_v9 = vld [vmem:[%s9127_s2 + $0x38] sm:$0xf0] }
  0x7c   :  { %1461 = vmatpush.bf16.msra.mxu2 %v4411_v10  ;;  %1449 = vmatpush.bf16.msra.mxu0 %v4267_v21  ;;  %v4223_v10 = vor.u32 %v5852_v1, %v4220_v2  ;;  %v5938_v21 = vld [vmem:[%s9127_s2 + $0x494] sm:$0xf0]  ;;  %v4634_v1 = vld [vmem:[%s9127_s2 + $0x528] sm:$0xf] }
  0x7d   :  { %1424 = vmatpush.bf16.msrb.mxu1 %v3995_v25  ;;  %v4063_v25 = vor.u32 %v5812_v17, %v4060_v18  ;;  %v4555_v28 = vor.u32 %v5938_v21, %v4554_v20  ;;  %v5958_v2 = vld [vmem:[%s9127_s2 + $0x534] sm:$0xf0]  ;;  %v4348_v17 = vld [vmem:[%s9127_s2 + $0x2f8] sm:$0xf0]  ;;  %v5916_v18 = vld [vmem:[%s9127_s2 + $0x3ec] sm:$0xf] }
  0x7e   :  { %v4635_v11 = vor.u32 %v5958_v2, %v4634_v1  ;;  %v4476_v20 = vld [vmem:[%s9127_s2 + $0x3f8] sm:$0xf0]  ;;  %v5828_v21 = vld [vmem:[%s9127_s2 + $0x12c] sm:$0xf] }
  0x7f   :  { %1437 = vmatpush.bf16.msrb.mxu3 %v4123_v29  ;;  %v5808_v29 = vld [vmem:[%s9127_s2 + $0x8c] sm:$0xf]  ;;  %v4300_v2 = vld [vmem:[%s9127_s2 + $0x298] sm:$0xf0] }
  0x80   :  { %1462 = vmatpush.bf16.msra.mxu2 %v4395_v22  ;;  %1450 = vmatpush.bf16.msra.mxu0 %v4251_v38  ;;  %v4207_v22 = vor.u32 %v5848_v14, %v4204_v15  ;;  %v5966_v38 = vld [vmem:[%s9127_s2 + $0x574] sm:$0xf0]  ;;  %v4143_v15 = vor.u32 %v5832_v4, %v4140_v5  ;;  %v5872_v1 = vld [vmem:[%s9127_s2 + $0x28c] sm:$0xf]  ;;  %v4428_v5 = vld [vmem:[%s9127_s2 + $0x398] sm:$0xf0] }
  0x81   :  { %1425 = vmatpush.bf16.msrb.mxu1 %v3979_v43  ;;  %v5804_v43 = vld [vmem:[%s9127_s2 + $0x6c] sm:$0xf]  ;;  %v4667_v46 = vor.u32 %v5966_v38, %v4666_v37  ;;  %v5954_v14 = vld [vmem:[%s9127_s2 + $0x514] sm:$0xf0]  ;;  %v4460_v38 = vld [vmem:[%s9127_s2 + $0x3d8] sm:$0xf0] }
  0x82   :  { %v4031_v53 = vor.u32 %v5804_v43, %v4028_v44  ;;  %v4732_v43 = vld [vmem:[%s9127_s2 + $0x5f8] sm:$0xf0]  ;;  %v4335_v44 = vor.u32 %v5880_v33, %v4332_v34  ;;  %v5904_v4 = vld [vmem:[%s9127_s2 + $0x38c] sm:$0xf] }
  0x83   :  { %1438 = vmatpush.bf16.msrb.mxu3 %v4107_v48  ;;  %v5930_v48 = vld [vmem:[%s9127_s2 + $0x454] sm:$0xf0]  ;;  %v5964_v33 = vld [vmem:[%s9127_s2 + $0x56c] sm:$0xf]  ;;  %v4668_v34 = vld [vmem:[%s9127_s2 + $0x578] sm:$0xf0] }
  0x84   :  { %1463 = vmatpush.bf16.msra.mxu2 %v4379_v39  ;;  %1451 = vmatpush.bf16.msra.mxu0 %v4235_v59  ;;  %v4047_v39 = vor.u32 %v5808_v29, %v4044_v31  ;;  %v4523_v58 = vor.u32 %v5930_v48, %v4522_v47  ;;  %v5800_v59 = vld [vmem:[%s9127_s2 + $0x4c] sm:$0xf]  ;;  %v4604_v29 = vld [vmem:[%s9127_s2 + $0x4f8] sm:$0xf0]  ;;  %v4479_v31 = vor.u32 %v5916_v18, %v4476_v20 }
  0x85   :  { %1470 = vmatpush.bf16.msra.mxu1 %v4603_v49  ;;  %v4175_v49 = vor.u32 %v5840_v40, %v4172_v41  ;;  %v4108_v40 = vld [vmem:[%s9127_s2 + $0x118] sm:$0xf0] }
  0x86   :  { %1439 = vmatmul.bf16.vlgmr.msrb.gmra.mxu3 %v6603_v7  ;;  %1426 = vmatmul.bf16.vlgmr.msrb.gmra.mxu1 %v6570_v55  ;;  %v4588_v47 = vld [vmem:[%s9127_s2 + $0x4d8] sm:$0xf0] }
  0x87   :  { %1483 = vmatpush.bf16.msra.mxu3 %v4731_v54  ;;  %1452 = vmatmul.bf16.vlgmr.msra.gmra.mxu0 %v6559_v51  ;;  %v5836_v54 = vld [vmem:[%s9127_s2 + $0x16c] sm:$0xf]  ;;  %v4684_v20 = vld [vmem:[%s9127_s2 + $0x598] sm:$0xf0] }
  0x88   :  { %1464 = vmatpush.bf16.msra.mxu2 %v4363_v60  ;;  %1503 = vmatpush.bf16.msrb.mxu0 %v4747_v0  ;;  %v4012_v60 = vld [vmem:[%s9127_s2 + $0x58] sm:$0xf0]  ;;  %v4159_v0 = vor.u32 %v5836_v54, %v4156_v56  ;;  %v5908_v54 = vld [vmem:[%s9127_s2 + $0x3ac] sm:$0xf] }
  0x89   :  { %1471 = vmatpush.bf16.msra.mxu1 %v4587_v3  ;;  %v4015_v3 = vor.u32 %v5800_v59, %v4012_v60  ;;  %v4444_v56 = vld [vmem:[%s9127_s2 + $0x3b8] sm:$0xf0]  ;;  %v5976_v59 = vld [vmem:[%s9127_s2 + $0x5cc] sm:$0xf] }
  0x8a   :  { %v4716_v60 = vld [vmem:[%s9127_s2 + $0x5d8] sm:$0xf0] }
  0x8b   :  { %1484 = vmatpush.bf16.msra.mxu3 %v4715_v6  ;;  %1465 = vmatmul.bf16.vlgmr.msra.gmra.mxu2 %v6572_v57 }
  0x8c   :  { %1509 = vmatpush.bf16.msrb.mxu2 %v4095_v63  ;;  %1522 = vmatpush.bf16.msra.mxu0 %v4223_v10  ;;  %v5926_v63 = vld [vmem:[%s9127_s2 + $0x434] sm:$0xf0]  ;;  %v4490_v10 = vld [vmem:[%s9127_s2 + $0x408] sm:$0xf] }
  0x8d   :  { %1472 = vmatpush.bf16.msra.mxu1 %v4571_v16  ;;  %v4507_v6 = vor.u32 %v5926_v63, %v4506_v62  ;;  %v5884_v16 = vld [vmem:[%s9127_s2 + $0x2ec] sm:$0xf]  ;;  %v4491_v23 = vor.u32 %v5922_v12, %v4490_v10  ;;  %v4572_v63 = vld [vmem:[%s9127_s2 + $0x4b8] sm:$0xf0]  ;;  %v4303_v10 = vor.u32 %v5872_v1, %v4300_v2  ;;  %v4431_v12 = vor.u32 %v5904_v4, %v4428_v5 }
  0x8e   :  { %v4351_v27 = vor.u32 %v5884_v16, %v4348_v17  ;;  %v5940_v62 = vld [vmem:[%s9127_s2 + $0x4ac] sm:$0xf] }
  0x8f   :  { %1485 = vmatpush.bf16.msra.mxu3 %v4699_v19  ;;  %v3999_v19 = vor.u32 %v5796_v8, %v3996_v9  ;;  %v5972_v8 = vld [vmem:[%s9127_s2 + $0x5ac] sm:$0xf]  ;;  %v4700_v9 = vld [vmem:[%s9127_s2 + $0x5b8] sm:$0xf0] }
  0x90   :  { %1510 = vmatpush.bf16.msrb.mxu2 %v4079_v13  ;;  %1523 = vmatpush.bf16.msra.mxu0 %v4207_v22  ;;  %v4618_v13 = vld [vmem:[%s9127_s2 + $0x508] sm:$0xf]  ;;  %v4124_v22 = vld [vmem:[%s9127_s2 + $0x138] sm:$0xf0]  ;;  %v5900_v16 = vld [vmem:[%s9127_s2 + $0x36c] sm:$0xf] }
  0x91   :  { %1473 = vmatpush.bf16.msra.mxu1 %v4555_v28  ;;  %v4619_v26 = vor.u32 %v5954_v14, %v4618_v13  ;;  %v5948_v28 = vld [vmem:[%s9127_s2 + $0x4ec] sm:$0xf]  ;;  %v4284_v14 = vld [vmem:[%s9127_s2 + $0x278] sm:$0xf0] }
  0x92   :  { %v4607_v41 = vor.u32 %v5948_v28, %v4604_v29  ;;  %v5868_v13 = vld [vmem:[%s9127_s2 + $0x26c] sm:$0xf] }
  0x93   :  { %1486 = vmatpush.bf16.msra.mxu3 %v4683_v32  ;;  %v4127_v32 = vor.u32 %v5828_v21, %v4124_v22  ;;  %v4287_v21 = vor.u32 %v5868_v13, %v4284_v14  ;;  %v5932_v22 = vld [vmem:[%s9127_s2 + $0x46c] sm:$0xf] }
  0x94   :  { %1511 = vmatpush.bf16.msrb.mxu2 %v4063_v25  ;;  %1524 = vmatpush.bf16.msra.mxu0 %v4191_v36  ;;  %v3980_v25 = vld [vmem:[%s9127_s2 + $0x18] sm:$0xf0]  ;;  %v5912_v36 = vld [vmem:[%s9127_s2 + $0x3cc] sm:$0xf] }
  0x95   :  { %1474 = vmatpush.bf16.msra.mxu1 %v4539_v42  ;;  %v3983_v37 = vor.u32 %v5792_v24, %v3980_v25  ;;  %v5980_v42 = vld [vmem:[%s9127_s2 + $0x5ec] sm:$0xf]  ;;  %v4463_v48 = vor.u32 %v5912_v36, %v4460_v38 }
  0x96   :  { %v5864_v25 = vld [vmem:[%s9127_s2 + $0x24c] sm:$0xf] }
  0x97   :  { %1487 = vmatpush.bf16.msra.mxu3 %v4667_v46  ;;  %4754 = vmatmul.msk.bf16.vlgmr.msrb.gmra.mxu0 %vm1232_vm0, %v6682_v45  ;;  %v5944_v46 = vld [vmem:[%s9127_s2 + $0x4cc] sm:$0xf] }
  0x98   :  { %1512 = vmatpush.bf16.msrb.mxu2 %v4047_v39  ;;  %1525 = vmatpush.bf16.msra.mxu0 %v4175_v49  ;;  %v5824_v39 = vld [vmem:[%s9127_s2 + $0x10c] sm:$0xf] }
  0x99   :  { %1475 = vmatpush.bf16.msra.mxu1 %v4523_v58  ;;  %v4111_v49 = vor.u32 %v5824_v39, %v4108_v40  ;;  %v4591_v58 = vor.u32 %v5944_v46, %v4588_v47  ;;  %v5896_v29 = vld [vmem:[%s9127_s2 + $0x34c] sm:$0xf]  ;;  %v4524_v39 = vld [vmem:[%s9127_s2 + $0x458] sm:$0xf0] }
  0x9a   :  { %v5928_v38 = vld [vmem:[%s9127_s2 + $0x44c] sm:$0xf]  ;;  %v4380_v47 = vld [vmem:[%s9127_s2 + $0x338] sm:$0xf0] }
  0x9b   :  { %1488 = vmatpush.bf16.msra.mxu3 %v4651_v61  ;;  %v4319_v61 = vor.u32 %v5876_v50, %v4316_v52  ;;  %v5892_v46 = vld [vmem:[%s9127_s2 + $0x32c] sm:$0xf]  ;;  %v4652_v52 = vld [vmem:[%s9127_s2 + $0x558] sm:$0xf0] }
  0x9c   :  { %1513 = vmatpush.bf16.msrb.mxu2 %v4031_v53  ;;  %1526 = vmatpush.bf16.msra.mxu0 %v4159_v0  ;;  %v4735_v53 = vor.u32 %v5980_v42, %v4732_v43  ;;  %v4447_v0 = vor.u32 %v5908_v54, %v4444_v56  ;;  %v5860_v42 = vld [vmem:[%s9127_s2 + $0x22c] sm:$0xf]  ;;  %v4252_v43 = vld [vmem:[%s9127_s2 + $0x238] sm:$0xf0] }
  0x9d   :  { %1476 = vmatpush.bf16.msra.mxu1 %v4507_v6  ;;  %v4575_v6 = vor.u32 %v5940_v62, %v4572_v63  ;;  %v5960_v50 = vld [vmem:[%s9127_s2 + $0x54c] sm:$0xf]  ;;  %v4255_v54 = vor.u32 %v5860_v42, %v4252_v43 }
  0x9e   :  { %v5924_v56 = vld [vmem:[%s9127_s2 + $0x42c] sm:$0xf]  ;;  %v4655_v63 = vor.u32 %v5960_v50, %v4652_v52 }
  0x9f   :  { %1489 = vmatpush.bf16.msra.mxu3 %v4635_v11  ;;  %v5936_v11 = vld [vmem:[%s9127_s2 + $0x48c] sm:$0xf] }
  0xa0   :  { %1514 = vmatpush.bf16.msrb.mxu2 %v4015_v3  ;;  %1527 = vmatpush.bf16.msra.mxu0 %v4143_v15  ;;  %v4719_v3 = vor.u32 %v5976_v59, %v4716_v60  ;;  %v4703_v15 = vor.u32 %v5972_v8, %v4700_v9  ;;  %v4383_v59 = vor.u32 %v5892_v46, %v4380_v47  ;;  %v5856_v60 = vld [vmem:[%s9127_s2 + $0x20c] sm:$0xf]  ;;  %v5987_v46 = vld [vmem:[%s9130_s3] sm:$0xff] }
  0xa1   :  { %1477 = vmatpush.bf16.msra.mxu1 %v4491_v23  ;;  %v4540_v23 = vld [vmem:[%s9127_s2 + $0x478] sm:$0xf0]  ;;  %v7480_v28 = vpop.f32.mrf.mxu1  ;;  %v5888_v62 = vld [vmem:[%s9127_s2 + $0x30c] sm:$0xf] }
  0xa2   :  { %v5984_v2 = vld [vmem:[%s9127_s2 + $0x60c] sm:$0xf] }
  0xa3   :  { %1490 = vmatpush.bf16.msra.mxu3 %v4619_v26  ;;  %v4268_v26 = vld [vmem:[%s9127_s2 + $0x258] sm:$0xf0]  ;;  %v5956_v5 = vld [vmem:[%s9127_s2 + $0x52c] sm:$0xf] }
  0xa4   :  { %1515 = vmatpush.bf16.msrb.mxu2 %v3999_v19  ;;  %1528 = vmatpush.bf16.msra.mxu0 %v4127_v32  ;;  %v7460_v17 = vpop.f32.mrf.mxu0  ;;  %v5968_v19 = vld [vmem:[%s9127_s2 + $0x58c] sm:$0xf]  ;;  %v4543_v32 = vor.u32 %v5932_v22, %v4540_v23  ;;  %v5993_v22 = vld [vmem:[%s9130_s3 + $0x30] sm:$0xff] }
  0xa5   :  { %1535 = vmatpush.bf16.msrb.mxu1 %v4351_v27  ;;  %v4687_v27 = vor.u32 %v5968_v19, %v4684_v20  ;;  %v4620_v19 = vld [vmem:[%s9127_s2 + $0x518] sm:$0xf0]  ;;  %v5988_v43 = vld [vmem:[%s9130_s3 + $0x8] sm:$0xff] }
  0xa6   :  { %1478 = vmatmul.bf16.vlgmr.msra.gmra.mxu1 %v6773_v30  ;;  %1491 = vmatmul.bf16.vlgmr.msra.gmra.mxu3 %v6784_v35  ;;  %v6002_v20 = vld [vmem:[%s9130_s3 + $0x78] sm:$0xff] }
  0xa7   :  { %1548 = vmatpush.bf16.msrb.mxu3 %v4479_v31  ;;  %v4396_v31 = vld [vmem:[%s9127_s2 + $0x358] sm:$0xf0] }
  0xa8   :  { %1516 = vmatpush.bf16.msrb.mxu2 %v3983_v37  ;;  %1529 = vmatpush.bf16.msra.mxu0 %v4111_v49  ;;  %v4271_v37 = vor.u32 %v5864_v25, %v4268_v26  ;;  %v4399_v40 = vor.u32 %v5896_v29, %v4396_v31  ;;  %v4527_v49 = vor.u32 %v5928_v38, %v4524_v39  ;;  %v5992_v26 = vld [vmem:[%s9130_s3 + $0x28] sm:$0xff]  ;;  %v5999_v31 = vld [vmem:[%s9130_s3 + $0x60] sm:$0xff] }
  0xa9   :  { %1536 = vmatpush.bf16.msrb.mxu1 %v4335_v44  ;;  %v7494_v36 = vpop.f32.mrf.mxu2  ;;  %v4671_v44 = vor.u32 %v5964_v33, %v4668_v34  ;;  %v1260_v1 = vpop.f32.mrf.mxu1  ;;  %v5998_v34 = vld [vmem:[%s9130_s3 + $0x58] sm:$0xff] }
  0xaa   :  { %v6010_v1 = vld [vmem:[%s9130_s3 + $0xb8] sm:$0xff] }
  0xab   :  { %1549 = vmatpush.bf16.msrb.mxu3 %v4463_v48  ;;  %1517 = vmatmul.bf16.vlgmr.msrb.gmra.mxu2 %v6570_v55  ;;  %v4556_v55 = vld [vmem:[%s9127_s2 + $0x498] sm:$0xf0] }
  0xac   :  { %1561 = vmatpush.bf16.msra.mxu2 %v4607_v41  ;;  %1574 = vmatpush.bf16.msrb.mxu0 %v4735_v53  ;;  %v4559_v18 = vor.u32 %v5936_v11, %v4556_v55  ;;  %v7502_v41 = vpop.f32.mrf.mxu3  ;;  %v1247_v48 = vpop.f32.mrf.mxu0  ;;  %v7525_v53 = vld [vmem:[%s9129_s6] sm:$0xf]  ;;  %v4492_v11 = vld [vmem:[%s9127_s2 + $0x418] sm:$0xf0] }
  0xad   :  { %1537 = vmatpush.bf16.msrb.mxu1 %v4319_v61  ;;  %1530 = vmatmul.bf16.vlgmr.msra.gmra.mxu0 %v6603_v7  ;;  %v4412_v7 = vld [vmem:[%s9127_s2 + $0x378] sm:$0xf0]  ;;  %v244_v55 = vperm.slane %v7525_v53, 0  ;;  %v245_v52 = vperm.slane %v7525_v53, 1 }
  0xae   :  { %v4415_v24 = vor.u32 %v5900_v16, %v4412_v7  ;;  %v4236_v61 = vld [vmem:[%s9127_s2 + $0x218] sm:$0xf0] }
  0xaf   :  { %1550 = vmatpush.bf16.msrb.mxu3 %v4447_v0  ;;  %v4364_v0 = vld [vmem:[%s9127_s2 + $0x318] sm:$0xf0]  ;;  %v4239_v9 = vor.u32 %v5856_v60, %v4236_v61 }
  0xb0   :  { %1562 = vmatpush.bf16.msra.mxu2 %v4591_v58  ;;  %1575 = vmatpush.bf16.msrb.mxu0 %v4719_v3  ;;  %v4508_v58 = vld [vmem:[%s9127_s2 + $0x438] sm:$0xf0] }
  0xb1   :  { %1538 = vmatpush.bf16.msrb.mxu1 %v4303_v10  ;;  %v4748_v3 = vld [vmem:[%s9127_s2 + $0x618] sm:$0xf0]  ;;  %v4511_v4 = vor.u32 %v5924_v56, %v4508_v58  ;;  %v1273_v8 = vpop.f32.mrf.mxu2  ;;  %v5920_v10 = vld [vmem:[%s9127_s2 + $0x40c] sm:$0xf] }
  0xb2   :  { %v4751_v13 = vor.u32 %v5984_v2, %v4748_v3  ;;  %v4495_v7 = vor.u32 %v5920_v10, %v4492_v11  ;;  %v6008_v8 = vld [vmem:[%s9130_s3 + $0xa8] sm:$0xff] }
  0xb3   :  { %1551 = vmatpush.bf16.msrb.mxu3 %v4431_v12  ;;  %v4367_v12 = vor.u32 %v5888_v62, %v4364_v0 }
  0xb4   :  { %1563 = vmatpush.bf16.msra.mxu2 %v4575_v6  ;;  %1576 = vmatpush.bf16.msrb.mxu0 %v4703_v15  ;;  %v4636_v6 = vld [vmem:[%s9127_s2 + $0x538] sm:$0xf0]  ;;  %v1286_v14 = vpop.f32.mrf.mxu3 }
  0xb5   :  { %1539 = vmatpush.bf16.msrb.mxu1 %v4287_v21  ;;  %v5994_v15 = vld [vmem:[%s9130_s3 + $0x38] sm:$0xff]  ;;  %v4639_v16 = vor.u32 %v5956_v5, %v4636_v6  ;;  %v1246_v21 = vadd.f32 %v7460_v17, %v244_v55  ;;  %v6001_v17 = vld [vmem:[%s9130_s3 + $0x70] sm:$0xff] }
  0xb7   :  { %1552 = vmatpush.bf16.msrb.mxu3 %v4415_v24  ;;  %v1259_v25 = vadd.f32 %v7480_v28, %v1246_v21 }
  0xb8   :  { %1564 = vmatpush.bf16.msra.mxu2 %v4559_v18  ;;  %1577 = vmatpush.bf16.msrb.mxu0 %v4687_v27  ;;  %v5952_v18 = vld [vmem:[%s9127_s2 + $0x50c] sm:$0xf]  ;;  %v5991_v27 = vld [vmem:[%s9130_s3 + $0x20] sm:$0xff] }
  0xb9   :  { %1540 = vmatpush.bf16.msrb.mxu1 %v4271_v37  ;;  %v4623_v23 = vor.u32 %v5952_v18, %v4620_v19  ;;  %v1323_v24 = vpop.f32.mrf.mxu2 }
  0xbb   :  { %1553 = vmatpush.bf16.msrb.mxu3 %v4399_v40 }
  0xbc   :  { %1565 = vmatpush.bf16.msra.mxu2 %v4543_v32  ;;  %1578 = vmatpush.bf16.msrb.mxu0 %v4671_v44 }
  0xbd   :  { %1541 = vmatpush.bf16.msrb.mxu1 %v4255_v54 }
  0xbf   :  { %1554 = vmatpush.bf16.msrb.mxu3 %v4383_v59 }
  0xc0   :  { %1566 = vmatpush.bf16.msra.mxu2 %v4527_v49  ;;  %1579 = vmatpush.bf16.msrb.mxu0 %v4655_v63  ;;  %v5995_v49 = vld [vmem:[%s9130_s3 + $0x40] sm:$0xff] }
  0xc1   :  { %1542 = vmatpush.bf16.msrb.mxu1 %v4239_v9  ;;  %v1325_v29 = vpop.f32.mrf.mxu2 }
  0xc3   :  { %1555 = vmatpush.bf16.msrb.mxu3 %v4367_v12  ;;  %v1310_v28 = vpop.f32.mrf.mxu1  ;;  %v6007_v12 = vld [vmem:[%s9130_s3 + $0xa0] sm:$0xff] }
  0xc4   :  { %1567 = vmatpush.bf16.msra.mxu2 %v4511_v4  ;;  %1580 = vmatpush.bf16.msrb.mxu0 %v4639_v16  ;;  %v6009_v4 = vld [vmem:[%s9130_s3 + $0xb0] sm:$0xff]  ;;  %v6006_v16 = vld [vmem:[%s9130_s3 + $0x98] sm:$0xff] }
  0xc5   :  { %1594 = vmatpush.bf16.msra.mxu1 %v4751_v13 }
  0xc6   :  { %1543 = vmatmul.bf16.vlgmr.msrb.gmra.mxu1 %v6559_v51  ;;  %1556 = vmatmul.bf16.vlgmr.msrb.gmra.mxu3 %v6572_v57  ;;  %v6000_v51 = vld [vmem:[%s9130_s3 + $0x68] sm:$0xff]  ;;  %v1272_v57 = vadd.f32 %v7494_v36, %v1259_v25  ;;  %v5989_v36 = vld [vmem:[%s9130_s3 + $0x10] sm:$0xff]  ;;  %v6018_v25 = vld [vmem:[%s9130_s3 + $0xf8] sm:$0xff] }
  0xc7   :  { %1867 = vmatpush.bf16.msra.mxu3 %v5994_v15 }
  0xc8   :  { %1568 = vmatpush.bf16.msra.mxu2 %v4495_v7  ;;  %1581 = vmatpush.bf16.msrb.mxu0 %v4623_v23  ;;  %v1285_v32 = vadd.f32 %v7502_v41, %v1272_v57  ;;  %v5997_v41 = vld [vmem:[%s9130_s3 + $0x50] sm:$0xff]  ;;  %v246_v57 = vperm.slane %v7525_v53, 2 }
  0xc9   :  { %1880 = vmatpush.bf16.msrb.mxu1 %v6002_v20  ;;  %v1336_v39 = vpop.f32.mrf.mxu3  ;;  %v6005_v7 = vld [vmem:[%s9130_s3 + $0x90] sm:$0xff]  ;;  %v6004_v20 = vld [vmem:[%s9130_s3 + $0x88] sm:$0xff] }
  0xca   :  { %v1337_v56 = vadd.f32 %v1336_v39, %v245_v52  ;;  %v6011_v52 = vld [vmem:[%s9130_s3 + $0xc0] sm:$0xff] }
  0xcb   :  { %1868 = vmatpush.bf16.msra.mxu3 %v5993_v22  ;;  %1569 = vmatmul.bf16.vlgmr.msra.gmra.mxu2 %v6773_v30  ;;  %v1297_v30 = vpop.f32.mrf.mxu0  ;;  %v1312_v40 = vpop.f32.mrf.mxu1  ;;  %v6003_v22 = vld [vmem:[%s9130_s3 + $0x80] sm:$0xff] }
  0xcc   :  { %1582 = vmatmul.bf16.vlgmr.msrb.gmra.mxu0 %v6784_v35  ;;  %v5990_v35 = vld [vmem:[%s9130_s3 + $0x18] sm:$0xff]  ;;  %v1298_v33 = vadd.f32 %v1297_v30, %v1285_v32  ;;  %1893 = vmatpush.bf16.msrb.mxu2 %v6010_v1 }
  0xcd   :  { %1881 = vmatpush.bf16.msrb.mxu1 %v6001_v17  ;;  %1906 = vmatpush.bf16.msra.mxu0 %v6018_v25 }
  0xce   :  { %v1311_v37 = vadd.f32 %v1310_v28, %v1298_v33  ;;  %v1349_v42 = vpop.f32.mrf.mxu2 }
  0xcf   :  { %1869 = vmatpush.bf16.msra.mxu3 %v5992_v26  ;;  %v1350_v58 = vadd.f32 %v1349_v42, %v1337_v56  ;;  %v6017_v26 = vld [vmem:[%s9130_s3 + $0xf0] sm:$0xff]  ;;  %v247_v56 = vperm.slane %v7525_v53, 3 }
  0xd0   :  { %v1324_v44 = vadd.f32 %v1323_v24, %v1311_v37  ;;  %1894 = vmatpush.bf16.msrb.mxu2 %v6009_v4  ;;  %v6014_v37 = vld [vmem:[%s9130_s3 + $0xd8] sm:$0xff] }
  0xd1   :  { %1882 = vmatpush.bf16.msrb.mxu1 %v6000_v51  ;;  %v1338_v48 = vpop.f32.mrf.mxu3  ;;  %1907 = vmatpush.bf16.msra.mxu0 %v6017_v26 }
  0xd2   :  { %v1600_v47 = vmax.f32 %v1324_v44, 0.0 }
  0xd3   :  { %1870 = vmatpush.bf16.msra.mxu3 %v5991_v27  ;;  %v1299_v38 = vpop.f32.mrf.mxu0 }
  0xd4   :  { %v1604_v54 = vpack.c.bf16 %v1600_v47, %v1600_v47  ;;  %1895 = vmatpush.bf16.msrb.mxu2 %v6008_v8  ;;  %v6012_v47 = vld [vmem:[%s9130_s3 + $0xc8] sm:$0xff] }
  0xd5   :  { %1883 = vmatpush.bf16.msrb.mxu1 %v5999_v31  ;;  %v6016_v31 = vld [vmem:[%s9130_s3 + $0xe8] sm:$0xff] }
  0xd6   :  { %4755 = vmatmul.msk.bf16.vlgmr.msra.gmra.mxu1 %vm1232_vm0, %v6682_v45  ;;  %v5996_v45 = vld [vmem:[%s9130_s3 + $0x48] sm:$0xff]  ;;  %v1351_v50 = vpop.f32.mrf.mxu2  ;;  %1908 = vmatpush.bf16.msra.mxu0 %v6016_v31 }
  0xd7   :  { %1871 = vmatpush.bf16.msra.mxu3 %v5990_v35  ;;  %v6015_v35 = vld [vmem:[%s9130_s3 + $0xe0] sm:$0xff] }
  0xd8   :  { %1896 = vmatpush.bf16.msrb.mxu2 %v6007_v12 }
  0xd9   :  { %1884 = vmatpush.bf16.msrb.mxu1 %v5998_v34 }
  0xda   :  { %1909 = vmatpush.bf16.msra.mxu0 %v6015_v35  ;;  %v1921_v35 = vlaneseq }
  0xdb   :  { %1872 = vmatpush.bf16.msra.mxu3 %v5989_v36 }
  0xdc   :  { %1897 = vmatpush.bf16.msrb.mxu2 %v6006_v16 }
  0xdd   :  { %1885 = vmatpush.bf16.msrb.mxu1 %v5997_v41  ;;  %v6013_v41 = vld [vmem:[%s9130_s3 + $0xd0] sm:$0xff] }
  0xde   :  { %1910 = vmatpush.bf16.msra.mxu0 %v6014_v37 }
  0xdf   :  { %1873 = vmatpush.bf16.msra.mxu3 %v5988_v43 }
  0xe0   :  { %v1362_v59 = vpop.f32.mrf.mxu0  ;;  %1898 = vmatpush.bf16.msrb.mxu2 %v6005_v7 }
  0xe1   :  { %1886 = vmatpush.bf16.msrb.mxu1 %v5996_v45  ;;  %v1363_v60 = vadd.f32 %v1362_v59, %v1350_v58 }
  0xe2   :  { %1911 = vmatpush.bf16.msra.mxu0 %v6013_v41 }
  0xe3   :  { %1874 = vmatpush.bf16.msra.mxu3 %v5987_v46  ;;  %v1375_v61 = vpop.f32.mrf.mxu1 }
  0xe4   :  { %v1376_v62 = vadd.f32 %v1375_v61, %v1363_v60  ;;  %1899 = vmatpush.bf16.msrb.mxu2 %v6004_v20 }
  0xe5   :  { %1887 = vmatpush.bf16.msrb.mxu1 %v5995_v49 }
  0xe6   :  { %1875 = vmatmul.bf16.vlgmr.msra.gmra.mxu3 %v1604_v54  ;;  %1912 = vmatpush.bf16.msra.mxu0 %v6012_v47  ;;  %v6183_v47 = vld [vmem:[%s9133_s5 + $0x520] sm:$0xf0] }
  0xe8   :  { %v1364_v63 = vpop.f32.mrf.mxu0  ;;  %1900 = vmatpush.bf16.msrb.mxu2 %v6003_v22  ;;  %v1935_v22 = vld [vmem:[%s9131_s4 + $0x8] sm:$0xff] }
  0xe9   :  { %v1388_v0 = vpop.f32.mrf.mxu3 }
  0xea   :  { %v1389_v2 = vadd.f32 %v1388_v0, %v1376_v62  ;;  %1913 = vmatpush.bf16.msra.mxu0 %v6011_v52  ;;  %v5254_v52 = vld [vmem:[%s9133_s5 + $0x2d8] sm:$0xf] }
  0xeb   :  { %v1377_v5 = vpop.f32.mrf.mxu1 }
  0xee   :  { %v1401_v3 = vpop.f32.mrf.mxu2 }
  0xef   :  { %v1402_v6 = vadd.f32 %v1401_v3, %v1389_v2 }
  0xf0   :  { %v1414_v9 = vpop.f32.mrf.mxu0 }
  0xf1   :  { %v1390_v10 = vpop.f32.mrf.mxu3  ;;  %v1415_v11 = vadd.f32 %v1414_v9, %v1402_v6 }
  0xf3   :  { %v1601_v13 = vmax.f32 %v1415_v11, 0.0 }
  0xf5   :  { %v1605_v14 = vpack.c.bf16 %v1601_v13, %v1601_v13 }
  0xf6   :  { %v1403_v55 = vpop.f32.mrf.mxu2 }
  0xf7   :  { %1888 = vmatmul.bf16.vlgmr.msrb.gmra.mxu1 %v1605_v14  ;;  %v6243_v14 = vld [vmem:[%s9129_s6 + $0x4] ss:$0 sm:$0xff] }
  0xf8   :  { %v1416_v15 = vpop.f32.mrf.mxu0 }
 0x103   :  { %v1427_v19 = vpop.f32.mrf.mxu1 }
 0x104   :  { %v1453_v18 = vpop.f32.mrf.mxu0  ;;  %v1428_v28 = vadd.f32 %v1427_v19, %v246_v57 }
 0x109   :  { %v1440_v21 = vpop.f32.mrf.mxu3 }
 0x10a   :  { %v1441_v29 = vadd.f32 %v1440_v21, %v1428_v28  ;;  %v1934_v21 = vld [vmem:[%s9131_s4] sm:$0xff]  ;;  %v1950_v28 = vunpack.c.h.b16 %v1935_v22 }
 0x10b   :  { %v1429_v17 = vpop.f32.mrf.mxu1 }
 0x10c   :  { %v1455_v23 = vpop.f32.mrf.mxu0  ;;  %v1454_v33 = vadd.f32 %v1453_v18, %v1441_v29  ;;  %v1949_v17 = vunpack.c.l.b16 %v1935_v22  ;;  %v1954_v29 = vpack.c.b16 %v1950_v28, %v1950_v28  ;;  %v6232_v28 = vld [vmem:[%s9133_s5 + $0x6a8] sm:$0xf0] }
 0x10d   :  { %v1947_v23 = vunpack.c.l.b16 %v1934_v21 }
 0x10e   :  { %v1466_v24 = vpop.f32.mrf.mxu2  ;;  %v1969_v31 = vsel %vm1958_vm1, %v1954_v29, 0  ;;  %v5170_v29 = vld [vmem:[%s9133_s5 + $0x230] sm:$0xf] }
 0x10f   :  { %v1467_v36 = vadd.f32 %v1466_v24, %v1454_v33  ;;  %v1948_v24 = vunpack.c.h.b16 %v1934_v21  ;;  %v1951_v25 = vpack.c.b16 %v1947_v23, %v1947_v23  ;;  %v6099_v21 = vld [vmem:[%s9133_s5 + $0x280] sm:$0xf0] }
 0x111   :  { %v1442_v51 = vpop.f32.mrf.mxu3  ;;  %v1952_v26 = vpack.c.b16 %v1948_v24, %v1948_v24  ;;  %v1960_v57 = vsel %vm1958_vm1, %v1951_v25, 0  ;;  %v6043_v25 = vld [vmem:[%s9133_s5 + $0xc0] sm:$0xf0] }
 0x112   :  { %v1953_v51 = vpack.c.b16 %v1949_v17, %v1949_v17  ;;  %1978 = vmatpush.bf16.msrb.mxu3 %v1960_v57  ;;  %v4974_v17 = vld [vmem:[%s9133_s5 + $0xa8] sm:$0xf] }
 0x114   :  { %v1505_v27 = vpop.f32.mrf.mxu0 }
 0x116   :  { %v1468_v30 = vpop.f32.mrf.mxu2  ;;  %2017 = vmatpush.bf16.msra.mxu3 %v1969_v31  ;;  %v6092_v31 = vld [vmem:[%s9133_s5 + $0x248] sm:$0xf0] }
 0x117   :  { %v1966_v30 = vsel %vm1958_vm1, %v1953_v51, 0 }
 0x118   :  { %2004 = vmatpush.bf16.msra.mxu2 %v1966_v30  ;;  %v5730_v30 = vld [vmem:[%s9133_s5 + $0x690] sm:$0xf] }
 0x11c   :  { %v1507_v32 = vpop.f32.mrf.mxu0 }
 0x123   :  { %v1479_v34 = vpop.f32.mrf.mxu1 }
 0x124   :  { %v1480_v38 = vadd.f32 %v1479_v34, %v1467_v36  ;;  %v1922_v36 = vand.u32 127, %v1921_v35 }
 0x126   :  { %vm1923_vm3 = vcmp.lt.s32.totalorder %v1922_v36, 2  ;;  %v5394_v36 = vld [vmem:[%s9133_s5 + $0x3f0] sm:$0xf] }
 0x129   :  { %v1492_v40 = vpop.f32.mrf.mxu3 }
 0x12a   :  { %v1531_v39 = vpop.f32.mrf.mxu0  ;;  %v1493_v42 = vadd.f32 %v1492_v40, %v1480_v38  ;;  %v5310_v38 = vld [vmem:[%s9133_s5 + $0x348] sm:$0xf]  ;;  %v5282_v40 = vld [vmem:[%s9133_s5 + $0x310] sm:$0xf] }
 0x12b   :  { %v1481_v43 = vpop.f32.mrf.mxu1 }
 0x12c   :  { %v1506_v44 = vadd.f32 %v1505_v27, %v1493_v42  ;;  %v1963_v27 = vsel %vm1958_vm1, %v1952_v26, 0  ;;  %v6120_v43 = vld [vmem:[%s9133_s5 + $0x328] sm:$0xf0]  ;;  %v5422_v26 = vld [vmem:[%s9133_s5 + $0x428] sm:$0xf] }
 0x12d   :  { %1991 = vmatpush.bf16.msra.mxu1 %v1963_v27  ;;  %v6155_v27 = vld [vmem:[%s9133_s5 + $0x440] sm:$0xf0] }
 0x12e   :  { %v1518_v45 = vpop.f32.mrf.mxu2  ;;  %v1602_v46 = vmax.f32 %v1506_v44, 0.0  ;;  %v5086_v44 = vld [vmem:[%s9133_s5 + $0x188] sm:$0xf]  ;;  %v5423_v35 = vor.u32 %v6155_v27, %v5422_v26  ;;  %v6110_v26 = vld [vmem:[%s9133_s5 + $0x2dc] sm:$0xf] }
 0x12f   :  { %v1519_v58 = vadd.f32 %v1518_v45, %v247_v56  ;;  %v6071_v45 = vld [vmem:[%s9133_s5 + $0x1a0] sm:$0xf0]  ;;  %v5058_v56 = vld [vmem:[%s9133_s5 + $0x150] sm:$0xf] }
 0x130   :  { %v1606_v48 = vpack.c.bf16 %v1602_v46, %v1602_v46  ;;  %v5534_v46 = vld [vmem:[%s9133_s5 + $0x508] sm:$0xf] }
 0x131   :  { %v1494_v50 = vpop.f32.mrf.mxu3  ;;  %v1532_v60 = vadd.f32 %v1531_v39, %v1519_v58  ;;  %v6127_v39 = vld [vmem:[%s9133_s5 + $0x360] sm:$0xf0] }
 0x132   :  { %v1533_v49 = vpop.f32.mrf.mxu0  ;;  %1901 = vmatmul.bf16.vlgmr.msrb.gmra.mxu2 %v1606_v48  ;;  %v5311_v42 = vor.u32 %v6127_v39, %v5310_v38  ;;  %v5283_v48 = vor.u32 %v6120_v43, %v5282_v40  ;;  %v5535_v50 = vor.u32 %v6183_v47, %v5534_v46  ;;  %v5171_v38 = vor.u32 %v6092_v31, %v5170_v29  ;;  %v6148_v39 = vld [vmem:[%s9133_s5 + $0x408] sm:$0xf0]  ;;  %v5702_v40 = vld [vmem:[%s9133_s5 + $0x658] sm:$0xf]  ;;  %v6085_v43 = vld [vmem:[%s9133_s5 + $0x210] sm:$0xf0] }
 0x133   :  { %v5087_v49 = vor.u32 %v6071_v45, %v5086_v44  ;;  %v5395_v45 = vor.u32 %v6148_v39, %v5394_v36  ;;  %v4918_v46 = vld [vmem:[%s9133_s5 + $0x38] sm:$0xf]  ;;  %v6029_v47 = vld [vmem:[%s9133_s5 + $0x50] sm:$0xf0]  ;;  %v6166_v29 = vld [vmem:[%s9133_s5 + $0x49c] sm:$0xf] }
 0x134   :  { %3467 = vmatpush.bf16.msrb.mxu1 %v5311_v42  ;;  %3480 = vmatpush.bf16.msrb.mxu2 %v5535_v50  ;;  %v5142_v42 = vld [vmem:[%s9133_s5 + $0x1f8] sm:$0xf]  ;;  %v5228_v36 = vld [vmem:[%s9133_s5 + $0x2bc] sm:$0xf0] }
 0x135   :  { %3454 = vmatpush.bf16.msrb.mxu0 %v5087_v49  ;;  %v5143_v50 = vor.u32 %v6085_v43, %v5142_v42  ;;  %v6159_v42 = vld [vmem:[%s9133_s5 + $0x464] sm:$0xf] }
 0x136   :  { %v1520_v54 = vpop.f32.mrf.mxu2 }
 0x137   :  { %v6113_v54 = vld [vmem:[%s9133_s5 + $0x2f0] sm:$0xf0] }
 0x138   :  { %3468 = vmatpush.bf16.msrb.mxu1 %v5283_v48  ;;  %v5366_v48 = vld [vmem:[%s9133_s5 + $0x3b8] sm:$0xf] }
 0x143   :  { %v1544_v59 = vpop.f32.mrf.mxu1 }
 0x144   :  { %v1545_v61 = vadd.f32 %v1544_v59, %v1532_v60  ;;  %v6064_v59 = vld [vmem:[%s9133_s5 + $0x168] sm:$0xf0]  ;;  %v5506_v60 = vld [vmem:[%s9133_s5 + $0x4d0] sm:$0xf] }
 0x149   :  { %v1557_v62 = vpop.f32.mrf.mxu3  ;;  %v1583_v63 = vpop.f32.mrf.mxu0 }
 0x14a   :  { %v1558_v0 = vadd.f32 %v1557_v62, %v1545_v61  ;;  %v6176_v61 = vld [vmem:[%s9133_s5 + $0x4e8] sm:$0xf0]  ;;  %v5059_v62 = vor.u32 %v6064_v59, %v5058_v56  ;;  %v6218_v56 = vld [vmem:[%s9133_s5 + $0x638] sm:$0xf0] }
 0x14b   :  { %v1546_v1 = vpop.f32.mrf.mxu1  ;;  %v6078_v59 = vld [vmem:[%s9133_s5 + $0x1d8] sm:$0xf0] }
 0x14c   :  { %v6057_v1 = vld [vmem:[%s9133_s5 + $0x130] sm:$0xf0]  ;;  %3455 = vmatpush.bf16.msrb.mxu0 %v5059_v62  ;;  %v4919_v62 = vor.u32 %v6029_v47, %v4918_v46  ;;  %v6190_v46 = vld [vmem:[%s9133_s5 + $0x558] sm:$0xf0]  ;;  %v6096_v47 = vld [vmem:[%s9133_s5 + $0x26c] sm:$0xf] }
 0x14e   :  { %v1570_v2 = vpop.f32.mrf.mxu2 }
 0x14f   :  { %v1571_v3 = vadd.f32 %v1570_v2, %v1558_v0  ;;  %v5030_v0 = vld [vmem:[%s9133_s5 + $0x118] sm:$0xf] }
 0x150   :  { %v5478_v2 = vld [vmem:[%s9133_s5 + $0x498] sm:$0xf] }
 0x151   :  { %v1559_v4 = vpop.f32.mrf.mxu3  ;;  %v1585_v5 = vpop.f32.mrf.mxu0  ;;  %v1584_v6 = vadd.f32 %v1583_v63, %v1571_v3  ;;  %v5507_v63 = vor.u32 %v6176_v61, %v5506_v60  ;;  %v6169_v3 = vld [vmem:[%s9133_s5 + $0x4b0] sm:$0xf0]  ;;  %v6124_v60 = vld [vmem:[%s9133_s5 + $0x34c] sm:$0xf]  ;;  %v5312_v61 = vld [vmem:[%s9133_s5 + $0x364] sm:$0xf0] }
 0x152   :  { %v1927_v4 = vld [vmem:[%s9134_s1] sm:$0xff]  ;;  %v5255_v5 = vor.u32 %v6113_v54, %v5254_v52  ;;  %v6141_v52 = vld [vmem:[%s9133_s5 + $0x3d0] sm:$0xf0] }
 0x153   :  { %v1596_v8 = vpop.f32.mrf.mxu1  ;;  %3481 = vmatpush.bf16.msrb.mxu2 %v5507_v63  ;;  %v5674_v54 = vld [vmem:[%s9133_s5 + $0x620] sm:$0xf] }
 0x154   :  { %v1597_v9 = vadd.f32 %v1596_v8, %v1584_v6  ;;  %v5226_v6 = vld [vmem:[%s9133_s5 + $0x2a0] sm:$0xf]  ;;  %v6106_v8 = vld [vmem:[%s9133_s5 + $0x2b8] sm:$0xf0]  ;;  %3469 = vmatpush.bf16.msrb.mxu1 %v5255_v5 }
 0x155   :  { %v4890_v63 = vld [vmem:[%s9133_s5] sm:$0xf] }
 0x156   :  { %v1572_v10 = vpop.f32.mrf.mxu2  ;;  %v1603_v11 = vmax.f32 %v1597_v9, 0.0 }
 0x158   :  { %v1607_v55 = vpack.c.bf16 %v1603_v11, %v1603_v11  ;;  %v5031_v11 = vor.u32 %v6057_v1, %v5030_v0  ;;  %v5367_v0 = vor.u32 %v6141_v52, %v5366_v48  ;;  %v6022_v1 = vld [vmem:[%s9133_s5 + $0x18] sm:$0xf0]  ;;  %v5200_v48 = vld [vmem:[%s9133_s5 + $0x284] sm:$0xf0] }
 0x15a   :  { %1914 = vmatmul.bf16.vlgmr.msra.gmra.mxu0 %v1607_v55  ;;  %v5479_v55 = vor.u32 %v6169_v3, %v5478_v2  ;;  %v5338_v2 = vld [vmem:[%s9133_s5 + $0x380] sm:$0xf]  ;;  %v6134_v3 = vld [vmem:[%s9133_s5 + $0x398] sm:$0xf0] }
 0x15b   :  { %v1598_v53 = vpop.f32.mrf.mxu1  ;;  %3456 = vmatpush.bf16.msrb.mxu0 %v5031_v11  ;;  %v5536_v11 = vld [vmem:[%s9133_s5 + $0x524] sm:$0xf0] }
 0x15c   :  { %3482 = vmatpush.bf16.msrb.mxu2 %v5479_v55  ;;  %v5646_v55 = vld [vmem:[%s9133_s5 + $0x5e8] sm:$0xf] }
 0x169   :  { %v1876_v12 = vpop.f32.mrf.mxu3 }
 0x16a   :  { %v1877_v15 = vadd.f32 %v6243_v14, %v1876_v12  ;;  %v5002_v12 = vld [vmem:[%s9133_s5 + $0xe0] sm:$0xf] }
 0x16b   :  { %v5450_v14 = vld [vmem:[%s9133_s5 + $0x460] sm:$0xf] }
 0x171   :  { %v1878_v13 = vpop.f32.mrf.mxu3 }
 0x172   :  { %v6050_v13 = vld [vmem:[%s9133_s5 + $0xf8] sm:$0xf0] }
 0x173   :  { %v5003_v22 = vor.u32 %v6050_v13, %v5002_v12  ;;  %v6117_v12 = vld [vmem:[%s9133_s5 + $0x314] sm:$0xf]  ;;  %v5284_v13 = vld [vmem:[%s9133_s5 + $0x32c] sm:$0xf0] }
 0x174   :  { %v1889_v16 = vpop.f32.mrf.mxu1 }
 0x175   :  { %v1890_v7 = vadd.f32 %v1889_v16, %v1877_v15  ;;  %v5227_v15 = vor.u32 %v6106_v8, %v5226_v6  ;;  %v6162_v16 = vld [vmem:[%s9133_s5 + $0x478] sm:$0xf0]  ;;  %3457 = vmatpush.bf16.msrb.mxu0 %v5003_v22  ;;  %v6068_v6 = vld [vmem:[%s9133_s5 + $0x18c] sm:$0xf]  ;;  %v5088_v8 = vld [vmem:[%s9133_s5 + $0x1a4] sm:$0xf0]  ;;  %v5287_v22 = vor.u32 %v6117_v12, %v5284_v13 }
 0x176   :  { %v5451_v24 = vor.u32 %v6162_v16, %v5450_v14  ;;  %v4891_v14 = vor.u32 %v6022_v1, %v4890_v63  ;;  %v5091_v16 = vor.u32 %v6068_v6, %v5088_v8  ;;  %v6236_v1 = vld [vmem:[%s9133_s5 + $0x6cc] sm:$0xf]  ;;  %v5144_v6 = vld [vmem:[%s9133_s5 + $0x214] sm:$0xf0]  ;;  %v6229_v12 = vld [vmem:[%s9133_s5 + $0x694] sm:$0xf] }
 0x177   :  { %3470 = vmatpush.bf16.msrb.mxu1 %v5227_v15  ;;  %v5339_v15 = vor.u32 %v6134_v3, %v5338_v2  ;;  %v5760_v2 = vld [vmem:[%s9133_s5 + $0x6e4] sm:$0xf0]  ;;  %v5732_v13 = vld [vmem:[%s9133_s5 + $0x6ac] sm:$0xf0] }
 0x178   :  { %3483 = vmatpush.bf16.msrb.mxu2 %v5451_v24  ;;  %v5508_v24 = vld [vmem:[%s9133_s5 + $0x4ec] sm:$0xf0] }
 0x17c   :  { %v1891_v18 = vpop.f32.mrf.mxu1  ;;  %3484 = vmatpush.bf16.msrb.mxu2 %v5423_v35  ;;  %v5590_v35 = vld [vmem:[%s9133_s5 + $0x578] sm:$0xf] }
 0x17d   :  { %v6239_v18 = vld [vmem:[%s9133_s5 + $0x6e0] sm:$0xf0] }
 0x180   :  { %3485 = vmatpush.bf16.msrb.mxu2 %v5395_v45  ;;  %v5562_v45 = vld [vmem:[%s9133_s5 + $0x540] sm:$0xf] }
 0x181   :  { %v5563_v52 = vor.u32 %v6190_v46, %v5562_v45  ;;  %v5564_v45 = vld [vmem:[%s9133_s5 + $0x55c] sm:$0xf0] }
 0x184   :  { %3486 = vmatpush.bf16.msrb.mxu2 %v5367_v0  ;;  %v5424_v0 = vld [vmem:[%s9133_s5 + $0x444] sm:$0xf0] }
 0x188   :  { %3487 = vmatpush.bf16.msrb.mxu2 %v5339_v15  ;;  %v5735_v15 = vor.u32 %v6229_v12, %v5732_v13 }
 0x1b5   :  { %v1902_v19 = vpop.f32.mrf.mxu2 }
 0x1b6   :  { %v1903_v32 = vadd.f32 %v1902_v19, %v1890_v7  ;;  %v5758_v7 = vld [vmem:[%s9133_s5 + $0x6c8] sm:$0xf] }
 0x1b7   :  { %v5759_v51 = vor.u32 %v6239_v18, %v5758_v7 }
 0x1bd   :  { %v1904_v20 = vpop.f32.mrf.mxu2 }
 0x1be   :  { %v5198_v20 = vld [vmem:[%s9133_s5 + $0x268] sm:$0xf] }
 0x1bf   :  { %v5199_v57 = vor.u32 %v6099_v21, %v5198_v20  ;;  %v5060_v20 = vld [vmem:[%s9133_s5 + $0x16c] sm:$0xf0]  ;;  %v6173_v21 = vld [vmem:[%s9133_s5 + $0x4d4] sm:$0xf] }
 0x1c1   :  { %3471 = vmatpush.bf16.msrb.mxu1 %v5199_v57  ;;  %v5511_v57 = vor.u32 %v6173_v21, %v5508_v24  ;;  %v5368_v24 = vld [vmem:[%s9133_s5 + $0x3d4] sm:$0xf0] }
 0x1c5   :  { %3472 = vmatpush.bf16.msrb.mxu1 %v5171_v38 }
 0x1c9   :  { %3473 = vmatpush.bf16.msrb.mxu1 %v5143_v50 }
 0x1d7   :  { %v1915_v33 = vpop.f32.mrf.mxu0 }
 0x1d8   :  { %v1916_v34 = vadd.f32 %v1915_v33, %v1903_v32  ;;  %v4975_v32 = vor.u32 %v6043_v25, %v4974_v17  ;;  %v4946_v33 = vld [vmem:[%s9133_s5 + $0x70] sm:$0xf]  ;;  %v6204_v25 = vld [vmem:[%s9133_s5 + $0x5c8] sm:$0xf0] }
 0x1d9   :  { %v5618_v17 = vld [vmem:[%s9133_s5 + $0x5b0] sm:$0xf] }
 0x1da   :  { %1920 = vst.msk [vmem:[%s9132_s8] sm:$0xff] %vm1919_vm2, %v1916_v34  ;;  %v1928_v37 = vmul.f32 0.5, %v1916_v34  ;;  %v1926_v10 = vsel %vm1923_vm3, %v1916_v34, 0.0  ;;  %v6036_v34 = vld [vmem:[%s9133_s5 + $0x88] sm:$0xf0]  ;;  %3458 = vmatpush.bf16.msrb.mxu0 %v4975_v32  ;;  %v5619_v27 = vor.u32 %v6204_v25, %v5618_v17 }
 0x1db   :  { %v4947_v44 = vor.u32 %v6036_v34, %v4946_v33  ;;  %v5480_v32 = vld [vmem:[%s9133_s5 + $0x4b4] sm:$0xf0]  ;;  %v6197_v33 = vld [vmem:[%s9133_s5 + $0x590] sm:$0xf0]  ;;  %v6103_v34 = vld [vmem:[%s9133_s5 + $0x2a4] sm:$0xf] }
 0x1dc   :  { %v1929_v41 = vmul.f32 1.442695, %v1928_v37  ;;  %v5731_v37 = vor.u32 %v6232_v28, %v5730_v30  ;;  %v6054_v30 = vld [vmem:[%s9133_s5 + $0x11c] sm:$0xf]  ;;  %v5032_v28 = vld [vmem:[%s9133_s5 + $0x134] sm:$0xf0]  ;;  %v5483_v38 = vor.u32 %v6166_v29, %v5480_v32  ;;  %v5591_v39 = vor.u32 %v6197_v33, %v5590_v35 }
 0x1dd   :  { %v5231_v43 = vor.u32 %v6103_v34, %v5228_v36  ;;  %v6222_v17 = vld [vmem:[%s9133_s5 + $0x65c] sm:$0xf]  ;;  %v6215_v29 = vld [vmem:[%s9133_s5 + $0x624] sm:$0xf]  ;;  %v6208_v33 = vld [vmem:[%s9133_s5 + $0x5ec] sm:$0xf] }
 0x1de   :  { %6244 = vpow2.f32 %v1929_v41  ;;  %v6225_v41 = vld [vmem:[%s9133_s5 + $0x670] sm:$0xf0]  ;;  %3459 = vmatpush.bf16.msrb.mxu0 %v4947_v44  ;;  %v5452_v44 = vld [vmem:[%s9133_s5 + $0x47c] sm:$0xf0]  ;;  %v5648_v34 = vld [vmem:[%s9133_s5 + $0x604] sm:$0xf0] }
 0x1df   :  { %v1917_v58 = vpop.f32.mrf.mxu0  ;;  %v5703_v49 = vor.u32 %v6225_v41, %v5702_v40  ;;  %v6047_v40 = vld [vmem:[%s9133_s5 + $0xe4] sm:$0xf]  ;;  %v5004_v41 = vld [vmem:[%s9133_s5 + $0xfc] sm:$0xf0]  ;;  %v5455_v50 = vor.u32 %v6159_v42, %v5452_v44  ;;  %v5651_v36 = vor.u32 %v6208_v33, %v5648_v34  ;;  %v5010_v33 = vld [vmem:[%s9133_s5 + $0xe8] sm:$0xf] }
 0x1e0   :  { %v5114_v58 = vld [vmem:[%s9133_s5 + $0x1c0] sm:$0xf]  ;;  %v6187_v44 = vld [vmem:[%s9133_s5 + $0x544] sm:$0xf] }
 0x1e1   :  { %v5115_v5 = vor.u32 %v6078_v59, %v5114_v58  ;;  %v5172_v58 = vld [vmem:[%s9133_s5 + $0x24c] sm:$0xf0]  ;;  %v5567_v46 = vor.u32 %v6187_v44, %v5564_v45  ;;  %v6051_v34 = vld [vmem:[%s9133_s5 + $0x100] sm:$0xf0] }
 0x1e2   :  { %3460 = vmatpush.bf16.msrb.mxu0 %v4919_v62  ;;  %v6152_v62 = vld [vmem:[%s9133_s5 + $0x42c] sm:$0xf]  ;;  %v4982_v45 = vld [vmem:[%s9133_s5 + $0xb0] sm:$0xf] }
 0x1e3   :  { %3474 = vmatpush.bf16.msrb.mxu1 %v5115_v5  ;;  %v5427_v3 = vor.u32 %v6152_v62, %v5424_v0  ;;  %v6082_v5 = vld [vmem:[%s9133_s5 + $0x1fc] sm:$0xf]  ;;  %v6121_v62 = vld [vmem:[%s9133_s5 + $0x330] sm:$0xf0] }
 0x1e4   :  { %v6245_v9 = vpop.eup %6244  ;;  %v5147_v8 = vor.u32 %v6082_v5, %v5144_v6 }
 0x1e5   :  { %v1931_v53 = vmul.f32 %v6245_v9, %v1927_v4  ;;  %v5675_v4 = vor.u32 %v6218_v56, %v5674_v54  ;;  %v6180_v9 = vld [vmem:[%s9133_s5 + $0x50c] sm:$0xf]  ;;  %v5203_v54 = vor.u32 %v6096_v47, %v5200_v48  ;;  %v6089_v56 = vld [vmem:[%s9133_s5 + $0x234] sm:$0xf] }
 0x1e6   :  { %v5539_v7 = vor.u32 %v6180_v9, %v5536_v11  ;;  %3461 = vmatpush.bf16.msrb.mxu0 %v4891_v14  ;;  %v5175_v59 = vor.u32 %v6089_v56, %v5172_v58  ;;  %v6033_v9 = vld [vmem:[%s9133_s5 + $0x74] sm:$0xf] }
 0x1e7   :  { %v1932_v19 = vadd.f32 %v1931_v53, %v1926_v10  ;;  %v5315_v10 = vor.u32 %v6124_v60, %v5312_v61  ;;  %v6211_v53 = vld [vmem:[%s9133_s5 + $0x600] sm:$0xf0]  ;;  %v6040_v60 = vld [vmem:[%s9133_s5 + $0xac] sm:$0xf]  ;;  %v4976_v61 = vld [vmem:[%s9133_s5 + $0xc4] sm:$0xf0] }
 0x1e8   :  { %v5647_v18 = vor.u32 %v6211_v53, %v5646_v55  ;;  %v4979_v63 = vor.u32 %v6040_v60, %v4976_v61  ;;  %v6145_v11 = vld [vmem:[%s9133_s5 + $0x3f4] sm:$0xf]  ;;  %v5396_v53 = vld [vmem:[%s9133_s5 + $0x40c] sm:$0xf0]  ;;  %v5290_v61 = vld [vmem:[%s9133_s5 + $0x318] sm:$0xf] }
 0x1e9   :  { %v7779_v23 = vpack.c.bf16 %v1932_v19, %v1932_v19  ;;  %v6061_v19 = vld [vmem:[%s9133_s5 + $0x154] sm:$0xf]  ;;  %v5399_v14 = vor.u32 %v6145_v11, %v5396_v53  ;;  %v5291_v6 = vor.u32 %v6121_v62, %v5290_v61  ;;  %v5262_v11 = vld [vmem:[%s9133_s5 + $0x2e0] sm:$0xf] }
 0x1ea   :  { %3506 = vmatpush.bf16.msra.mxu0 %v5091_v16  ;;  %v6075_v16 = vld [vmem:[%s9133_s5 + $0x1c4] sm:$0xf] }
 0x1eb   :  { %4884 = vmatmul.msk.bf16.vlgmr.msrb.gmra.mxu3 %vm1919_vm2, %v7779_v23  ;;  %4885 = vmatmul.msk.bf16.vlgmr.msra.gmra.mxu1 %vm1919_vm2, %v7779_v23 }
 0x1ec   :  { %4886 = vmatmul.msk.bf16.vlgmr.msra.gmra.mxu2 %vm1919_vm2, %v7779_v23  ;;  %3493 = vmatpush.bf16.msrb.mxu3 %v5759_v51  ;;  %v5063_v51 = vor.u32 %v6061_v19, %v5060_v20  ;;  %v6026_v19 = vld [vmem:[%s9133_s5 + $0x3c] sm:$0xf]  ;;  %v4920_v20 = vld [vmem:[%s9133_s5 + $0x54] sm:$0xf0] }
 0x1ed   :  { %3519 = vmatpush.bf16.msra.mxu1 %v5315_v10  ;;  %3532 = vmatpush.bf16.msra.mxu2 %v5539_v7  ;;  %v4948_v10 = vld [vmem:[%s9133_s5 + $0x8c] sm:$0xf0]  ;;  %v5116_v7 = vld [vmem:[%s9133_s5 + $0x1dc] sm:$0xf0]  ;;  %v4923_v21 = vor.u32 %v6026_v19, %v4920_v20  ;;  %v5514_v19 = vld [vmem:[%s9133_s5 + $0x4d8] sm:$0xf] }
 0x1ee   :  { %3507 = vmatpush.bf16.msra.mxu0 %v5063_v51  ;;  %v4951_v55 = vor.u32 %v6033_v9, %v4948_v10  ;;  %v6019_v51 = vld [vmem:[%s9133_s5 + $0x4] sm:$0xf]  ;;  %v6184_v9 = vld [vmem:[%s9133_s5 + $0x528] sm:$0xf0]  ;;  %v6177_v20 = vld [vmem:[%s9133_s5 + $0x4f0] sm:$0xf0] }
 0x1f0   :  { %3494 = vmatpush.bf16.msrb.mxu3 %v5731_v37  ;;  %v5035_v37 = vor.u32 %v6054_v30, %v5032_v28  ;;  %v5340_v28 = vld [vmem:[%s9133_s5 + $0x39c] sm:$0xf0] }
 0x1f1   :  { %3520 = vmatpush.bf16.msra.mxu1 %v5287_v22  ;;  %3533 = vmatpush.bf16.msra.mxu2 %v5511_v57  ;;  %v6138_v22 = vld [vmem:[%s9133_s5 + $0x3bc] sm:$0xf]  ;;  %v4892_v57 = vld [vmem:[%s9133_s5 + $0x1c] sm:$0xf0] }
 0x1f2   :  { %3508 = vmatpush.bf16.msra.mxu0 %v5035_v37  ;;  %v5371_v25 = vor.u32 %v6138_v22, %v5368_v24  ;;  %v4895_v30 = vor.u32 %v6019_v51, %v4892_v57  ;;  %v6201_v37 = vld [vmem:[%s9133_s5 + $0x5b4] sm:$0xf]  ;;  %v6107_v22 = vld [vmem:[%s9133_s5 + $0x2c0] sm:$0xf0]  ;;  %v6058_v51 = vld [vmem:[%s9133_s5 + $0x138] sm:$0xf0] }
 0x1f4   :  { %3495 = vmatpush.bf16.msrb.mxu3 %v5703_v49  ;;  %v5007_v49 = vor.u32 %v6047_v40, %v5004_v41  ;;  %v6194_v40 = vld [vmem:[%s9133_s5 + $0x57c] sm:$0xf]  ;;  %v5592_v41 = vld [vmem:[%s9133_s5 + $0x594] sm:$0xf0] }
 0x1f5   :  { %3534 = vmatpush.bf16.msra.mxu2 %v5483_v38  ;;  %v5620_v38 = vld [vmem:[%s9133_s5 + $0x5cc] sm:$0xf0]  ;;  %v5595_v42 = vor.u32 %v6194_v40, %v5592_v41  ;;  %v6093_v40 = vld [vmem:[%s9133_s5 + $0x250] sm:$0xf0] }
 0x1f6   :  { %3509 = vmatpush.bf16.msra.mxu0 %v5007_v49 }
 0x1f8   :  { %3496 = vmatpush.bf16.msrb.mxu3 %v5675_v4  ;;  %v5763_v4 = vor.u32 %v6236_v1, %v5760_v2  ;;  %v5094_v2 = vld [vmem:[%s9133_s5 + $0x190] sm:$0xf] }
 0x1f9   :  { %3535 = vmatpush.bf16.msra.mxu2 %v5455_v50  ;;  %v5318_v50 = vld [vmem:[%s9133_s5 + $0x350] sm:$0xf] }
 0x1fa   :  { %3510 = vmatpush.bf16.msra.mxu0 %v4979_v63 }
 0x1fb   :  { %4887 = vmatmul.msk.bf16.vlgmr.msra.gmra.mxu3 %vm1919_vm2, %v7779_v23  ;;  %v5256_v23 = vld [vmem:[%s9133_s5 + $0x2f4] sm:$0xf0] }
 0x1fc   :  { %3497 = vmatpush.bf16.msrb.mxu3 %v5647_v18  ;;  %v5259_v31 = vor.u32 %v6110_v26, %v5256_v23  ;;  %v5119_v18 = vor.u32 %v6075_v16, %v5116_v7  ;;  %v5704_v26 = vld [vmem:[%s9133_s5 + $0x674] sm:$0xf0]  ;;  %v6065_v16 = vld [vmem:[%s9133_s5 + $0x170] sm:$0xf0] }
 0x1fd   :  { %3536 = vmatpush.bf16.msra.mxu2 %v5427_v3  ;;  %v5707_v23 = vor.u32 %v6222_v17, %v5704_v26  ;;  %v6072_v3 = vld [vmem:[%s9133_s5 + $0x1a8] sm:$0xf0]  ;;  %v5515_v26 = vor.u32 %v6177_v20, %v5514_v19  ;;  %v6142_v20 = vld [vmem:[%s9133_s5 + $0x3d8] sm:$0xf0] }
 0x1fe   :  { %3521 = vmatpush.bf16.msra.mxu1 %v5259_v31  ;;  %3511 = vmatpush.bf16.msra.mxu0 %v4951_v55  ;;  %v5676_v31 = vld [vmem:[%s9133_s5 + $0x63c] sm:$0xf0]  ;;  %v6114_v55 = vld [vmem:[%s9133_s5 + $0x2f8] sm:$0xf0]  ;;  %v5095_v12 = vor.u32 %v6072_v3, %v5094_v2  ;;  %v5402_v2 = vld [vmem:[%s9133_s5 + $0x3f8] sm:$0xf] }
 0x1ff   :  { %v5679_v35 = vor.u32 %v6215_v29, %v5676_v31  ;;  %v6100_v29 = vld [vmem:[%s9133_s5 + $0x288] sm:$0xf0] }
 0x200   :  { %3498 = vmatpush.bf16.msrb.mxu3 %v5619_v27  ;;  %v6131_v27 = vld [vmem:[%s9133_s5 + $0x384] sm:$0xf] }
 0x201   :  { %3537 = vmatpush.bf16.msra.mxu2 %v5399_v14  ;;  %v5343_v32 = vor.u32 %v6131_v27, %v5340_v28  ;;  %v5486_v27 = vld [vmem:[%s9133_s5 + $0x4a0] sm:$0xf]  ;;  %v5206_v28 = vld [vmem:[%s9133_s5 + $0x270] sm:$0xf] }
 0x202   :  { %3522 = vmatpush.bf16.msra.mxu1 %v5231_v43  ;;  %3512 = vmatpush.bf16.msra.mxu0 %v4923_v21  ;;  %v8086_v43 = vld [vmem:[%s9129_s6 + $0x5] sm:$0xf] }
 0x203   :  { %v1938_v47 = vperm.slane %v8086_v43, 1  ;;  %v1937_v56 = vperm.slane %v8086_v43, 0  ;;  %v1939_v58 = vperm.slane %v8086_v43, 2  ;;  %v5234_v21 = vld [vmem:[%s9133_s5 + $0x2a8] sm:$0xf] }
 0x204   :  { %3499 = vmatpush.bf16.msrb.mxu3 %v5591_v39  ;;  %v5623_v39 = vor.u32 %v6201_v37, %v5620_v38  ;;  %v5235_v57 = vor.u32 %v6107_v22, %v5234_v21  ;;  %v5458_v37 = vld [vmem:[%s9133_s5 + $0x468] sm:$0xf]  ;;  %v6163_v38 = vld [vmem:[%s9133_s5 + $0x480] sm:$0xf0]  ;;  %v5710_v21 = vld [vmem:[%s9133_s5 + $0x660] sm:$0xf] }
 0x205   :  { %3538 = vmatpush.bf16.msra.mxu2 %v5371_v25  ;;  %v5459_v44 = vor.u32 %v6163_v38, %v5458_v37  ;;  %v6226_v22 = vld [vmem:[%s9133_s5 + $0x678] sm:$0xf0]  ;;  %v6111_v38 = vld [vmem:[%s9133_s5 + $0x2e4] sm:$0xf] }
 0x206   :  { %3523 = vmatpush.bf16.msra.mxu1 %v5203_v54  ;;  %3513 = vmatpush.bf16.msra.mxu0 %v4895_v30  ;;  %v6170_v30 = vld [vmem:[%s9133_s5 + $0x4b8] sm:$0xf0] }
 0x208   :  { %3500 = vmatpush.bf16.msrb.mxu3 %v5563_v52  ;;  %v6128_v52 = vld [vmem:[%s9133_s5 + $0x368] sm:$0xf0] }
 0x209   :  { %3539 = vmatpush.bf16.msra.mxu2 %v5343_v32  ;;  %v5487_v32 = vor.u32 %v6170_v30, %v5486_v27  ;;  %v6023_v27 = vld [vmem:[%s9133_s5 + $0x20] sm:$0xf0]  ;;  %v5346_v30 = vld [vmem:[%s9133_s5 + $0x388] sm:$0xf] }
 0x20a   :  { %3524 = vmatpush.bf16.msra.mxu1 %v5175_v59  ;;  %v5319_v59 = vor.u32 %v6128_v52, %v5318_v50  ;;  %v5766_v50 = vld [vmem:[%s9133_s5 + $0x6d0] sm:$0xf]  ;;  %v6240_v52 = vld [vmem:[%s9133_s5 + $0x6e8] sm:$0xf0] }
 0x20c   :  { %3545 = vmatpush.bf16.msra.mxu3 %v5763_v4 }
 0x20e   :  { %3525 = vmatpush.bf16.msra.mxu1 %v5147_v8  ;;  %v5542_v8 = vld [vmem:[%s9133_s5 + $0x510] sm:$0xf] }
 0x20f   :  { %v5543_v14 = vor.u32 %v6184_v9, %v5542_v8  ;;  %v5122_v8 = vld [vmem:[%s9133_s5 + $0x1c8] sm:$0xf]  ;;  %v6079_v9 = vld [vmem:[%s9133_s5 + $0x1e0] sm:$0xf0] }
 0x210   :  { %3546 = vmatpush.bf16.msra.mxu3 %v5735_v15  ;;  %v5066_v15 = vld [vmem:[%s9133_s5 + $0x158] sm:$0xf]  ;;  %v5123_v19 = vor.u32 %v6079_v9, %v5122_v8 }
 0x211   :  { %v5067_v17 = vor.u32 %v6065_v16, %v5066_v15  ;;  %v4926_v15 = vld [vmem:[%s9133_s5 + $0x40] sm:$0xf]  ;;  %v6030_v16 = vld [vmem:[%s9133_s5 + $0x58] sm:$0xf0] }
 0x212   :  { %3526 = vmatpush.bf16.msra.mxu1 %v5119_v18  ;;  %v5263_v18 = vor.u32 %v6114_v55, %v5262_v11  ;;  %v6125_v55 = vld [vmem:[%s9133_s5 + $0x354] sm:$0xf] }
 0x214   :  { %3547 = vmatpush.bf16.msra.mxu3 %v5707_v23  ;;  %v5038_v23 = vld [vmem:[%s9133_s5 + $0x120] sm:$0xf] }
 0x215   :  { %v5039_v31 = vor.u32 %v6058_v51, %v5038_v23  ;;  %v4898_v23 = vld [vmem:[%s9133_s5 + $0x8] sm:$0xf] }
 0x216   :  { %v4899_v37 = vor.u32 %v6023_v27, %v4898_v23  ;;  %v6237_v27 = vld [vmem:[%s9133_s5 + $0x6d4] sm:$0xf] }
 0x218   :  { %3548 = vmatpush.bf16.msra.mxu3 %v5679_v35  ;;  %v1940_v35 = vperm.slane %v8086_v43, 3 }
 0x21c   :  { %3549 = vmatpush.bf16.msra.mxu3 %v5651_v36  ;;  %v5207_v36 = vor.u32 %v6100_v29, %v5206_v28  ;;  %v6135_v28 = vld [vmem:[%s9133_s5 + $0x3a0] sm:$0xf0]  ;;  %v5682_v29 = vld [vmem:[%s9133_s5 + $0x628] sm:$0xf] }
 0x220   :  { %3550 = vmatpush.bf16.msra.mxu3 %v5623_v39  ;;  %v5178_v39 = vld [vmem:[%s9133_s5 + $0x238] sm:$0xf] }
 0x224   :  { %3551 = vmatpush.bf16.msra.mxu3 %v5595_v42  ;;  %v5011_v42 = vor.u32 %v6051_v34, %v5010_v33  ;;  %v5096_v33 = vld [vmem:[%s9133_s5 + $0x1ac] sm:$0xf0]  ;;  %v6181_v34 = vld [vmem:[%s9133_s5 + $0x514] sm:$0xf] }
 0x228   :  { %3552 = vmatpush.bf16.msra.mxu3 %v5567_v46  ;;  %v6044_v46 = vld [vmem:[%s9133_s5 + $0xc8] sm:$0xf0] }
 0x268   :  { %v1993_v48 = vpop.f32.mrf.mxu1 }
 0x269   :  { %v1994_v49 = vadd.f32 %v1993_v48, %v1938_v47  ;;  %v5430_v47 = vld [vmem:[%s9133_s5 + $0x430] sm:$0xf]  ;;  %v5179_v48 = vor.u32 %v6093_v40, %v5178_v39  ;;  %v5264_v39 = vld [vmem:[%s9133_s5 + $0x2fc] sm:$0xf0]  ;;  %v5347_v40 = vor.u32 %v6135_v28, %v5346_v30  ;;  %v6083_v28 = vld [vmem:[%s9133_s5 + $0x204] sm:$0xf] }
 0x26a   :  { %v5768_v30 = vld [vmem:[%s9133_s5 + $0x6ec] sm:$0xf0] }
 0x26b   :  { %v2024_v54 = vmax.f32 %v1994_v49, 0.0  ;;  %v6156_v49 = vld [vmem:[%s9133_s5 + $0x448] sm:$0xf0] }
 0x26c   :  { %v5431_v62 = vor.u32 %v6156_v49, %v5430_v47  ;;  %v5267_v47 = vor.u32 %v6111_v38, %v5264_v39  ;;  %v6174_v49 = vld [vmem:[%s9133_s5 + $0x4dc] sm:$0xf]  ;;  %v5404_v39 = vld [vmem:[%s9133_s5 + $0x414] sm:$0xf0] }
 0x26d   :  { %v8103_v60 = vpack.c.bf16 %v2024_v54, %v2024_v54  ;;  %v6146_v38 = vld [vmem:[%s9133_s5 + $0x3fc] sm:$0xf] }
 0x26e   :  { %v1980_v63 = vpop.f32.mrf.mxu3 }
 0x26f   :  { %v1981_v0 = vadd.f32 %v1980_v63, %v1937_v56  ;;  %v2006_v1 = vpop.f32.mrf.mxu2  ;;  %3475 = vmatmul.bf16.vlgmr.msrb.gmra.mxu1 %v8103_v60  ;;  %v5150_v56 = vld [vmem:[%s9133_s5 + $0x200] sm:$0xf]  ;;  %v5767_v63 = vor.u32 %v6240_v52, %v5766_v50  ;;  %v5516_v50 = vld [vmem:[%s9133_s5 + $0x4f4] sm:$0xf0]  ;;  %v6104_v52 = vld [vmem:[%s9133_s5 + $0x2ac] sm:$0xf] }
 0x270   :  { %v2007_v4 = vadd.f32 %v2006_v1, %v1939_v58  ;;  %3571 = vmatpush.bf16.msrb.mxu1 %v5319_v59  ;;  %v1995_v5 = vpop.f32.mrf.mxu1  ;;  %v6086_v58 = vld [vmem:[%s9133_s5 + $0x218] sm:$0xf0]  ;;  %v4983_v59 = vor.u32 %v6044_v46, %v4982_v45  ;;  %v6037_v1 = vld [vmem:[%s9133_s5 + $0x90] sm:$0xf0]  ;;  %v6212_v45 = vld [vmem:[%s9133_s5 + $0x608] sm:$0xf0] }
 0x271   :  { %v2023_v10 = vmax.f32 %v1981_v0, 0.0  ;;  %v4954_v0 = vld [vmem:[%s9133_s5 + $0x78] sm:$0xf]  ;;  %v5151_v3 = vor.u32 %v6086_v58, %v5150_v56  ;;  %v6062_v46 = vld [vmem:[%s9133_s5 + $0x15c] sm:$0xf] }
 0x272   :  { %v2025_v53 = vmax.f32 %v2007_v4, 0.0  ;;  %v6149_v4 = vld [vmem:[%s9133_s5 + $0x410] sm:$0xf0]  ;;  %v5738_v5 = vld [vmem:[%s9133_s5 + $0x698] sm:$0xf]  ;;  %v4955_v11 = vor.u32 %v6037_v1, %v4954_v0 }
 0x273   :  { %v8130_v13 = vpack.c.bf16 %v2023_v10, %v2023_v10  ;;  %v6055_v0 = vld [vmem:[%s9133_s5 + $0x124] sm:$0xf] }
 0x274   :  { %v8138_v7 = vpack.c.bf16 %v2025_v53, %v2025_v53  ;;  %3572 = vmatpush.bf16.msrb.mxu1 %v5291_v6  ;;  %v6233_v6 = vld [vmem:[%s9133_s5 + $0x6b0] sm:$0xf0]  ;;  %v5320_v53 = vld [vmem:[%s9133_s5 + $0x36c] sm:$0xf0] }
 0x275   :  { %3462 = vmatmul.bf16.vlgmr.msrb.gmra.mxu0 %v8130_v13 }
 0x276   :  { %3488 = vmatmul.bf16.vlgmr.msrb.gmra.mxu2 %v8138_v7  ;;  %3558 = vmatpush.bf16.msrb.mxu0 %v5095_v12  ;;  %v1982_v24 = vpop.f32.mrf.mxu3  ;;  %v5403_v12 = vor.u32 %v6149_v4, %v5402_v2  ;;  %v5040_v2 = vld [vmem:[%s9133_s5 + $0x13c] sm:$0xf0] }
 0x277   :  { %3584 = vmatpush.bf16.msrb.mxu2 %v5543_v14  ;;  %v2008_v25 = vpop.f32.mrf.mxu2  ;;  %v5739_v14 = vor.u32 %v6233_v6, %v5738_v5  ;;  %v5323_v24 = vor.u32 %v6125_v55, %v5320_v53  ;;  %v5488_v4 = vld [vmem:[%s9133_s5 + $0x4bc] sm:$0xf0]  ;;  %v6097_v5 = vld [vmem:[%s9133_s5 + $0x274] sm:$0xf]  ;;  %v5208_v6 = vld [vmem:[%s9133_s5 + $0x28c] sm:$0xf0]  ;;  %v5043_v9 = vor.u32 %v6055_v0, %v5040_v2 }
 0x278   :  { %3573 = vmatpush.bf16.msrb.mxu1 %v5263_v18  ;;  %v5374_v18 = vld [vmem:[%s9133_s5 + $0x3c0] sm:$0xf]  ;;  %v6118_v25 = vld [vmem:[%s9133_s5 + $0x31c] sm:$0xf]  ;;  %v6048_v53 = vld [vmem:[%s9133_s5 + $0xec] sm:$0xf] }
 0x279   :  { %v5375_v51 = vor.u32 %v6142_v20, %v5374_v18  ;;  %v6198_v55 = vld [vmem:[%s9133_s5 + $0x598] sm:$0xf0] }
 0x27a   :  { %3559 = vmatpush.bf16.msrb.mxu0 %v5067_v17  ;;  %v4927_v17 = vor.u32 %v6030_v16, %v4926_v15  ;;  %v6160_v15 = vld [vmem:[%s9133_s5 + $0x46c] sm:$0xf]  ;;  %v5460_v16 = vld [vmem:[%s9133_s5 + $0x484] sm:$0xf0]  ;;  %v6090_v18 = vld [vmem:[%s9133_s5 + $0x23c] sm:$0xf] }
 0x27b   :  { %3585 = vmatpush.bf16.msrb.mxu2 %v5515_v26  ;;  %v5292_v26 = vld [vmem:[%s9133_s5 + $0x334] sm:$0xf0]  ;;  %v6122_v0 = vld [vmem:[%s9133_s5 + $0x338] sm:$0xf0] }
 0x27c   :  { %3574 = vmatpush.bf16.msrb.mxu1 %v5235_v57  ;;  %v5711_v57 = vor.u32 %v6226_v22, %v5710_v21  ;;  %v5570_v21 = vld [vmem:[%s9133_s5 + $0x548] sm:$0xf] }
 0x27e   :  { %3560 = vmatpush.bf16.msrb.mxu0 %v5039_v31  ;;  %v2019_v41 = vpop.f32.mrf.mxu3  ;;  %v6219_v31 = vld [vmem:[%s9133_s5 + $0x640] sm:$0xf0] }
 0x27f   :  { %3586 = vmatpush.bf16.msrb.mxu2 %v5487_v32  ;;  %v2020_v43 = vadd.f32 %v2019_v41, %v1940_v35  ;;  %3527 = vmatmul.bf16.vlgmr.msra.gmra.mxu1 %v8103_v60  ;;  %v6069_v32 = vld [vmem:[%s9133_s5 + $0x194] sm:$0xf]  ;;  %v5295_v35 = vor.u32 %v6118_v25, %v5292_v26  ;;  %v5683_v41 = vor.u32 %v6219_v31, %v5682_v29  ;;  %v4984_v26 = vld [vmem:[%s9133_s5 + $0xcc] sm:$0xf0]  ;;  %v5152_v29 = vld [vmem:[%s9133_s5 + $0x21c] sm:$0xf0] }
 0x280   :  { %3575 = vmatpush.bf16.msrb.mxu1 %v5207_v36  ;;  %v5544_v36 = vld [vmem:[%s9133_s5 + $0x52c] sm:$0xf0]  ;;  %v6041_v25 = vld [vmem:[%s9133_s5 + $0xb4] sm:$0xf] }
 0x281   :  { %v2026_v54 = vmax.f32 %v2020_v43, 0.0  ;;  %v5547_v43 = vor.u32 %v6181_v34, %v5544_v36  ;;  %v4956_v34 = vld [vmem:[%s9133_s5 + $0x94] sm:$0xf0]  ;;  %v5771_v36 = vor.u32 %v6237_v27, %v5768_v30  ;;  %v5242_v27 = vld [vmem:[%s9133_s5 + $0x2b0] sm:$0xf] }
 0x282   :  { %3561 = vmatpush.bf16.msrb.mxu0 %v5011_v42  ;;  %v5099_v42 = vor.u32 %v6069_v32, %v5096_v33  ;;  %v4987_v32 = vor.u32 %v6041_v25, %v4984_v26  ;;  %v6034_v33 = vld [vmem:[%s9133_s5 + $0x7c] sm:$0xf]  ;;  %v5074_v26 = vld [vmem:[%s9133_s5 + $0x160] sm:$0xf]  ;;  %v6108_v30 = vld [vmem:[%s9133_s5 + $0x2c8] sm:$0xf0] }
 0x283   :  { %v8216_v61 = vpack.c.bf16 %v2026_v54, %v2026_v54  ;;  %3587 = vmatpush.bf16.msrb.mxu2 %v5459_v44  ;;  %v5654_v44 = vld [vmem:[%s9133_s5 + $0x5f0] sm:$0xf]  ;;  %v5236_v54 = vld [vmem:[%s9133_s5 + $0x2c4] sm:$0xf0] }
 0x284   :  { %3576 = vmatpush.bf16.msrb.mxu1 %v5179_v48  ;;  %v5068_v48 = vld [vmem:[%s9133_s5 + $0x174] sm:$0xf0]  ;;  %v5655_v56 = vor.u32 %v6212_v45, %v5654_v44  ;;  %v5239_v1 = vor.u32 %v6104_v52, %v5236_v54  ;;  %v6129_v45 = vld [vmem:[%s9133_s5 + $0x370] sm:$0xf0]  ;;  %v4928_v52 = vld [vmem:[%s9133_s5 + $0x5c] sm:$0xf0] }
 0x285   :  { %3501 = vmatmul.bf16.vlgmr.msrb.gmra.mxu3 %v8216_v61  ;;  %3514 = vmatmul.bf16.vlgmr.msra.gmra.mxu0 %v8130_v13  ;;  %v5071_v58 = vor.u32 %v6062_v46, %v5068_v48  ;;  %v5326_v44 = vld [vmem:[%s9133_s5 + $0x358] sm:$0xf]  ;;  %v4959_v46 = vor.u32 %v6034_v33, %v4956_v34  ;;  %v6027_v48 = vld [vmem:[%s9133_s5 + $0x44] sm:$0xf]  ;;  %v5243_v33 = vor.u32 %v6108_v30, %v5242_v27  ;;  %v5046_v34 = vld [vmem:[%s9133_s5 + $0x128] sm:$0xf] }
 0x286   :  { %3540 = vmatmul.bf16.vlgmr.msra.gmra.mxu2 %v8138_v7  ;;  %3562 = vmatpush.bf16.msrb.mxu0 %v4983_v59  ;;  %v2021_v10 = vpop.f32.mrf.mxu3  ;;  %v5519_v59 = vor.u32 %v6174_v49, %v5516_v50  ;;  %v6139_v54 = vld [vmem:[%s9133_s5 + $0x3c4] sm:$0xf]  ;;  %v5382_v27 = vld [vmem:[%s9133_s5 + $0x3c8] sm:$0xf] }
 0x287   :  { %3588 = vmatpush.bf16.msrb.mxu2 %v5431_v62  ;;  %3597 = vmatpush.bf16.msrb.mxu3 %v5767_v63  ;;  %v5626_v62 = vld [vmem:[%s9133_s5 + $0x5b8] sm:$0xf]  ;;  %v6205_v63 = vld [vmem:[%s9133_s5 + $0x5d0] sm:$0xf0] }
 0x288   :  { %3577 = vmatpush.bf16.msrb.mxu1 %v5151_v3  ;;  %v6167_v3 = vld [vmem:[%s9133_s5 + $0x4a4] sm:$0xf]  ;;  %v5627_v8 = vor.u32 %v6205_v63, %v5626_v62  ;;  %v5712_v62 = vld [vmem:[%s9133_s5 + $0x67c] sm:$0xf0] }
 0x289   :  { %v5491_v10 = vor.u32 %v6167_v3, %v5488_v4  ;;  %v5298_v63 = vld [vmem:[%s9133_s5 + $0x320] sm:$0xf]  ;;  %v6020_v3 = vld [vmem:[%s9133_s5 + $0xc] sm:$0xf]  ;;  %v4900_v4 = vld [vmem:[%s9133_s5 + $0x24] sm:$0xf0] }
 0x28a   :  { %3563 = vmatpush.bf16.msrb.mxu0 %v4955_v11  ;;  %v5598_v11 = vld [vmem:[%s9133_s5 + $0x580] sm:$0xf] }
 0x28b   :  { %3589 = vmatpush.bf16.msrb.mxu2 %v5403_v12  ;;  %3598 = vmatpush.bf16.msrb.mxu3 %v5739_v14  ;;  %v5211_v12 = vor.u32 %v6097_v5, %v5208_v6  ;;  %v5012_v14 = vld [vmem:[%s9133_s5 + $0x104] sm:$0xf0]  ;;  %v5599_v20 = vor.u32 %v6198_v55, %v5598_v11  ;;  %v6132_v5 = vld [vmem:[%s9133_s5 + $0x38c] sm:$0xf]  ;;  %v5299_v11 = vor.u32 %v6122_v0, %v5298_v63  ;;  %v5102_v55 = vld [vmem:[%s9133_s5 + $0x198] sm:$0xf] }
 0x28c   :  { %3578 = vmatpush.bf16.msrb.mxu1 %v5123_v19  ;;  %v5180_v19 = vld [vmem:[%s9133_s5 + $0x254] sm:$0xf0]  ;;  %v5015_v22 = vor.u32 %v6048_v53, %v5012_v14  ;;  %v6073_v53 = vld [vmem:[%s9133_s5 + $0x1b0] sm:$0xf0] }
 0x28d   :  { %v5183_v23 = vor.u32 %v6090_v18, %v5180_v19  ;;  %v6185_v14 = vld [vmem:[%s9133_s5 + $0x530] sm:$0xf0]  ;;  %v4903_v18 = vor.u32 %v6020_v3, %v4900_v4  ;;  %v5438_v3 = vld [vmem:[%s9133_s5 + $0x438] sm:$0xf] }
 0x28e   :  { %3564 = vmatpush.bf16.msrb.mxu0 %v4927_v17  ;;  %v6191_v17 = vld [vmem:[%s9133_s5 + $0x560] sm:$0xf0]  ;;  %v6157_v4 = vld [vmem:[%s9133_s5 + $0x450] sm:$0xf0] }
 0x28f   :  { %3590 = vmatpush.bf16.msrb.mxu2 %v5375_v51  ;;  %3599 = vmatpush.bf16.msrb.mxu3 %v5711_v57  ;;  %v6153_v51 = vld [vmem:[%s9133_s5 + $0x434] sm:$0xf]  ;;  %v5432_v57 = vld [vmem:[%s9133_s5 + $0x44c] sm:$0xf0]  ;;  %v5571_v31 = vor.u32 %v6191_v17, %v5570_v21  ;;  %v5103_v21 = vor.u32 %v6073_v53, %v5102_v55  ;;  %v5439_v55 = vor.u32 %v6157_v4, %v5438_v3  ;;  %v6175_v3 = vld [vmem:[%s9133_s5 + $0x4e4] sm:$0xf] }
 0x290   :  { %3623 = vmatpush.bf16.msra.mxu1 %v5323_v24  ;;  %v5463_v24 = vor.u32 %v6160_v15, %v5460_v16  ;;  %v5270_v15 = vld [vmem:[%s9133_s5 + $0x2e8] sm:$0xf]  ;;  %v6115_v16 = vld [vmem:[%s9133_s5 + $0x300] sm:$0xf0]  ;;  %v5524_v4 = vld [vmem:[%s9133_s5 + $0x4fc] sm:$0xf0] }
 0x291   :  { %3579 = vmatmul.bf16.vlgmr.msrb.gmra.mxu1 %v8103_v60  ;;  %v5271_v25 = vor.u32 %v6115_v16, %v5270_v15  ;;  %v5410_v15 = vld [vmem:[%s9133_s5 + $0x400] sm:$0xf] }
 0x292   :  { %3565 = vmatpush.bf16.msrb.mxu0 %v4899_v37  ;;  %v5155_v37 = vor.u32 %v6083_v28, %v5152_v29 }
 0x293   :  { %3591 = vmatpush.bf16.msrb.mxu2 %v5347_v40  ;;  %3600 = vmatpush.bf16.msrb.mxu3 %v5683_v41  ;;  %v6230_v40 = vld [vmem:[%s9133_s5 + $0x69c] sm:$0xf]  ;;  %v5740_v41 = vld [vmem:[%s9133_s5 + $0x6b4] sm:$0xf0] }
 0x294   :  { %3624 = vmatpush.bf16.msra.mxu1 %v5295_v35  ;;  %v5435_v35 = vor.u32 %v6153_v51, %v5432_v57  ;;  %v5743_v49 = vor.u32 %v6230_v40, %v5740_v41  ;;  %v5522_v51 = vld [vmem:[%s9133_s5 + $0x4e0] sm:$0xf]  ;;  %v6178_v57 = vld [vmem:[%s9133_s5 + $0x4f8] sm:$0xf0]  ;;  %v6101_v40 = vld [vmem:[%s9133_s5 + $0x290] sm:$0xf0] }
 0x295   :  { %3553 = vmatmul.bf16.vlgmr.msra.gmra.mxu3 %v8216_v61  ;;  %3566 = vmatmul.bf16.vlgmr.msrb.gmra.mxu0 %v8130_v13 }
 0x296   :  { %3610 = vmatpush.bf16.msra.mxu0 %v5099_v42  ;;  %3592 = vmatmul.bf16.vlgmr.msrb.gmra.mxu2 %v8138_v7  ;;  %v6076_v42 = vld [vmem:[%s9133_s5 + $0x1cc] sm:$0xf] }
 0x297   :  { %3636 = vmatpush.bf16.msra.mxu2 %v5547_v43  ;;  %3601 = vmatpush.bf16.msrb.mxu3 %v5655_v56  ;;  %v5124_v43 = vld [vmem:[%s9133_s5 + $0x1e4] sm:$0xf0]  ;;  %v5376_v56 = vld [vmem:[%s9133_s5 + $0x3dc] sm:$0xf0] }
 0x298   :  { %3625 = vmatpush.bf16.msra.mxu1 %v5267_v47  ;;  %v5407_v47 = vor.u32 %v6146_v38, %v5404_v39  ;;  %v5127_v50 = vor.u32 %v6076_v42, %v5124_v43  ;;  %v5379_v2 = vor.u32 %v6139_v54, %v5376_v56  ;;  %v6171_v38 = vld [vmem:[%s9133_s5 + $0x4c0] sm:$0xf0]  ;;  %v5214_v39 = vld [vmem:[%s9133_s5 + $0x278] sm:$0xf]  ;;  %v6094_v54 = vld [vmem:[%s9133_s5 + $0x258] sm:$0xf0] }
 0x299   :  { %v6195_v43 = vld [vmem:[%s9133_s5 + $0x584] sm:$0xf] }
 0x29a   :  { %3611 = vmatpush.bf16.msra.mxu0 %v5071_v58  ;;  %v5327_v58 = vor.u32 %v6129_v45, %v5326_v44  ;;  %v5600_v44 = vld [vmem:[%s9133_s5 + $0x59c] sm:$0xf0] }
 0x29b   :  { %3637 = vmatpush.bf16.msra.mxu2 %v5519_v59  ;;  %3602 = vmatpush.bf16.msrb.mxu3 %v5627_v8  ;;  %v6223_v59 = vld [vmem:[%s9133_s5 + $0x664] sm:$0xf]  ;;  %v5348_v8 = vld [vmem:[%s9133_s5 + $0x3a4] sm:$0xf0]  ;;  %v5603_v56 = vor.u32 %v6195_v43, %v5600_v44  ;;  %v6220_v43 = vld [vmem:[%s9133_s5 + $0x648] sm:$0xf0] }
 0x29c   :  { %3626 = vmatpush.bf16.msra.mxu1 %v5239_v1  ;;  %v4931_v1 = vor.u32 %v6027_v48, %v4928_v52  ;;  %v5715_v6 = vor.u32 %v6223_v59, %v5712_v62  ;;  %v5351_v19 = vor.u32 %v6132_v5, %v5348_v8  ;;  %v6052_v48 = vld [vmem:[%s9133_s5 + $0x108] sm:$0xf0]  ;;  %v5186_v52 = vld [vmem:[%s9133_s5 + $0x240] sm:$0xf]  ;;  %v5572_v62 = vld [vmem:[%s9133_s5 + $0x564] sm:$0xf0] }
 0x29d   :  { %v6188_v59 = vld [vmem:[%s9133_s5 + $0x54c] sm:$0xf]  ;;  %v5187_v0 = vor.u32 %v6094_v54, %v5186_v52  ;;  %v5774_v5 = vld [vmem:[%s9133_s5 + $0x6d8] sm:$0xf]  ;;  %v5158_v8 = vld [vmem:[%s9133_s5 + $0x208] sm:$0xf] }
 0x29e   :  { %3612 = vmatpush.bf16.msra.mxu0 %v5043_v9  ;;  %v6216_v9 = vld [vmem:[%s9133_s5 + $0x62c] sm:$0xf]  ;;  %v6070_v44 = vld [vmem:[%s9133_s5 + $0x19c] sm:$0xf]  ;;  %v5272_v52 = vld [vmem:[%s9133_s5 + $0x304] sm:$0xf0] }
 0x29f   :  { %3638 = vmatpush.bf16.msra.mxu2 %v5491_v10  ;;  %3603 = vmatpush.bf16.msrb.mxu3 %v5599_v20  ;;  %v5684_v10 = vld [vmem:[%s9133_s5 + $0x644] sm:$0xf0] }
 0x2a0   :  { %3627 = vmatpush.bf16.msra.mxu1 %v5211_v12  ;;  %v5550_v12 = vld [vmem:[%s9133_s5 + $0x518] sm:$0xf]  ;;  %v5687_v20 = vor.u32 %v6216_v9, %v5684_v10  ;;  %v6087_v9 = vld [vmem:[%s9133_s5 + $0x220] sm:$0xf0]  ;;  %v5575_v10 = vor.u32 %v6188_v59, %v5572_v62 }
 0x2a1   :  { %v5551_v17 = vor.u32 %v6185_v14, %v5550_v12  ;;  %v4962_v12 = vld [vmem:[%s9133_s5 + $0x80] sm:$0xf]  ;;  %v6038_v14 = vld [vmem:[%s9133_s5 + $0x98] sm:$0xf0]  ;;  %v5159_v16 = vor.u32 %v6087_v9, %v5158_v8  ;;  %v5662_v62 = vld [vmem:[%s9133_s5 + $0x5f8] sm:$0xf] }
 0x2a2   :  { %3613 = vmatpush.bf16.msra.mxu0 %v5015_v22  ;;  %v6209_v22 = vld [vmem:[%s9133_s5 + $0x5f4] sm:$0xf] }
 0x2a3   :  { %3639 = vmatpush.bf16.msra.mxu2 %v5463_v24  ;;  %3604 = vmatpush.bf16.msrb.mxu3 %v5571_v31  ;;  %v5656_v24 = vld [vmem:[%s9133_s5 + $0x60c] sm:$0xf0]  ;;  %v6202_v31 = vld [vmem:[%s9133_s5 + $0x5bc] sm:$0xf] }
 0x2a4   :  { %3628 = vmatpush.bf16.msra.mxu1 %v5183_v23  ;;  %v6066_v23 = vld [vmem:[%s9133_s5 + $0x178] sm:$0xf0]  ;;  %v5659_v28 = vor.u32 %v6209_v22, %v5656_v24  ;;  %v6080_v22 = vld [vmem:[%s9133_s5 + $0x1e8] sm:$0xf0]  ;;  %v4963_v24 = vor.u32 %v6038_v14, %v4962_v12  ;;  %v5048_v14 = vld [vmem:[%s9133_s5 + $0x144] sm:$0xf0] }
 0x2a5   :  { %v5075_v29 = vor.u32 %v6066_v23, %v5074_v26 }
 0x2a6   :  { %3614 = vmatpush.bf16.msra.mxu0 %v4987_v32  ;;  %3605 = vmatmul.bf16.vlgmr.msrb.gmra.mxu3 %v8216_v61  ;;  %v5628_v32 = vld [vmem:[%s9133_s5 + $0x5d4] sm:$0xf0] }
 0x2a7   :  { %3640 = vmatpush.bf16.msra.mxu2 %v5435_v35  ;;  %3649 = vmatpush.bf16.msra.mxu3 %v5771_v36  ;;  %v5523_v35 = vor.u32 %v6178_v57, %v5522_v51  ;;  %v6059_v36 = vld [vmem:[%s9133_s5 + $0x140] sm:$0xf0]  ;;  %v5631_v41 = vor.u32 %v6202_v31, %v5628_v32  ;;  %v4934_v51 = vld [vmem:[%s9133_s5 + $0x48] sm:$0xf] }
 0x2a8   :  { %3629 = vmatpush.bf16.msra.mxu1 %v5155_v37  ;;  %v5494_v37 = vld [vmem:[%s9133_s5 + $0x4a8] sm:$0xf]  ;;  %v5047_v42 = vor.u32 %v6059_v36, %v5046_v34  ;;  %v6031_v57 = vld [vmem:[%s9133_s5 + $0x60] sm:$0xf0]  ;;  %v5300_v34 = vld [vmem:[%s9133_s5 + $0x33c] sm:$0xf0] }
 0x2a9   :  { %v5495_v45 = vor.u32 %v6171_v38, %v5494_v37  ;;  %v6227_v31 = vld [vmem:[%s9133_s5 + $0x680] sm:$0xf0]  ;;  %v4906_v36 = vld [vmem:[%s9133_s5 + $0x10] sm:$0xf] }
 0x2aa   :  { %3615 = vmatpush.bf16.msra.mxu0 %v4959_v46  ;;  %v5215_v46 = vor.u32 %v6101_v40, %v5214_v39  ;;  %v6024_v39 = vld [vmem:[%s9133_s5 + $0x28] sm:$0xf0]  ;;  %v5354_v40 = vld [vmem:[%s9133_s5 + $0x390] sm:$0xf] }
 0x2ab   :  { %3641 = vmatpush.bf16.msra.mxu2 %v5407_v47  ;;  %3650 = vmatpush.bf16.msra.mxu3 %v5743_v49  ;;  %v5018_v47 = vld [vmem:[%s9133_s5 + $0xf0] sm:$0xf] }
 0x2ac   :  { %3630 = vmatpush.bf16.msra.mxu1 %v5127_v50  ;;  %v5466_v49 = vld [vmem:[%s9133_s5 + $0x470] sm:$0xf]  ;;  %v6164_v50 = vld [vmem:[%s9133_s5 + $0x488] sm:$0xf0] }
 0x2ad   :  { %v5467_v63 = vor.u32 %v6164_v50, %v5466_v49  ;;  %v4907_v49 = vor.u32 %v6024_v39, %v4906_v36  ;;  %v6112_v50 = vld [vmem:[%s9133_s5 + $0x2ec] sm:$0xf]  ;;  %v6238_v39 = vld [vmem:[%s9133_s5 + $0x6dc] sm:$0xf] }
 0x2ae   :  { %3616 = vmatpush.bf16.msra.mxu0 %v4931_v1  ;;  %v4990_v1 = vld [vmem:[%s9133_s5 + $0xb8] sm:$0xf] }
 0x2af   :  { %3642 = vmatpush.bf16.msra.mxu2 %v5379_v2  ;;  %3651 = vmatpush.bf16.msra.mxu3 %v5715_v6  ;;  %v6045_v2 = vld [vmem:[%s9133_s5 + $0xd0] sm:$0xf0] }
 0x2b0   :  { %3675 = vmatpush.bf16.msrb.mxu1 %v5327_v58  ;;  %v5019_v58 = vor.u32 %v6052_v48, %v5018_v47  ;;  %v6241_v6 = vld [vmem:[%s9133_s5 + $0x6f0] sm:$0xf0]  ;;  %v6182_v47 = vld [vmem:[%s9133_s5 + $0x51c] sm:$0xf]  ;;  %v5552_v48 = vld [vmem:[%s9133_s5 + $0x534] sm:$0xf0] }
 0x2b1   :  { %3631 = vmatmul.bf16.vlgmr.msra.gmra.mxu1 %v8103_v60  ;;  %v5775_v53 = vor.u32 %v6241_v6, %v5774_v5  ;;  %v5555_v59 = vor.u32 %v6182_v47, %v5552_v48  ;;  %v6105_v5 = vld [vmem:[%s9133_s5 + $0x2b4] sm:$0xf]  ;;  %v5244_v6 = vld [vmem:[%s9133_s5 + $0x2cc] sm:$0xf0]  ;;  %v4964_v47 = vld [vmem:[%s9133_s5 + $0x9c] sm:$0xf0] }
 0x2b2   :  { %3617 = vmatpush.bf16.msra.mxu0 %v4903_v18  ;;  %v6150_v18 = vld [vmem:[%s9133_s5 + $0x418] sm:$0xf0]  ;;  %v5247_v12 = vor.u32 %v6105_v5, %v5244_v6  ;;  %v4936_v5 = vld [vmem:[%s9133_s5 + $0x64] sm:$0xf0]  ;;  %v6140_v6 = vld [vmem:[%s9133_s5 + $0x3cc] sm:$0xf] }
 0x2b3   :  { %3643 = vmatpush.bf16.msra.mxu2 %v5351_v19  ;;  %3652 = vmatpush.bf16.msra.mxu3 %v5687_v20  ;;  %v5746_v19 = vld [vmem:[%s9133_s5 + $0x6a0] sm:$0xf]  ;;  %v6234_v20 = vld [vmem:[%s9133_s5 + $0x6b8] sm:$0xf0]  ;;  %v5411_v26 = vor.u32 %v6150_v18, %v5410_v15  ;;  %v6168_v15 = vld [vmem:[%s9133_s5 + $0x4ac] sm:$0xf] }
 0x2b4   :  { %3676 = vmatpush.bf16.msrb.mxu1 %v5299_v11  ;;  %v4991_v11 = vor.u32 %v6045_v2, %v4990_v1  ;;  %v5747_v23 = vor.u32 %v6234_v20, %v5746_v19  ;;  %v5275_v1 = vor.u32 %v6112_v50, %v5272_v52  ;;  %v5076_v2 = vld [vmem:[%s9133_s5 + $0x17c] sm:$0xf0]  ;;  %v6098_v18 = vld [vmem:[%s9133_s5 + $0x27c] sm:$0xf]  ;;  %v5216_v19 = vld [vmem:[%s9133_s5 + $0x294] sm:$0xf0] }
 0x2b5   :  { %3618 = vmatmul.bf16.vlgmr.msra.gmra.mxu0 %v8130_v13  ;;  %v6147_v50 = vld [vmem:[%s9133_s5 + $0x404] sm:$0xf]  ;;  %v5412_v52 = vld [vmem:[%s9133_s5 + $0x41c] sm:$0xf0] }
 0x2b6   :  { %3662 = vmatpush.bf16.msrb.mxu0 %v5103_v21  ;;  %3644 = vmatmul.bf16.vlgmr.msra.gmra.mxu2 %v8138_v7  ;;  %v5130_v21 = vld [vmem:[%s9133_s5 + $0x1d0] sm:$0xf] }
 0x2b7   :  { %3688 = vmatpush.bf16.msrb.mxu2 %v5551_v17  ;;  %3653 = vmatpush.bf16.msra.mxu3 %v5659_v28  ;;  %v6126_v17 = vld [vmem:[%s9133_s5 + $0x35c] sm:$0xf]  ;;  %v5131_v30 = vor.u32 %v6080_v22, %v5130_v21  ;;  %v6143_v28 = vld [vmem:[%s9133_s5 + $0x3e0] sm:$0xf0] }
 0x2b8   :  { %3677 = vmatpush.bf16.msrb.mxu1 %v5271_v25  ;;  %v5328_v25 = vld [vmem:[%s9133_s5 + $0x374] sm:$0xf0]  ;;  %v5383_v37 = vor.u32 %v6143_v28, %v5382_v27  ;;  %v6091_v27 = vld [vmem:[%s9133_s5 + $0x244] sm:$0xf] }
 0x2b9   :  { %v5331_v32 = vor.u32 %v6126_v17, %v5328_v25  ;;  %v6199_v17 = vld [vmem:[%s9133_s5 + $0x5a0] sm:$0xf0]  ;;  %v6049_v25 = vld [vmem:[%s9133_s5 + $0xf4] sm:$0xf] }
 0x2ba   :  { %3663 = vmatpush.bf16.msrb.mxu0 %v5075_v29  ;;  %v5718_v29 = vld [vmem:[%s9133_s5 + $0x668] sm:$0xf] }
 0x2bb   :  { %3689 = vmatpush.bf16.msrb.mxu2 %v5523_v35  ;;  %3654 = vmatpush.bf16.msra.mxu3 %v5631_v41  ;;  %v4935_v35 = vor.u32 %v6031_v57, %v4934_v51  ;;  %v5719_v38 = vor.u32 %v6227_v31, %v5718_v29  ;;  %v6136_v41 = vld [vmem:[%s9133_s5 + $0x3a8] sm:$0xf0]  ;;  %v6161_v51 = vld [vmem:[%s9133_s5 + $0x474] sm:$0xf]  ;;  %v5468_v57 = vld [vmem:[%s9133_s5 + $0x48c] sm:$0xf0] }
 0x2bc   :  { %3678 = vmatpush.bf16.msrb.mxu1 %v5243_v33  ;;  %v6119_v33 = vld [vmem:[%s9133_s5 + $0x324] sm:$0xf]  ;;  %v5355_v54 = vor.u32 %v6136_v41, %v5354_v40  ;;  %v5578_v29 = vld [vmem:[%s9133_s5 + $0x550] sm:$0xf]  ;;  %v5776_v40 = vld [vmem:[%s9133_s5 + $0x6f4] sm:$0xf0] }
 0x2bd   :  { %v6084_v41 = vld [vmem:[%s9133_s5 + $0x20c] sm:$0xf]  ;;  %v5779_v48 = vor.u32 %v6238_v39, %v5776_v40  ;;  %v5250_v39 = vld [vmem:[%s9133_s5 + $0x2b8] sm:$0xf]  ;;  %v6109_v40 = vld [vmem:[%s9133_s5 + $0x2d0] sm:$0xf0] }
 0x2be   :  { %3664 = vmatpush.bf16.msrb.mxu0 %v5047_v42  ;;  %v5690_v42 = vld [vmem:[%s9133_s5 + $0x630] sm:$0xf] }
 0x2bf   :  { %3690 = vmatpush.bf16.msrb.mxu2 %v5495_v45  ;;  %3655 = vmatpush.bf16.msra.mxu3 %v5603_v56  ;;  %v5303_v45 = vor.u32 %v6119_v33, %v5300_v34  ;;  %v5691_v56 = vor.u32 %v6220_v43, %v5690_v42  ;;  %v6042_v33 = vld [vmem:[%s9133_s5 + $0xbc] sm:$0xf]  ;;  %v4992_v34 = vld [vmem:[%s9133_s5 + $0xd4] sm:$0xf0]  ;;  %v5160_v42 = vld [vmem:[%s9133_s5 + $0x224] sm:$0xf0] }
 0x2c0   :  { %3679 = vmatpush.bf16.msrb.mxu1 %v5215_v46  ;;  %v5104_v46 = vld [vmem:[%s9133_s5 + $0x1b4] sm:$0xf0] }
 0x2c2   :  { %3665 = vmatpush.bf16.msrb.mxu0 %v5019_v58  ;;  %v5107_v58 = vor.u32 %v6070_v44, %v5104_v46  ;;  %v4995_v44 = vor.u32 %v6042_v33, %v4992_v34  ;;  %v6035_v46 = vld [vmem:[%s9133_s5 + $0x84] sm:$0xf]  ;;  %v5082_v34 = vld [vmem:[%s9133_s5 + $0x168] sm:$0xf] }
 0x2c3   :  { %3691 = vmatpush.bf16.msrb.mxu2 %v5467_v63  ;;  %3656 = vmatpush.bf16.msra.mxu3 %v5575_v10  ;;  %v6213_v63 = vld [vmem:[%s9133_s5 + $0x610] sm:$0xf0]  ;;  %v5527_v10 = vor.u32 %v6175_v3, %v5524_v4 }
 0x2c4   :  { %3680 = vmatpush.bf16.msrb.mxu1 %v5187_v0  ;;  %v6063_v0 = vld [vmem:[%s9133_s5 + $0x164] sm:$0xf]  ;;  %v5663_v8 = vor.u32 %v6213_v63, %v5662_v62  ;;  %v5334_v62 = vld [vmem:[%s9133_s5 + $0x360] sm:$0xf]  ;;  %v6130_v63 = vld [vmem:[%s9133_s5 + $0x378] sm:$0xf0] }
 0x2c5   :  { %v5079_v9 = vor.u32 %v6063_v0, %v5076_v2  ;;  %v4967_v0 = vor.u32 %v6035_v46, %v4964_v47  ;;  %v6028_v2 = vld [vmem:[%s9133_s5 + $0x4c] sm:$0xf]  ;;  %v5251_v47 = vor.u32 %v6109_v40, %v5250_v39 }
 0x2c6   :  { %3666 = vmatpush.bf16.msrb.mxu0 %v4991_v11  ;;  %3657 = vmatmul.bf16.vlgmr.msra.gmra.mxu3 %v8216_v61  ;;  %v5634_v11 = vld [vmem:[%s9133_s5 + $0x5c0] sm:$0xf] }
 0x2c7   :  { %3692 = vmatpush.bf16.msrb.mxu2 %v5439_v55  ;;  %3701 = vmatpush.bf16.msrb.mxu3 %v5775_v53  ;;  %v6206_v55 = vld [vmem:[%s9133_s5 + $0x5d8] sm:$0xf0]  ;;  %v6056_v53 = vld [vmem:[%s9133_s5 + $0x12c] sm:$0xf] }
 0x2c8   :  { %3681 = vmatpush.bf16.msrb.mxu1 %v5159_v16  ;;  %v5496_v16 = vld [vmem:[%s9133_s5 + $0x4c4] sm:$0xf0]  ;;  %v5635_v20 = vor.u32 %v6206_v55, %v5634_v11  ;;  %v5051_v21 = vor.u32 %v6056_v53, %v5048_v14  ;;  %v6123_v53 = vld [vmem:[%s9133_s5 + $0x340] sm:$0xf0] }
 0x2c9   :  { %v5499_v22 = vor.u32 %v6168_v15, %v5496_v16  ;;  %v5720_v11 = vld [vmem:[%s9133_s5 + $0x684] sm:$0xf0]  ;;  %v6021_v15 = vld [vmem:[%s9133_s5 + $0x14] sm:$0xf]  ;;  %v4908_v16 = vld [vmem:[%s9133_s5 + $0x2c] sm:$0xf0] }
 0x2ca   :  { %3667 = vmatpush.bf16.msrb.mxu0 %v4963_v24  ;;  %v5606_v24 = vld [vmem:[%s9133_s5 + $0x588] sm:$0xf] }
 0x2cb   :  { %3693 = vmatpush.bf16.msrb.mxu2 %v5411_v26  ;;  %3702 = vmatpush.bf16.msrb.mxu3 %v5747_v23  ;;  %v5219_v26 = vor.u32 %v6098_v18, %v5216_v19  ;;  %v5020_v23 = vld [vmem:[%s9133_s5 + $0x10c] sm:$0xf0]  ;;  %v5607_v28 = vor.u32 %v6199_v17, %v5606_v24  ;;  %v5306_v55 = vld [vmem:[%s9133_s5 + $0x328] sm:$0xf]  ;;  %v6133_v18 = vld [vmem:[%s9133_s5 + $0x394] sm:$0xf] }
 0x2cc   :  { %3682 = vmatpush.bf16.msrb.mxu1 %v5131_v30  ;;  %v5188_v30 = vld [vmem:[%s9133_s5 + $0x25c] sm:$0xf0]  ;;  %v5023_v31 = vor.u32 %v6049_v25, %v5020_v23  ;;  %v5307_v24 = vor.u32 %v6123_v53, %v5306_v55  ;;  %v6074_v25 = vld [vmem:[%s9133_s5 + $0x1b8] sm:$0xf0]  ;;  %v6189_v53 = vld [vmem:[%s9133_s5 + $0x554] sm:$0xf] }
 0x2cd   :  { %v5191_v36 = vor.u32 %v6091_v27, %v5188_v30  ;;  %v5110_v17 = vld [vmem:[%s9133_s5 + $0x1a0] sm:$0xf]  ;;  %v6186_v23 = vld [vmem:[%s9133_s5 + $0x538] sm:$0xf0]  ;;  %v4911_v27 = vor.u32 %v6021_v15, %v4908_v16 }
 0x2ce   :  { %3668 = vmatpush.bf16.msrb.mxu0 %v4935_v35  ;;  %v6192_v35 = vld [vmem:[%s9133_s5 + $0x568] sm:$0xf0]  ;;  %v4998_v16 = vld [vmem:[%s9133_s5 + $0xc0] sm:$0xf] }
 0x2cf   :  { %3694 = vmatpush.bf16.msrb.mxu2 %v5383_v37  ;;  %3703 = vmatpush.bf16.msrb.mxu3 %v5719_v38  ;;  %v6154_v37 = vld [vmem:[%s9133_s5 + $0x43c] sm:$0xf]  ;;  %v5440_v38 = vld [vmem:[%s9133_s5 + $0x454] sm:$0xf0]  ;;  %v5579_v43 = vor.u32 %v6192_v35, %v5578_v29  ;;  %v5111_v29 = vor.u32 %v6074_v25, %v5110_v17  ;;  %v6088_v17 = vld [vmem:[%s9133_s5 + $0x228] sm:$0xf0] }
 0x2d0   :  { %3727 = vmatpush.bf16.msra.mxu1 %v5331_v32  ;;  %v5471_v32 = vor.u32 %v6161_v51, %v5468_v57  ;;  %v5278_v51 = vld [vmem:[%s9133_s5 + $0x2f0] sm:$0xf]  ;;  %v6116_v57 = vld [vmem:[%s9133_s5 + $0x308] sm:$0xf0] }
 0x2d1   :  { %3683 = vmatmul.bf16.vlgmr.msrb.gmra.mxu1 %v8103_v60  ;;  %v5279_v33 = vor.u32 %v6116_v57, %v5278_v51  ;;  %v9012_v25 = vld [vmem:[%s9129_s6 + $0x9] sm:$0x7f] }
 0x2d2   :  { %3669 = vmatpush.bf16.msrb.mxu0 %v4907_v49  ;;  %v5163_v49 = vor.u32 %v6084_v41, %v5160_v42 }
 0x2d3   :  { %3695 = vmatpush.bf16.msrb.mxu2 %v5355_v54  ;;  %3704 = vmatpush.bf16.msrb.mxu3 %v5691_v56  ;;  %v6231_v54 = vld [vmem:[%s9133_s5 + $0x6a4] sm:$0xf]  ;;  %v5748_v56 = vld [vmem:[%s9133_s5 + $0x6bc] sm:$0xf0] }
 0x2d4   :  { %3728 = vmatpush.bf16.msra.mxu1 %v5303_v45  ;;  %v5443_v45 = vor.u32 %v6154_v37, %v5440_v38  ;;  %v5751_v3 = vor.u32 %v6231_v54, %v5748_v56  ;;  %v5530_v37 = vld [vmem:[%s9133_s5 + $0x4e8] sm:$0xf]  ;;  %v6179_v38 = vld [vmem:[%s9133_s5 + $0x500] sm:$0xf0]  ;;  %v5222_v54 = vld [vmem:[%s9133_s5 + $0x280] sm:$0xf] }
 0x2d5   :  { %3670 = vmatmul.bf16.vlgmr.msrb.gmra.mxu0 %v8130_v13  ;;  %v5531_v46 = vor.u32 %v6179_v38, %v5530_v37  ;;  %v6102_v56 = vld [vmem:[%s9133_s5 + $0x298] sm:$0xf0]  ;;  %v6081_v37 = vld [vmem:[%s9133_s5 + $0x1f0] sm:$0xf0]  ;;  %v2288_v38 = vperm.slane %v9012_v25, 0 }
 0x2d6   :  { %3714 = vmatpush.bf16.msra.mxu0 %v5107_v58  ;;  %3696 = vmatmul.bf16.vlgmr.msrb.gmra.mxu2 %v8138_v7  ;;  %v6077_v58 = vld [vmem:[%s9133_s5 + $0x1d4] sm:$0xf] }
 0x2d7   :  { %3740 = vmatpush.bf16.msra.mxu2 %v5555_v59  ;;  %3705 = vmatpush.bf16.msrb.mxu3 %v5663_v8  ;;  %v5132_v59 = vld [vmem:[%s9133_s5 + $0x1ec] sm:$0xf0]  ;;  %v5384_v8 = vld [vmem:[%s9133_s5 + $0x3e4] sm:$0xf0] }
 0x2d8   :  { %3729 = vmatpush.bf16.msra.mxu1 %v5275_v1  ;;  %v5415_v1 = vor.u32 %v6147_v50, %v5412_v52  ;;  %v5135_v4 = vor.u32 %v6077_v58, %v5132_v59  ;;  %v5387_v14 = vor.u32 %v6140_v6, %v5384_v8  ;;  %v5502_v50 = vld [vmem:[%s9133_s5 + $0x4b0] sm:$0xf]  ;;  %v6172_v52 = vld [vmem:[%s9133_s5 + $0x4c8] sm:$0xf0]  ;;  %v6165_v6 = vld [vmem:[%s9133_s5 + $0x490] sm:$0xf0] }
 0x2d9   :  { %v5194_v8 = vld [vmem:[%s9133_s5 + $0x248] sm:$0xf] }
 0x2da   :  { %3715 = vmatpush.bf16.msra.mxu0 %v5079_v9  ;;  %v5335_v9 = vor.u32 %v6130_v63, %v5334_v62  ;;  %v6196_v62 = vld [vmem:[%s9133_s5 + $0x58c] sm:$0xf]  ;;  %v5608_v63 = vld [vmem:[%s9133_s5 + $0x5a4] sm:$0xf0] }
 0x2db   :  { %3741 = vmatpush.bf16.msra.mxu2 %v5527_v10  ;;  %3706 = vmatpush.bf16.msrb.mxu3 %v5635_v20  ;;  %v6224_v10 = vld [vmem:[%s9133_s5 + $0x66c] sm:$0xf]  ;;  %v5356_v20 = vld [vmem:[%s9133_s5 + $0x3ac] sm:$0xf0] }
 0x2dc   :  { %3730 = vmatpush.bf16.msra.mxu1 %v5247_v12  ;;  %v4939_v12 = vor.u32 %v6028_v2, %v4936_v5  ;;  %v5723_v19 = vor.u32 %v6224_v10, %v5720_v11  ;;  %v5359_v30 = vor.u32 %v6133_v18, %v5356_v20  ;;  %v5026_v2 = vld [vmem:[%s9133_s5 + $0xf8] sm:$0xf]  ;;  %v5611_v11 = vor.u32 %v6196_v62, %v5608_v63  ;;  %v6046_v18 = vld [vmem:[%s9133_s5 + $0xd8] sm:$0xf0]  ;;  %v6025_v63 = vld [vmem:[%s9133_s5 + $0x30] sm:$0xf0] }
 0x2dd   :  { %v6158_v20 = vld [vmem:[%s9133_s5 + $0x458] sm:$0xf0]  ;;  %v4914_v62 = vld [vmem:[%s9133_s5 + $0x18] sm:$0xf] }
 0x2de   :  { %3716 = vmatpush.bf16.msra.mxu0 %v5051_v21  ;;  %v6217_v21 = vld [vmem:[%s9133_s5 + $0x634] sm:$0xf] }
 0x2df   :  { %3742 = vmatpush.bf16.msra.mxu2 %v5499_v22  ;;  %3707 = vmatpush.bf16.msrb.mxu3 %v5607_v28  ;;  %v5692_v22 = vld [vmem:[%s9133_s5 + $0x64c] sm:$0xf0] }
 0x2e0   :  { %3731 = vmatpush.bf16.msra.mxu1 %v5219_v26  ;;  %v5558_v26 = vld [vmem:[%s9133_s5 + $0x520] sm:$0xf]  ;;  %v5695_v28 = vor.u32 %v6217_v21, %v5692_v22  ;;  %v6242_v22 = vld [vmem:[%s9133_s5 + $0x6f8] sm:$0xf0] }
 0x2e1   :  { %v5559_v35 = vor.u32 %v6186_v23, %v5558_v26  ;;  %v5782_v21 = vld [vmem:[%s9133_s5 + $0x6e0] sm:$0xf]  ;;  %v4999_v23 = vor.u32 %v6046_v18, %v4998_v16  ;;  %v6207_v18 = vld [vmem:[%s9133_s5 + $0x5e0] sm:$0xf0] }
 0x2e2   :  { %3717 = vmatpush.bf16.msra.mxu0 %v5023_v31  ;;  %v6210_v31 = vld [vmem:[%s9133_s5 + $0x5fc] sm:$0xf] }
 0x2e3   :  { %3743 = vmatpush.bf16.msra.mxu2 %v5471_v32  ;;  %3708 = vmatpush.bf16.msrb.mxu3 %v5579_v43  ;;  %v5664_v32 = vld [vmem:[%s9133_s5 + $0x614] sm:$0xf0] }
 0x2e4   :  { %3732 = vmatpush.bf16.msra.mxu1 %v5191_v36  ;;  %v6067_v36 = vld [vmem:[%s9133_s5 + $0x180] sm:$0xf0]  ;;  %v5667_v42 = vor.u32 %v6210_v31, %v5664_v32 }
 0x2e5   :  { %v5083_v43 = vor.u32 %v6067_v36, %v5082_v34  ;;  %v6235_v34 = vld [vmem:[%s9133_s5 + $0x6c0] sm:$0xf0]  ;;  %v5138_v36 = vld [vmem:[%s9133_s5 + $0x1d8] sm:$0xf] }
 0x2e6   :  { %3718 = vmatpush.bf16.msra.mxu0 %v4995_v44  ;;  %3709 = vmatmul.bf16.vlgmr.msrb.gmra.mxu3 %v8216_v61  ;;  %v6203_v44 = vld [vmem:[%s9133_s5 + $0x5c4] sm:$0xf] }
 0x2e7   :  { %3744 = vmatpush.bf16.msra.mxu2 %v5443_v45  ;;  %3753 = vmatpush.bf16.msra.mxu3 %v5779_v48  ;;  %v5636_v45 = vld [vmem:[%s9133_s5 + $0x5dc] sm:$0xf0]  ;;  %v5054_v48 = vld [vmem:[%s9133_s5 + $0x130] sm:$0xf] }
 0x2e8   :  { %3733 = vmatpush.bf16.msra.mxu1 %v5163_v49  ;;  %v6060_v49 = vld [vmem:[%s9133_s5 + $0x148] sm:$0xf0]  ;;  %v5639_v58 = vor.u32 %v6203_v44, %v5636_v45  ;;  %v4942_v44 = vld [vmem:[%s9133_s5 + $0x50] sm:$0xf] }
 0x2e9   :  { %v5055_v59 = vor.u32 %v6060_v49, %v5054_v48  ;;  %v6032_v45 = vld [vmem:[%s9133_s5 + $0x68] sm:$0xf0]  ;;  %v5726_v49 = vld [vmem:[%s9133_s5 + $0x670] sm:$0xf] }
 0x2ea   :  { %3719 = vmatpush.bf16.msra.mxu0 %v4967_v0  ;;  %v5503_v0 = vor.u32 %v6172_v52, %v5502_v50  ;;  %v6144_v48 = vld [vmem:[%s9133_s5 + $0x3e8] sm:$0xf0]  ;;  %v4943_v52 = vor.u32 %v6032_v45, %v4942_v44 }
 0x2eb   :  { %3745 = vmatpush.bf16.msra.mxu2 %v5415_v1  ;;  %3754 = vmatpush.bf16.msra.mxu3 %v5751_v3  ;;  %v5223_v1 = vor.u32 %v6102_v56, %v5222_v54  ;;  %v6053_v3 = vld [vmem:[%s9133_s5 + $0x110] sm:$0xf0]  ;;  %v6228_v50 = vld [vmem:[%s9133_s5 + $0x688] sm:$0xf0] }
 0x2ec   :  { %3734 = vmatpush.bf16.msra.mxu1 %v5135_v4  ;;  %v8925_v41 = vpop.f32.mrf.mxu1  ;;  %v5474_v4 = vld [vmem:[%s9133_s5 + $0x478] sm:$0xf]  ;;  %v5027_v55 = vor.u32 %v6053_v3, %v5026_v2  ;;  %v6137_v2 = vld [vmem:[%s9133_s5 + $0x3b0] sm:$0xf0] }
 0x2ed   :  { %v5698_v3 = vld [vmem:[%s9133_s5 + $0x638] sm:$0xf] }
 0x2ee   :  { %3720 = vmatpush.bf16.msra.mxu0 %v4939_v12  ;;  %v5580_v12 = vld [vmem:[%s9133_s5 + $0x56c] sm:$0xf0] }
 0x2ef   :  { %3746 = vmatpush.bf16.msra.mxu2 %v5387_v14  ;;  %3755 = vmatpush.bf16.msra.mxu3 %v5723_v19  ;;  %v5475_v14 = vor.u32 %v6165_v6, %v5474_v4  ;;  %v5446_v19 = vld [vmem:[%s9133_s5 + $0x440] sm:$0xf]  ;;  %v5583_v26 = vor.u32 %v6189_v53, %v5580_v12  ;;  %v6221_v4 = vld [vmem:[%s9133_s5 + $0x650] sm:$0xf0]  ;;  %v4915_v6 = vor.u32 %v6025_v63, %v4914_v62 }
 0x2f0   :  { %3779 = vmatpush.bf16.msrb.mxu1 %v5335_v9  ;;  %v6095_v9 = vld [vmem:[%s9133_s5 + $0x260] sm:$0xf0]  ;;  %v5447_v57 = vor.u32 %v6158_v20, %v5446_v19  ;;  %v2289_v20 = vperm.slane %v9012_v25, 1 }
 0x2f1   :  { %3735 = vmatmul.bf16.vlgmr.msra.gmra.mxu1 %v8103_v60  ;;  %v5195_v15 = vor.u32 %v6095_v9, %v5194_v8 }
 0x2f2   :  { %3721 = vmatpush.bf16.msra.mxu0 %v4911_v27  ;;  %v8968_v5 = vpop.f32.mrf.mxu0  ;;  %v5783_v27 = vor.u32 %v6242_v22, %v5782_v21 }
 0x2f3   :  { %3747 = vmatpush.bf16.msra.mxu2 %v5359_v30  ;;  %3756 = vmatpush.bf16.msra.mxu3 %v5695_v28  ;;  %v4970_v30 = vld [vmem:[%s9133_s5 + $0x88] sm:$0xf]  ;;  %v6039_v28 = vld [vmem:[%s9133_s5 + $0xa0] sm:$0xf0]  ;;  %v3464_v54 = vadd.f32 %v8968_v5, %v2288_v38 }
 0x2f4   :  { %3780 = vmatpush.bf16.msrb.mxu1 %v5307_v24  ;;  %v3478_v10 = vpop.f32.mrf.mxu1  ;;  %v5166_v24 = vld [vmem:[%s9133_s5 + $0x210] sm:$0xf]  ;;  %v4971_v40 = vor.u32 %v6039_v28, %v4970_v30 }
 0x2f5   :  { %3722 = vmatmul.bf16.vlgmr.msra.gmra.mxu0 %v8130_v13  ;;  %v5167_v32 = vor.u32 %v6088_v17, %v5166_v24  ;;  %v3477_v8 = vadd.f32 %v8925_v41, %v3464_v54  ;;  %v5699_v10 = vor.u32 %v6221_v4, %v5698_v3  ;;  %v5614_v24 = vld [vmem:[%s9133_s5 + $0x590] sm:$0xf]  ;;  %v6200_v17 = vld [vmem:[%s9133_s5 + $0x5a8] sm:$0xf0] }
 0x2f6   :  { %3766 = vmatpush.bf16.msrb.mxu0 %v5111_v29  ;;  %3748 = vmatmul.bf16.vlgmr.msra.gmra.mxu2 %v8138_v7  ;;  %v5418_v29 = vld [vmem:[%s9133_s5 + $0x408] sm:$0xf] }
 0x2f7   :  { %3792 = vmatpush.bf16.msrb.mxu2 %v5559_v35  ;;  %3757 = vmatpush.bf16.msra.mxu3 %v5667_v42  ;;  %v6151_v35 = vld [vmem:[%s9133_s5 + $0x420] sm:$0xf0] }
 0x2f8   :  { %3781 = vmatpush.bf16.msrb.mxu1 %v5279_v33  ;;  %v5754_v33 = vld [vmem:[%s9133_s5 + $0x6a8] sm:$0xf]  ;;  %v5419_v42 = vor.u32 %v6151_v35, %v5418_v29 }
 0x2f9   :  { %v3489_v51 = vpop.f32.mrf.mxu2 }
 0x2fa   :  { %3767 = vmatpush.bf16.msrb.mxu0 %v5083_v43  ;;  %v3465_v31 = vpop.f32.mrf.mxu0  ;;  %v5755_v43 = vor.u32 %v6235_v34, %v5754_v33  ;;  %v3490_v53 = vadd.f32 %v3489_v51, %v3477_v8  ;;  %v5615_v51 = vor.u32 %v6200_v17, %v5614_v24 }
 0x2fb   :  { %3793 = vmatpush.bf16.msrb.mxu2 %v5531_v46  ;;  %3758 = vmatpush.bf16.msra.mxu3 %v5639_v58  ;;  %v5390_v46 = vld [vmem:[%s9133_s5 + $0x3d0] sm:$0xf] }
 0x2fc   :  { %3782 = vmatpush.bf16.msrb.mxu1 %v5251_v47  ;;  %v9039_v39 = vpop.f32.mrf.mxu1  ;;  %v5139_v47 = vor.u32 %v6081_v37, %v5138_v36  ;;  %v5391_v58 = vor.u32 %v6144_v48, %v5390_v46 }
 0x2fe   :  { %3768 = vmatpush.bf16.msrb.mxu0 %v5055_v59  ;;  %v5727_v59 = vor.u32 %v6228_v50, %v5726_v49 }
 0x2ff   :  { %3794 = vmatpush.bf16.msrb.mxu2 %v5503_v0  ;;  %3759 = vmatpush.bf16.msra.mxu3 %v5611_v11  ;;  %v5362_v0 = vld [vmem:[%s9133_s5 + $0x398] sm:$0xf]  ;;  %v5670_v11 = vld [vmem:[%s9133_s5 + $0x600] sm:$0xf] }
 0x300   :  { %3783 = vmatpush.bf16.msrb.mxu1 %v5223_v1  ;;  %v5363_v9 = vor.u32 %v6137_v2, %v5362_v0 }
 0x301   :  { %v3491_v56 = vpop.f32.mrf.mxu2 }
 0x302   :  { %3769 = vmatpush.bf16.msrb.mxu0 %v5027_v55  ;;  %v3515_v1 = vpop.f32.mrf.mxu0  ;;  %v6214_v55 = vld [vmem:[%s9133_s5 + $0x618] sm:$0xf0] }
 0x303   :  { %3795 = vmatpush.bf16.msrb.mxu2 %v5475_v14  ;;  %3760 = vmatpush.bf16.msra.mxu3 %v5583_v26 }
 0x304   :  { %3784 = vmatpush.bf16.msrb.mxu1 %v5195_v15  ;;  %v3530_v5 = vpop.f32.mrf.mxu1  ;;  %v5671_v15 = vor.u32 %v6214_v55, %v5670_v11 }
 0x306   :  { %3770 = vmatpush.bf16.msrb.mxu0 %v4999_v23  ;;  %3761 = vmatmul.bf16.vlgmr.msra.gmra.mxu3 %v8216_v61  ;;  %v3516_v23 = vadd.f32 %v3515_v1, %v2289_v20 }
 0x307   :  { %3796 = vmatpush.bf16.msrb.mxu2 %v5447_v57  ;;  %3805 = vmatpush.bf16.msrb.mxu3 %v5783_v27  ;;  %v6193_v57 = vld [vmem:[%s9133_s5 + $0x570] sm:$0xf0] }
 0x308   :  { %3785 = vmatpush.bf16.msrb.mxu1 %v5167_v32  ;;  %v3502_v12 = vpop.f32.mrf.mxu3  ;;  %v3529_v28 = vadd.f32 %v9039_v39, %v3516_v23 }
 0x309   :  { %v3503_v41 = vadd.f32 %v3502_v12, %v3490_v53  ;;  %v3541_v14 = vpop.f32.mrf.mxu2 }
 0x30a   :  { %3771 = vmatpush.bf16.msrb.mxu0 %v4971_v40  ;;  %v3517_v16 = vpop.f32.mrf.mxu0  ;;  %v3542_v35 = vadd.f32 %v3541_v14, %v3529_v28 }
 0x30b   :  { %3797 = vmatpush.bf16.msrb.mxu2 %v5419_v42  ;;  %3806 = vmatpush.bf16.msrb.mxu3 %v5755_v43  ;;  %v5784_v19 = vmul.f32 -1.442695, %v3503_v41 }
 0x30c   :  { %3786 = vmatpush.bf16.msrb.mxu1 %v5139_v47  ;;  %v2290_v47 = vperm.slane %v9012_v25, 2 }
 0x30d   :  { %6246 = vpow2.f32 %v5784_v19 }
 0x30e   :  { %3772 = vmatpush.bf16.msrb.mxu0 %v4943_v52  ;;  %v3580_v21 = vpop.f32.mrf.mxu1 }
 0x30f   :  { %3798 = vmatpush.bf16.msrb.mxu2 %v5391_v58  ;;  %3807 = vmatpush.bf16.msrb.mxu3 %v5727_v59 }
 0x310   :  { %3787 = vmatmul.bf16.vlgmr.msrb.gmra.mxu1 %v8103_v60  ;;  %v5642_v60 = vld [vmem:[%s9133_s5 + $0x5c8] sm:$0xf]  ;;  %v3504_v26 = vpop.f32.mrf.mxu3 }
 0x311   :  { %v5643_v22 = vor.u32 %v6207_v18, %v5642_v60  ;;  %v2291_v18 = vperm.slane %v9012_v25, 3 }
 0x312   :  { %3773 = vmatpush.bf16.msrb.mxu0 %v4915_v6  ;;  %v3567_v30 = vpop.f32.mrf.mxu0 }
 0x313   :  { %3799 = vmatpush.bf16.msrb.mxu2 %v5363_v9  ;;  %3808 = vmatpush.bf16.msrb.mxu3 %v5699_v10  ;;  %v6247_v27 = vpop.eup %6246  ;;  %v3568_v54 = vadd.f32 %v3567_v30, %v2290_v47 }
 0x314   :  { %v3839_v32 = vadd.f32 1.0, %v6247_v27 }
 0x315   :  { %3774 = vmatmul.bf16.vlgmr.msrb.gmra.mxu0 %v8130_v13  ;;  %v3543_v13 = vpop.f32.mrf.mxu2  ;;  %v3581_v63 = vadd.f32 %v3580_v21, %v3568_v54 }
 0x316   :  { %3800 = vmatmul.bf16.vlgmr.msrb.gmra.mxu2 %v8138_v7  ;;  %v5586_v7 = vld [vmem:[%s9133_s5 + $0x558] sm:$0xf]  ;;  %v3582_v29 = vpop.f32.mrf.mxu1  ;;  %6248 = vrcp.f32 %v3839_v32  ;;  %vm3851_vm5 = vweird.f32 %v3839_v32  ;;  %v3857_v59 = vand.u32 2147483648, %v3839_v32  ;;  %v3855_v1 = vand.u32 2147483647, %v3839_v32 }
 0x317   :  { %3809 = vmatpush.bf16.msrb.mxu3 %v5671_v15  ;;  %v5587_v31 = vor.u32 %v6193_v57, %v5586_v7 }
 0x318   :  { %v3554_v33 = vpop.f32.mrf.mxu3  ;;  %v3858_v10 = vor.u32 1.1754944e-38, %v3857_v59  ;;  %vm3856_vm10 = vcmp.eq.f32.partialorder %v3855_v1, 8.507059e+37 }
 0x319   :  { %v3555_v34 = vadd.f32 %v3554_v33, %v3542_v35 }
 0x31a   :  { %v3569_v38 = vpop.f32.mrf.mxu0 }
 0x31b   :  { %3810 = vmatpush.bf16.msrb.mxu3 %v5643_v22  ;;  %v5785_v37 = vmul.f32 -1.442695, %v3555_v34 }
 0x31c   :  { %v6249_v40 = vpop.eup %6248 }
 0x31d   :  { %v3593_v36 = vpop.f32.mrf.mxu2  ;;  %6250 = vpow2.f32 %v5785_v37  ;;  %v3847_v39 = vmul.f32 %v6249_v40, %v3839_v32  ;;  %vm3852_vm4 = vweird.f32 %v6249_v40 }
 0x31e   :  { %vm3853_vm7 = vmor %vm3851_vm5, %vm3852_vm4  ;;  %v3594_v5 = vadd.f32 %v3593_v36, %v3581_v63 }
 0x31f   :  { %3811 = vmatpush.bf16.msrb.mxu3 %v5615_v51  ;;  %v3848_v46 = vsub.f32 1.0, %v3847_v39 }
 0x320   :  { %v3556_v42 = vpop.f32.mrf.mxu3 }
 0x321   :  { %v3849_v50 = vmul.f32 %v6249_v40, %v3848_v46 }
 0x323   :  { %3812 = vmatpush.bf16.msrb.mxu3 %v5587_v31  ;;  %v6251_v44 = vpop.eup %6250  ;;  %v3850_v58 = vadd.f32 %v6249_v40, %v3849_v50 }
 0x324   :  { %v3840_v45 = vadd.f32 1.0, %v6251_v44 }
 0x325   :  { %v3595_v43 = vpop.f32.mrf.mxu2  ;;  %v3854_v8 = vsel %vm3853_vm7, %v6249_v40, %v3850_v58 }
 0x326   :  { %3813 = vmatmul.bf16.vlgmr.msrb.gmra.mxu3 %v8216_v61  ;;  %6252 = vrcp.f32 %v3840_v45  ;;  %v3872_v62 = vand.u32 2147483648, %v3840_v45  ;;  %v3870_v3 = vand.u32 2147483647, %v3840_v45  ;;  %vm3866_vm8 = vweird.f32 %v3840_v45 }
 0x327   :  { %v3859_v12 = vsel %vm3856_vm10, %v3858_v10, %v3854_v8  ;;  %v2293_v10 = vperm.slane %v9012_v25, 5 }
 0x328   :  { %v3873_v11 = vor.u32 1.1754944e-38, %v3872_v62  ;;  %vm3871_vm11 = vcmp.eq.f32.partialorder %v3870_v3, 8.507059e+37 }
 0x329   :  { %v3606_v48 = vpop.f32.mrf.mxu3 }
 0x32a   :  { %v3607_v55 = vadd.f32 %v3606_v48, %v3594_v5 }
 0x32c   :  { %v6253_v52 = vpop.eup %6252  ;;  %v5786_v16 = vmul.f32 -1.442695, %v3607_v55 }
 0x32d   :  { %v3862_v56 = vmul.f32 %v6253_v52, %v3840_v45  ;;  %vm3867_vm6 = vweird.f32 %v6253_v52 }
 0x32e   :  { %v3632_v49 = vpop.f32.mrf.mxu1  ;;  %vm3868_vm9 = vmor %vm3866_vm8, %vm3867_vm6  ;;  %6254 = vpow2.f32 %v5786_v16 }
 0x32f   :  { %v3863_v61 = vsub.f32 1.0, %v3862_v56 }
 0x331   :  { %v3864_v2 = vmul.f32 %v6253_v52, %v3863_v61  ;;  %v3608_v4 = vpop.f32.mrf.mxu3 }
 0x332   :  { %v3619_v0 = vpop.f32.mrf.mxu0 }
 0x333   :  { %v3865_v9 = vadd.f32 %v6253_v52, %v3864_v2  ;;  %v3620_v20 = vadd.f32 %v3619_v0, %v2291_v18 }
 0x334   :  { %v6255_v21 = vpop.eup %6254 }
 0x335   :  { %v3869_v53 = vsel %vm3868_vm9, %v6253_v52, %v3865_v9  ;;  %v3633_v22 = vadd.f32 %v3632_v49, %v3620_v20  ;;  %v3841_v24 = vadd.f32 1.0, %v6255_v21  ;;  %v2292_v52 = vperm.slane %v9012_v25, 4 }
 0x336   :  { %v3634_v6 = vpop.f32.mrf.mxu1  ;;  %v3874_v41 = vsel %vm3871_vm11, %v3873_v11, %v3869_v53 }
 0x337   :  { %v3951_v15 = vpack.c.bf16 %v3874_v41, %v3859_v12  ;;  %6256 = vrcp.f32 %v3841_v24  ;;  %vm3881_vm13 = vweird.f32 %v3841_v24  ;;  %v3887_v43 = vand.u32 2147483648, %v3841_v24 }
 0x338   :  { %v3885_v39 = vand.u32 2147483647, %v3841_v24 }
 0x339   :  { %v3645_v14 = vpop.f32.mrf.mxu2  ;;  %3955 = vst [vmem:[%s9135_s7] sm:$0xff] %v3951_v15  ;;  %v3888_v49 = vor.u32 1.1754944e-38, %v3887_v43 }
 0x33a   :  { %v3621_v60 = vpop.f32.mrf.mxu0  ;;  %v3646_v17 = vadd.f32 %v3645_v14, %v3633_v22  ;;  %vm3886_vm2 = vcmp.eq.f32.partialorder %v3885_v39, 8.507059e+37 }
 0x33d   :  { %v6257_v57 = vpop.eup %6256 }
 0x33e   :  { %v3877_v29 = vmul.f32 %v6257_v57, %v3841_v24  ;;  %vm3882_vm12 = vweird.f32 %v6257_v57 }
 0x33f   :  { %vm3883_vm15 = vmor %vm3881_vm13, %vm3882_vm12 }
 0x340   :  { %v3878_v33 = vsub.f32 1.0, %v3877_v29 }
 0x341   :  { %v3647_v19 = vpop.f32.mrf.mxu2 }
 0x342   :  { %v3879_v34 = vmul.f32 %v6257_v57, %v3878_v33 }
 0x344   :  { %v3880_v40 = vadd.f32 %v6257_v57, %v3879_v34 }
 0x346   :  { %v3884_v47 = vsel %vm3883_vm15, %v6257_v57, %v3880_v40 }
 0x347   :  { %v3889_v58 = vsel %vm3886_vm2, %v3888_v49, %v3884_v47 }
 0x349   :  { %v3658_v26 = vpop.f32.mrf.mxu3 }
 0x34a   :  { %v3659_v23 = vadd.f32 %v3658_v26, %v3646_v17 }
 0x34c   :  { %v5787_v51 = vmul.f32 -1.442695, %v3659_v23 }
 0x34e   :  { %v3684_v13 = vpop.f32.mrf.mxu1  ;;  %6258 = vpow2.f32 %v5787_v51 }
 0x351   :  { %v3660_v27 = vpop.f32.mrf.mxu3 }
 0x352   :  { %v3671_v7 = vpop.f32.mrf.mxu0 }
 0x353   :  { %v3672_v63 = vadd.f32 %v3671_v7, %v2292_v52  ;;  %v2294_v7 = vperm.slane %v9012_v25, 6 }
 0x354   :  { %v6259_v28 = vpop.eup %6258 }
 0x355   :  { %v3842_v31 = vadd.f32 1.0, %v6259_v28  ;;  %v3685_v0 = vadd.f32 %v3684_v13, %v3672_v63 }
 0x356   :  { %v3686_v30 = vpop.f32.mrf.mxu1 }
 0x357   :  { %6260 = vrcp.f32 %v3842_v31  ;;  %v3902_v44 = vand.u32 2147483648, %v3842_v31  ;;  %v3900_v46 = vand.u32 2147483647, %v3842_v31  ;;  %vm3896_vm0 = vweird.f32 %v3842_v31 }
 0x359   :  { %v3697_v32 = vpop.f32.mrf.mxu2  ;;  %v3903_v50 = vor.u32 1.1754944e-38, %v3902_v44  ;;  %vm3901_vm3 = vcmp.eq.f32.partialorder %v3900_v46, 8.507059e+37 }
 0x35a   :  { %v3673_v35 = vpop.f32.mrf.mxu0  ;;  %v3698_v3 = vadd.f32 %v3697_v32, %v3685_v0 }
 0x35d   :  { %v6261_v36 = vpop.eup %6260 }
 0x35e   :  { %v3892_v37 = vmul.f32 %v6261_v36, %v3842_v31  ;;  %vm3897_vm14 = vweird.f32 %v6261_v36 }
 0x35f   :  { %vm3898_vm1 = vmor %vm3896_vm0, %vm3897_vm14  ;;  %vm3958_vm0 = vcmask 125952  }
 0x360   :  { %v3893_v42 = vsub.f32 1.0, %v3892_v37 }
 0x361   :  { %v3699_v38 = vpop.f32.mrf.mxu2 }
 0x362   :  { %v3894_v45 = vmul.f32 %v6261_v36, %v3893_v42 }
 0x364   :  { %v3895_v48 = vadd.f32 %v6261_v36, %v3894_v45 }
 0x366   :  { %v3899_v54 = vsel %vm3898_vm1, %v6261_v36, %v3895_v48 }
 0x367   :  { %v3904_v61 = vsel %vm3901_vm3, %v3903_v50, %v3899_v54 }
 0x368   :  { %v3952_v62 = vpack.c.bf16 %v3904_v61, %v3889_v58 }
 0x369   :  { %v3710_v56 = vpop.f32.mrf.mxu3 }
 0x36a   :  { %3956 = vst [vmem:[%s9135_s7 + $0x8] sm:$0xff] %v3952_v62  ;;  %v3711_v5 = vadd.f32 %v3710_v56, %v3698_v3 }
 0x36c   :  { %v5788_v8 = vmul.f32 -1.442695, %v3711_v5 }
 0x36e   :  { %v3736_v59 = vpop.f32.mrf.mxu1  ;;  %6262 = vpow2.f32 %v5788_v8 }
 0x371   :  { %v3712_v2 = vpop.f32.mrf.mxu3 }
 0x372   :  { %v3723_v1 = vpop.f32.mrf.mxu0 }
 0x373   :  { %v3724_v55 = vadd.f32 %v3723_v1, %v2293_v10 }
 0x374   :  { %v6263_v53 = vpop.eup %6262 }
 0x375   :  { %v3737_v12 = vadd.f32 %v3736_v59, %v3724_v55  ;;  %v3843_v41 = vadd.f32 1.0, %v6263_v53 }
 0x376   :  { %v3738_v4 = vpop.f32.mrf.mxu1 }
 0x377   :  { %6264 = vrcp.f32 %v3843_v41  ;;  %vm3911_vm5 = vweird.f32 %v3843_v41  ;;  %v3917_v35 = vand.u32 2147483648, %v3843_v41  ;;  %v3915_v34 = vand.u32 2147483647, %v3843_v41 }
 0x379   :  { %v3749_v6 = vpop.f32.mrf.mxu2  ;;  %v3918_v25 = vor.u32 1.1754944e-38, %v3917_v35  ;;  %vm3916_vm10 = vcmp.eq.f32.partialorder %v3915_v34, 8.507059e+37 }
 0x37a   :  { %v3725_v9 = vpop.f32.mrf.mxu0  ;;  %v3750_v14 = vadd.f32 %v3749_v6, %v3737_v12 }
 0x37d   :  { %v6265_v20 = vpop.eup %6264 }
 0x37e   :  { %v3907_v17 = vmul.f32 %v6265_v20, %v3843_v41  ;;  %vm3912_vm4 = vweird.f32 %v6265_v20 }
 0x37f   :  { %vm3913_vm7 = vmor %vm3911_vm5, %vm3912_vm4 }
 0x380   :  { %v3908_v51 = vsub.f32 1.0, %v3907_v17 }
 0x381   :  { %v3751_v11 = vpop.f32.mrf.mxu2 }
 0x382   :  { %v3909_v57 = vmul.f32 %v6265_v20, %v3908_v51 }
 0x384   :  { %v3910_v31 = vadd.f32 %v6265_v20, %v3909_v57 }
 0x386   :  { %v3914_v40 = vsel %vm3913_vm7, %v6265_v20, %v3910_v31 }
 0x387   :  { %v3919_v46 = vsel %vm3916_vm10, %v3918_v25, %v3914_v40 }
 0x389   :  { %v3762_v15 = vpop.f32.mrf.mxu3 }
 0x38a   :  { %v3763_v16 = vadd.f32 %v3762_v15, %v3750_v14 }
 0x38c   :  { %v5789_v18 = vmul.f32 -1.442695, %v3763_v16 }
 0x38d   :  { %v3788_v60 = vpop.f32.mrf.mxu1 }
 0x38e   :  { %6266 = vpow2.f32 %v5789_v18 }
 0x391   :  { %v3764_v21 = vpop.f32.mrf.mxu3 }
 0x392   :  { %v3775_v19 = vpop.f32.mrf.mxu0 }
 0x393   :  { %v3776_v29 = vadd.f32 %v3775_v19, %v2294_v7 }
 0x394   :  { %v6267_v24 = vpop.eup %6266 }
 0x395   :  { %v3790_v22 = vpop.f32.mrf.mxu1  ;;  %v3844_v26 = vadd.f32 1.0, %v6267_v24  ;;  %v3789_v38 = vadd.f32 %v3788_v60, %v3776_v29 }
 0x397   :  { %6268 = vrcp.f32 %v3844_v26  ;;  %v3932_v33 = vand.u32 2147483648, %v3844_v26  ;;  %v3930_v37 = vand.u32 2147483647, %v3844_v26  ;;  %vm3926_vm8 = vweird.f32 %v3844_v26 }
 0x399   :  { %v3801_v23 = vpop.f32.mrf.mxu2  ;;  %v3933_v43 = vor.u32 1.1754944e-38, %v3932_v33  ;;  %vm3931_vm11 = vcmp.eq.f32.partialorder %v3930_v37, 8.507059e+37 }
 0x39a   :  { %v3777_v13 = vpop.f32.mrf.mxu0  ;;  %v3802_v44 = vadd.f32 %v3801_v23, %v3789_v38 }
 0x39d   :  { %v6269_v27 = vpop.eup %6268 }
 0x39e   :  { %v3922_v30 = vmul.f32 %v6269_v27, %v3844_v26  ;;  %vm3927_vm6 = vweird.f32 %v6269_v27 }
 0x39f   :  { %vm3928_vm9 = vmor %vm3926_vm8, %vm3927_vm6 }
 0x3a0   :  { %v3923_v32 = vsub.f32 1.0, %v3922_v30 }
 0x3a1   :  { %v3803_v28 = vpop.f32.mrf.mxu2 }
 0x3a2   :  { %v3924_v36 = vmul.f32 %v6269_v27, %v3923_v32 }
 0x3a4   :  { %v3925_v42 = vadd.f32 %v6269_v27, %v3924_v36 }
 0x3a6   :  { %v3929_v39 = vsel %vm3928_vm9, %v6269_v27, %v3925_v42 }
 0x3a7   :  { %v3934_v47 = vsel %vm3931_vm11, %v3933_v43, %v3929_v39 }
 0x3a8   :  { %v3953_v49 = vpack.c.bf16 %v3934_v47, %v3919_v46 }
 0x3a9   :  { %v3814_v45 = vpop.f32.mrf.mxu3 }
 0x3aa   :  { %v3815_v48 = vadd.f32 %v3814_v45, %v3802_v44  ;;  %3957 = vst [vmem:[%s9135_s7 + $0x10] sm:$0xff] %v3953_v49 }
 0x3ac   :  { %v5790_v50 = vmul.f32 -1.442695, %v3815_v48 }
 0x3ae   :  { %6270 = vpow2.f32 %v5790_v50 }
 0x3b1   :  { %v3816_v52 = vpop.f32.mrf.mxu3 }
 0x3b4   :  { %v6271_v54 = vpop.eup %6270 }
 0x3b5   :  { %v3845_v56 = vadd.f32 1.0, %v6271_v54 }
 0x3b7   :  { %6272 = vrcp.f32 %v3845_v56  ;;  %v3947_v62 = vand.u32 2147483648, %v3845_v56  ;;  %v3945_v0 = vand.u32 2147483647, %v3845_v56  ;;  %vm3941_vm13 = vweird.f32 %v3845_v56 }
 0x3b9   :  { %v3948_v2 = vor.u32 1.1754944e-38, %v3947_v62  ;;  %vm3946_vm15 = vcmp.eq.f32.partialorder %v3945_v0, 8.507059e+37 }
 0x3bd   :  { %v6273_v58 = vpop.eup %6272 }
 0x3be   :  { %v3937_v61 = vmul.f32 %v6273_v58, %v3845_v56  ;;  %vm3942_vm12 = vweird.f32 %v6273_v58 }
 0x3bf   :  { %vm3943_vm14 = vmor %vm3941_vm13, %vm3942_vm12 }
 0x3c0   :  { %v3938_v59 = vsub.f32 1.0, %v3937_v61 }
 0x3c2   :  { %v3939_v63 = vmul.f32 %v6273_v58, %v3938_v59 }
 0x3c4   :  { %v3940_v1 = vadd.f32 %v6273_v58, %v3939_v63 }
 0x3c6   :  { %v3944_v3 = vsel %vm3943_vm14, %v6273_v58, %v3940_v1 }
 0x3c7   :  { %v3949_v4 = vsel %vm3946_vm15, %v3948_v2, %v3944_v3 }
 0x3c8   :  { %v3954_v5 = vpack.c.bf16 %v3949_v4, %v3949_v4 }
 0x3ca   :  { %3959 = vst.msk [vmem:[%s9135_s7 + $0x18] sm:$0xf] %vm3958_vm0, %v3954_v5 }

</bundles_post_ra>
